<compile_context>
chip_gen: v6e
topology: v6e:2x2x1
jax: 0.10.0
libtpu: 0.0.40
codegen_flags: <defaults>
</compile_context>

<pallas_src>
import functools

import jax
import jax.numpy as jnp
from jax import lax
from jax.experimental import pallas as pl
from jax.experimental.pallas import tpu as pltpu


# ----------------------------------------------------------------------------
# Small helpers
# ----------------------------------------------------------------------------
def _round_up(x, m):
    return (x + m - 1) // m * m


def _apply_act(x, act):
    if act == "relu":
        return jnp.maximum(x, 0.0)
    if act == "sigmoid":
        return jax.nn.sigmoid(x)
    return x


# ----------------------------------------------------------------------------
# Pallas kernel: Y = act(A @ W + b), f32 accumulation on the MXU
# ----------------------------------------------------------------------------
_MIN_PALLAS_ROWS = 256   # below this, pallas_call launch overhead dominates


def _gemm_bias_act_kernel(a_ref, w_ref, b_ref, o_ref, *, act):
    acc = jnp.dot(a_ref[...], w_ref[...], preferred_element_type=jnp.float32)
    acc = acc + b_ref[...]                      # (1, Cp) broadcasts over rows
    acc = _apply_act(acc, act)
    o_ref[...] = acc.astype(o_ref.dtype)


def _gemm_bias_act(a, w, b, act, out_dtype):
    """act(a @ w + b).  a:[M,Kp], w:[Kp,Cp], b:[1,Cp] f32;  Kp,Cp % 128 == 0."""
    M, Kp = a.shape
    Cp = w.shape[1]

    if M < _MIN_PALLAS_ROWS:
        # Tiny GEMM: let XLA fuse dot + bias + act; skip the custom-call boundary.
        acc = jnp.dot(a, w, preferred_element_type=jnp.float32) + b
        return _apply_act(acc, act).astype(out_dtype)

    if M >= 1024:
        bm = 512          # >= 2 blocks -> both v7x TCs; still big for v5e/v6e
    elif M >= 512:
        bm = 256
    else:
        bm = _round_up(M, 32)
    Mp = _round_up(M, bm)
    if Mp != M:
        a = jnp.pad(a, ((0, Mp - M), (0, 0)))

    out = pl.pallas_call(
        functools.partial(_gemm_bias_act_kernel, act=act),
        out_shape=jax.ShapeDtypeStruct((Mp, Cp), out_dtype),
        grid=(Mp // bm,),
        in_specs=[
            pl.BlockSpec((bm, Kp), lambda i: (i, 0)),   # A tile streams
            pl.BlockSpec((Kp, Cp), lambda i: (0, 0)),   # W resident
            pl.BlockSpec((1, Cp), lambda i: (0, 0)),    # bias resident
        ],
        out_specs=pl.BlockSpec((bm, Cp), lambda i: (i, 0)),
        compiler_params=pltpu.CompilerParams(
            dimension_semantics=("parallel",)),
    )(a, w, b)
    return out[:M] if Mp != M else out


# ----------------------------------------------------------------------------
# im2col on NHWC tensors (column order: kernel-row i, kernel-col j, channel c)
# ----------------------------------------------------------------------------
def _im2col_nhwc(x, c_real, kh, kw, stride, k_pad, dtype):
    """x:[N,H,W,C_stored] -> ([N*Ho*Wo, k_pad], (N,Ho,Wo)); K zero-padded."""
    N, H, W, _ = x.shape
    Ho = (H - kh) // stride + 1
    Wo = (W - kw) // stride + 1
    cols = []
    for i in range(kh):
        for j in range(kw):
            cols.append(x[:, i:i + (Ho - 1) * stride + 1:stride,
                             j:j + (Wo - 1) * stride + 1:stride, :c_real])
    K = kh * kw * c_real
    if k_pad > K:
        cols.append(jnp.zeros((N, Ho, Wo, k_pad - K), x.dtype))
    patches = cols[0] if len(cols) == 1 else jnp.concatenate(cols, axis=-1)
    return patches.astype(dtype).reshape(N * Ho * Wo, k_pad), (N, Ho, Wo)


# ----------------------------------------------------------------------------
# Layers (all NHWC; channel dim padded to a multiple of 128 between layers)
# ----------------------------------------------------------------------------
def conv2d_nhwc(x, p, act, out_dtype):
    a, (N, Ho, Wo) = _im2col_nhwc(x, p["cin"], p["kh"], p["kw"], p["stride"],
                                  p["k_pad"], p["dtype"])
    y = _gemm_bias_act(a, p["w"], p["b"], act, out_dtype)
    return y.reshape(N, Ho, Wo, p["cout_pad"])


def _interleave_phases(blocks, s, Ho, Wo):
    """blocks[(qh,qw)] : [N, nh, nw, C] -> interleaved [N, Ho, Wo, C]."""
    if s == 1:
        return blocks[(0, 0)]
    nw_max = max(b.shape[2] for b in blocks.values())
    row_slabs = []
    for qh in range(s):
        cols = []
        for qw in range(s):
            b = blocks[(qh, qw)]
            if b.shape[2] < nw_max:
                b = jnp.pad(b, ((0, 0), (0, 0), (0, nw_max - b.shape[2]), (0, 0)))
            cols.append(b)
        slab = jnp.stack(cols, axis=3)                  # [N, nh, nw_max, s, C]
        N, nh, _, _, C = slab.shape
        row_slabs.append(slab.reshape(N, nh, nw_max * s, C)[:, :, :Wo, :])
    nh_max = max(r.shape[1] for r in row_slabs)
    row_slabs = [
        jnp.pad(r, ((0, 0), (0, nh_max - r.shape[1]), (0, 0), (0, 0)))
        if r.shape[1] < nh_max else r for r in row_slabs]
    out = jnp.stack(row_slabs, axis=2)                  # [N, nh_max, s, Wo, C]
    N, _, _, _, C = out.shape
    return out.reshape(N, nh_max * s, Wo, C)[:, :Ho, :, :]


def conv_transpose2d_nhwc(x, p, act, out_dtype):
    """Sub-pixel decomposition: one stride-1 GEMM per output phase (qh, qw)."""
    N, H, W, _ = x.shape
    s, kh, kw = p["stride"], p["kh"], p["kw"]
    cin, cp = p["cin"], p["cout_pad"]
    Ho, Wo = (H - 1) * s + kh, (W - 1) * s + kw
    xin = x[..., :cin]
    bias_fill = None
    blocks = {}
    for (qh, qw), ph in p["phases"].items():
        nh = (Ho - qh + s - 1) // s
        nw = (Wo - qw + s - 1) // s
        if ph is None:
            # Phase with no kernel taps (e.g. 1x1 kernel, stride 2): output = act(bias).
            if bias_fill is None:
                bias_fill = _apply_act(p["b"], act).astype(out_dtype)
            blocks[(qh, qw)] = jnp.broadcast_to(
                bias_fill.reshape(1, 1, 1, cp), (N, nh, nw, cp))
        else:
            lh, lw = ph["lh"], ph["lw"]
            xp = jnp.pad(xin, ((0, 0), (lh - 1, lh - 1), (lw - 1, lw - 1), (0, 0)))
            a, (_, nh2, nw2) = _im2col_nhwc(xp, cin, lh, lw, 1,
                                            ph["k_pad"], p["dtype"])
            y = _gemm_bias_act(a, ph["w"], p["b"], act, out_dtype)
            blocks[(qh, qw)] = y.reshape(N, nh2, nw2, cp)
    return _interleave_phases(blocks, s, Ho, Wo)


# ----------------------------------------------------------------------------
# One-time parameter preparation (reshape / flip / pad / cast, outside the jit)
# ----------------------------------------------------------------------------
def prep_params(raw, compute_dtype):
    prepped = {"compute_dtype": compute_dtype}

    for name, s in [("conv1", 2), ("conv2", 2), ("conv3", 2), ("conv4", 2)]:
        w, b = raw[name]                               # [Cout, Cin, kh, kw]
        cout, cin, kh, kw = w.shape
        K, kp, cp = kh * kw * cin, _round_up(kh * kw * cin, 128), _round_up(cout, 128)
        wm = jnp.transpose(w, (2, 3, 1, 0)).reshape(K, cout)      # (i, j, ci) x co
        wm = jnp.pad(wm, ((0, kp - K), (0, cp - cout))).astype(compute_dtype)
        bp = jnp.pad(b, (0, cp - cout)).astype(jnp.float32).reshape(1, cp)
        prepped[name] = dict(w=wm, b=bp, cin=cin, cout=cout, cout_pad=cp,
                             kh=kh, kw=kw, stride=s, k_pad=kp, dtype=compute_dtype)

    for name, s in [("convt1", 2), ("convt2", 2), ("convt3", 2),
                    ("convt4", 2), ("convt5", 1), ("convt6", 1)]:
        w, b = raw[name]                               # [Cin, Cout, kh, kw]
        cin, cout, kh, kw = w.shape
        cp = _round_up(cout, 128)
        bp = jnp.pad(b, (0, cp - cout)).astype(jnp.float32).reshape(1, cp)
        phases = {}
        for qh in range(s):
            for qw in range(s):
                sub = w[:, :, qh::s, qw::s]            # taps of this phase
                lh, lw = int(sub.shape[2]), int(sub.shape[3])
                if lh == 0 or lw == 0:
                    phases[(qh, qw)] = None
                    continue
                sub = sub[:, :, ::-1, ::-1]            # flip for conv form
                K, kp = lh * lw * cin, _round_up(lh * lw * cin, 128)
                wm = jnp.transpose(sub, (2, 3, 0, 1)).reshape(K, cout)
                wm = jnp.pad(wm, ((0, kp - K), (0, cp - cout))).astype(compute_dtype)
                phases[(qh, qw)] = dict(w=wm, lh=lh, lw=lw, k_pad=kp)
        prepped[name] = dict(b=bp, cin=cin, cout=cout, cout_pad=cp, kh=kh, kw=kw,
                             stride=s, phases=phases, dtype=compute_dtype)
    return prepped


# ----------------------------------------------------------------------------
# Forward pass (module I/O stays NCHW like PyTorch)
# ----------------------------------------------------------------------------
def bg_restore_net(prepped, x_nchw):
    cd = prepped["compute_dtype"]
    x = jnp.transpose(x_nchw, (0, 2, 3, 1)).astype(cd)      # NCHW -> NHWC once
    x = conv2d_nhwc(x, prepped["conv1"], "relu", cd)
    x = conv2d_nhwc(x, prepped["conv2"], "relu", cd)
    x = conv2d_nhwc(x, prepped["conv3"], "relu", cd)
    x = conv2d_nhwc(x, prepped["conv4"], "relu", cd)
    x = conv_transpose2d_nhwc(x, prepped["convt1"], "relu", cd)
    x = conv_transpose2d_nhwc(x, prepped["convt2"], "relu", cd)
    x = conv_transpose2d_nhwc(x, prepped["convt3"], "relu", cd)
    x = conv_transpose2d_nhwc(x, prepped["convt4"], "relu", cd)
    x = conv_transpose2d_nhwc(x, prepped["convt5"], "relu", cd)
    x = conv_transpose2d_nhwc(x, prepped["convt6"], "sigmoid", jnp.float32)
    x = x[..., :prepped["convt6"]["cout"]]                   # drop padded channels
    return jnp.transpose(x, (0, 3, 1, 2))                    # NHWC -> NCHW once


# ----------------------------------------------------------------------------
# Deterministic synthetic parameters (shapes per BGRestoreNet.__init__)
# ----------------------------------------------------------------------------
def init_params(key):
    conv_shapes = {"conv1": (32, 3, 8, 8), "conv2": (64, 32, 5, 5),
                   "conv3": (128, 64, 3, 3), "conv4": (256, 128, 2, 2)}
    convt_shapes = {"convt1": (256, 128, 4, 4), "convt2": (128, 64, 2, 2),
                    "convt3": (64, 64, 2, 2), "convt4": (64, 16, 1, 1),
                    "convt5": (16, 8, 2, 2), "convt6": (8, 3, 1, 1)}
    params = {}
    names = list(conv_shapes) + list(convt_shapes)
    keys = jax.random.split(key, len(names))
    for k, name in zip(keys, names):
        k1, k2 = jax.random.split(k)
        if name in conv_shapes:
            shape = conv_shapes[name]
            cout, fan_in = shape[0], shape[1] * shape[2] * shape[3]
        else:
            shape = convt_shapes[name]
            cout, fan_in = shape[1], shape[0] * shape[2] * shape[3]
        w = jax.random.normal(k1, shape, jnp.float32) / jnp.sqrt(float(fan_in))
        b = 0.01 * jax.random.normal(k2, (cout,), jnp.float32)
        params[name] = (w, b)
    return params


# ----------------------------------------------------------------------------
# Pure-JAX reference (lax.conv_general_dilated) for correctness checking
# ----------------------------------------------------------------------------
def _ref_conv(x, w, b, s):
    y = lax.conv_general_dilated(x, w, (s, s), "VALID",
                                 dimension_numbers=("NCHW", "OIHW", "NCHW"))
    return y + b[None, :, None, None]


def _ref_convt(x, w, b, s):
    cin, cout, kh, kw = w.shape
    we = jnp.transpose(w, (1, 0, 2, 3))[:, :, ::-1, ::-1]
    y = lax.conv_general_dilated(x, we, (1, 1),
                                 padding=[(kh - 1, kh - 1), (kw - 1, kw - 1)],
                                 lhs_dilation=(s, s),
                                 dimension_numbers=("NCHW", "OIHW", "NCHW"))
    return y + b[None, :, None, None]


def bg_restore_net_ref(params, x):
    x = jax.nn.relu(_ref_conv(x, *params["conv1"], 2))
    x = jax.nn.relu(_ref_conv(x, *params["conv2"], 2))
    x = jax.nn.relu(_ref_conv(x, *params["conv3"], 2))
    x = jax.nn.relu(_ref_conv(x, *params["conv4"], 2))
    x = jax.nn.relu(_ref_convt(x, *params["convt1"], 2))
    x = jax.nn.relu(_ref_convt(x, *params["convt2"], 2))
    x = jax.nn.relu(_ref_convt(x, *params["convt3"], 2))
    x = jax.nn.relu(_ref_convt(x, *params["convt4"], 2))
    x = jax.nn.relu(_ref_convt(x, *params["convt5"], 1))
    x = jax.nn.sigmoid(_ref_convt(x, *params["convt6"], 1))
    return x


if __name__ == "__main__":
    key = jax.random.PRNGKey(0)
    kp, kx = jax.random.split(key)
    raw = init_params(kp)
    # 32x32 input -> 13 -> 5 -> 2 -> 1 -> 4 -> 8 -> 16 -> 31 -> 32 -> 32
    x = jax.random.normal(kx, (2, 3, 32, 32), jnp.float32)

    ref = jax.block_until_ready(bg_restore_net_ref(raw, x))

    # Exact-math path (f32 operands) validates padding / NHWC / sub-pixel wiring.
    prep32 = prep_params(raw, jnp.float32)
    fwd32 = jax.jit(functools.partial(bg_restore_net, prep32))
    out32 = jax.block_until_ready(fwd32(x))
    assert out32.shape == (2, 3, 32, 32), out32.shape
    assert jnp.allclose(out32, ref, rtol=1e-3, atol=1e-3), (
        float(jnp.max(jnp.abs(out32 - ref))))

    # Fast path: bf16 MXU operands + bf16 inter-layer activations, f32 accumulate.
    prep16 = prep_params(raw, jnp.bfloat16)
    fwd16 = jax.jit(functools.partial(bg_restore_net, prep16))
    out16 = jax.block_until_ready(fwd16(x))
    assert out16.shape == (2, 3, 32, 32), out16.shape
    assert out16.dtype == jnp.float32
    assert float(jnp.max(jnp.abs(out16 - ref))) < 2e-2, (
        float(jnp.max(jnp.abs(out16 - ref))))

    print("KERNEL_OK")
</pallas_src>

<mosaic_0001>
module attributes {stable_mosaic.version = 11 : i64} {
  func.func @_gemm_bias_act_kernel(%arg0: i32, %arg1: memref<352x256xf32, #tpu.memory_space<vmem>>, %arg2: memref<256x128xf32, #tpu.memory_space<vmem>>, %arg3: memref<1x128xf32, #tpu.memory_space<vmem>>, %arg4: memref<352x128xf32, #tpu.memory_space<vmem>>) attributes {dimension_semantics = [#tpu.dimension_semantics<parallel>], iteration_bounds = array<i64: 1>, scalar_prefetch = 0 : i64, scratch_operands = 0 : i64, tpu.core_type = #tpu.core_type<tc>, window_params = [{transform_indices = @transform_0, window_bounds = array<i64: 352, 256>}, {pipeline_mode = #tpu.pipeline_mode<synchronous>, transform_indices = @transform_1, window_bounds = array<i64: 256, 128>}, {pipeline_mode = #tpu.pipeline_mode<synchronous>, transform_indices = @transform_2, window_bounds = array<i64: 1, 128>}, {transform_indices = @transform_3, window_bounds = array<i64: 352, 128>}]} {
    %c0 = arith.constant 0 : index
    %c0_0 = arith.constant 0 : index
    %0 = vector.load %arg1[%c0, %c0_0] : memref<352x256xf32, #tpu.memory_space<vmem>>, vector<352x256xf32>
    %c0_1 = arith.constant 0 : index
    %c0_2 = arith.constant 0 : index
    %1 = vector.load %arg2[%c0_1, %c0_2] : memref<256x128xf32, #tpu.memory_space<vmem>>, vector<256x128xf32>
    %cst = arith.constant dense<0.000000e+00> : vector<352x128xf32>
    %2 = tpu.matmul %0, %1, %cst {dimension_numbers = #tpu.dot_dimension_numbers<[1], [0], [0], [1], [0, 0, 1, 1], [], []>} : vector<352x256xf32>, vector<256x128xf32>, vector<352x128xf32> -> vector<352x128xf32>
    %c0_3 = arith.constant 0 : index
    %c0_4 = arith.constant 0 : index
    %3 = vector.load %arg3[%c0_3, %c0_4] : memref<1x128xf32, #tpu.memory_space<vmem>>, vector<1x128xf32>
    %4 = vector.broadcast %3 : vector<1x128xf32> to vector<352x128xf32>
    %5 = arith.addf %2, %4 : vector<352x128xf32>
    %cst_5 = arith.constant 0.000000e+00 : f32
    %6 = vector.broadcast %cst_5 : f32 to vector<352x128xf32>
    %7 = arith.maximumf %5, %6 : vector<352x128xf32>
    %c0_6 = arith.constant 0 : index
    %c0_7 = arith.constant 0 : index
    %8 = vector.load %arg4[%c0_6, %c0_7] : memref<352x128xf32, #tpu.memory_space<vmem>>, vector<352x128xf32>
    tpu.vector_store %arg4[%c0_6, %c0_7], %7 {strides = array<i32>} : memref<352x128xf32, #tpu.memory_space<vmem>>, vector<352x128xf32>,
    return
  }
  func.func @transform_0(%arg0: i32) -> (i32, i32) {
    %c0_i32 = arith.constant 0 : i32
    %c0_i32_0 = arith.constant 0 : i32
    return %arg0, %c0_i32 : i32, i32
  }
  func.func @transform_1(%arg0: i32) -> (i32, i32) {
    %c0_i32 = arith.constant 0 : i32
    %c0_i32_0 = arith.constant 0 : i32
    %c0_i32_1 = arith.constant 0 : i32
    return %c0_i32, %c0_i32_0 : i32, i32
  }
  func.func @transform_2(%arg0: i32) -> (i32, i32) {
    %c0_i32 = arith.constant 0 : i32
    %c0_i32_0 = arith.constant 0 : i32
    %c0_i32_1 = arith.constant 0 : i32
    return %c0_i32, %c0_i32_0 : i32, i32
  }
  func.func @transform_3(%arg0: i32) -> (i32, i32) {
    %c0_i32 = arith.constant 0 : i32
    %c0_i32_0 = arith.constant 0 : i32
    return %arg0, %c0_i32 : i32, i32
  }
}

module attributes {stable_mosaic.version = 11 : i64} {
  func.func @_gemm_bias_act_kernel(%arg0: i32, %arg1: memref<256x128xf32, #tpu.memory_space<vmem>>, %arg2: memref<128x128xf32, #tpu.memory_space<vmem>>, %arg3: memref<1x128xf32, #tpu.memory_space<vmem>>, %arg4: memref<256x128xf32, #tpu.memory_space<vmem>>) attributes {dimension_semantics = [#tpu.dimension_semantics<parallel>], iteration_bounds = array<i64: 2>, scalar_prefetch = 0 : i64, scratch_operands = 0 : i64, tpu.core_type = #tpu.core_type<tc>, window_params = [{transform_indices = @transform_0, window_bounds = array<i64: 256, 128>}, {pipeline_mode = #tpu.pipeline_mode<synchronous>, transform_indices = @transform_1, window_bounds = array<i64: 128, 128>}, {pipeline_mode = #tpu.pipeline_mode<synchronous>, transform_indices = @transform_2, window_bounds = array<i64: 1, 128>}, {transform_indices = @transform_3, window_bounds = array<i64: 256, 128>}]} {
    %c0 = arith.constant 0 : index
    %c0_0 = arith.constant 0 : index
    %0 = vector.load %arg1[%c0, %c0_0] : memref<256x128xf32, #tpu.memory_space<vmem>>, vector<256x128xf32>
    %c0_1 = arith.constant 0 : index
    %c0_2 = arith.constant 0 : index
    %1 = vector.load %arg2[%c0_1, %c0_2] : memref<128x128xf32, #tpu.memory_space<vmem>>, vector<128x128xf32>
    %cst = arith.constant dense<0.000000e+00> : vector<256x128xf32>
    %2 = tpu.matmul %0, %1, %cst {dimension_numbers = #tpu.dot_dimension_numbers<[1], [0], [0], [1], [0, 0, 1, 1], [], []>} : vector<256x128xf32>, vector<128x128xf32>, vector<256x128xf32> -> vector<256x128xf32>
    %c0_3 = arith.constant 0 : index
    %c0_4 = arith.constant 0 : index
    %3 = vector.load %arg3[%c0_3, %c0_4] : memref<1x128xf32, #tpu.memory_space<vmem>>, vector<1x128xf32>
    %4 = vector.broadcast %3 : vector<1x128xf32> to vector<256x128xf32>
    %5 = arith.addf %2, %4 : vector<256x128xf32>
    %cst_5 = arith.constant 0.000000e+00 : f32
    %6 = vector.broadcast %cst_5 : f32 to vector<256x128xf32>
    %7 = arith.maximumf %5, %6 : vector<256x128xf32>
    %c0_6 = arith.constant 0 : index
    %c0_7 = arith.constant 0 : index
    %8 = vector.load %arg4[%c0_6, %c0_7] : memref<256x128xf32, #tpu.memory_space<vmem>>, vector<256x128xf32>
    tpu.vector_store %arg4[%c0_6, %c0_7], %7 {strides = array<i32>} : memref<256x128xf32, #tpu.memory_space<vmem>>, vector<256x128xf32>,
    return
  }
  func.func @transform_0(%arg0: i32) -> (i32, i32) {
    %c0_i32 = arith.constant 0 : i32
    %c0_i32_0 = arith.constant 0 : i32
    return %arg0, %c0_i32 : i32, i32
  }
  func.func @transform_1(%arg0: i32) -> (i32, i32) {
    %c0_i32 = arith.constant 0 : i32
    %c0_i32_0 = arith.constant 0 : i32
    %c0_i32_1 = arith.constant 0 : i32
    return %c0_i32, %c0_i32_0 : i32, i32
  }
  func.func @transform_2(%arg0: i32) -> (i32, i32) {
    %c0_i32 = arith.constant 0 : i32
    %c0_i32_0 = arith.constant 0 : i32
    %c0_i32_1 = arith.constant 0 : i32
    return %c0_i32, %c0_i32_0 : i32, i32
  }
  func.func @transform_3(%arg0: i32) -> (i32, i32) {
    %c0_i32 = arith.constant 0 : i32
    %c0_i32_0 = arith.constant 0 : i32
    return %arg0, %c0_i32 : i32, i32
  }
}

module attributes {stable_mosaic.version = 11 : i64} {
  func.func @_gemm_bias_act_kernel(%arg0: i32, %arg1: memref<512x128xf32, #tpu.memory_space<vmem>>, %arg2: memref<128x128xf32, #tpu.memory_space<vmem>>, %arg3: memref<1x128xf32, #tpu.memory_space<vmem>>, %arg4: memref<512x128xf32, #tpu.memory_space<vmem>>) attributes {dimension_semantics = [#tpu.dimension_semantics<parallel>], iteration_bounds = array<i64: 4>, scalar_prefetch = 0 : i64, scratch_operands = 0 : i64, tpu.core_type = #tpu.core_type<tc>, window_params = [{transform_indices = @transform_0, window_bounds = array<i64: 512, 128>}, {pipeline_mode = #tpu.pipeline_mode<synchronous>, transform_indices = @transform_1, window_bounds = array<i64: 128, 128>}, {pipeline_mode = #tpu.pipeline_mode<synchronous>, transform_indices = @transform_2, window_bounds = array<i64: 1, 128>}, {transform_indices = @transform_3, window_bounds = array<i64: 512, 128>}]} {
    %c0 = arith.constant 0 : index
    %c0_0 = arith.constant 0 : index
    %0 = vector.load %arg1[%c0, %c0_0] : memref<512x128xf32, #tpu.memory_space<vmem>>, vector<512x128xf32>
    %c0_1 = arith.constant 0 : index
    %c0_2 = arith.constant 0 : index
    %1 = vector.load %arg2[%c0_1, %c0_2] : memref<128x128xf32, #tpu.memory_space<vmem>>, vector<128x128xf32>
    %cst = arith.constant dense<0.000000e+00> : vector<512x128xf32>
    %2 = tpu.matmul %0, %1, %cst {dimension_numbers = #tpu.dot_dimension_numbers<[1], [0], [0], [1], [0, 0, 1, 1], [], []>} : vector<512x128xf32>, vector<128x128xf32>, vector<512x128xf32> -> vector<512x128xf32>
    %c0_3 = arith.constant 0 : index
    %c0_4 = arith.constant 0 : index
    %3 = vector.load %arg3[%c0_3, %c0_4] : memref<1x128xf32, #tpu.memory_space<vmem>>, vector<1x128xf32>
    %4 = vector.broadcast %3 : vector<1x128xf32> to vector<512x128xf32>
    %5 = arith.addf %2, %4 : vector<512x128xf32>
    %cst_5 = arith.constant 0.000000e+00 : f32
    %6 = vector.broadcast %cst_5 : f32 to vector<512x128xf32>
    %7 = arith.maximumf %5, %6 : vector<512x128xf32>
    %c0_6 = arith.constant 0 : index
    %c0_7 = arith.constant 0 : index
    %8 = vector.load %arg4[%c0_6, %c0_7] : memref<512x128xf32, #tpu.memory_space<vmem>>, vector<512x128xf32>
    tpu.vector_store %arg4[%c0_6, %c0_7], %7 {strides = array<i32>} : memref<512x128xf32, #tpu.memory_space<vmem>>, vector<512x128xf32>,
    return
  }
  func.func @transform_0(%arg0: i32) -> (i32, i32) {
    %c0_i32 = arith.constant 0 : i32
    %c0_i32_0 = arith.constant 0 : i32
    return %arg0, %c0_i32 : i32, i32
  }
  func.func @transform_1(%arg0: i32) -> (i32, i32) {
    %c0_i32 = arith.constant 0 : i32
    %c0_i32_0 = arith.constant 0 : i32
    %c0_i32_1 = arith.constant 0 : i32
    return %c0_i32, %c0_i32_0 : i32, i32
  }
  func.func @transform_2(%arg0: i32) -> (i32, i32) {
    %c0_i32 = arith.constant 0 : i32
    %c0_i32_0 = arith.constant 0 : i32
    %c0_i32_1 = arith.constant 0 : i32
    return %c0_i32, %c0_i32_0 : i32, i32
  }
  func.func @transform_3(%arg0: i32) -> (i32, i32) {
    %c0_i32 = arith.constant 0 : i32
    %c0_i32_0 = arith.constant 0 : i32
    return %arg0, %c0_i32 : i32, i32
  }
}

module attributes {stable_mosaic.version = 11 : i64} {
  func.func @_gemm_bias_act_kernel(%arg0: i32, %arg1: memref<512x128xf32, #tpu.memory_space<vmem>>, %arg2: memref<128x128xf32, #tpu.memory_space<vmem>>, %arg3: memref<1x128xf32, #tpu.memory_space<vmem>>, %arg4: memref<512x128xf32, #tpu.memory_space<vmem>>) attributes {dimension_semantics = [#tpu.dimension_semantics<parallel>], iteration_bounds = array<i64: 4>, scalar_prefetch = 0 : i64, scratch_operands = 0 : i64, tpu.core_type = #tpu.core_type<tc>, window_params = [{transform_indices = @transform_0, window_bounds = array<i64: 512, 128>}, {pipeline_mode = #tpu.pipeline_mode<synchronous>, transform_indices = @transform_1, window_bounds = array<i64: 128, 128>}, {pipeline_mode = #tpu.pipeline_mode<synchronous>, transform_indices = @transform_2, window_bounds = array<i64: 1, 128>}, {transform_indices = @transform_3, window_bounds = array<i64: 512, 128>}]} {
    %c0 = arith.constant 0 : index
    %c0_0 = arith.constant 0 : index
    %0 = vector.load %arg1[%c0, %c0_0] : memref<512x128xf32, #tpu.memory_space<vmem>>, vector<512x128xf32>
    %c0_1 = arith.constant 0 : index
    %c0_2 = arith.constant 0 : index
    %1 = vector.load %arg2[%c0_1, %c0_2] : memref<128x128xf32, #tpu.memory_space<vmem>>, vector<128x128xf32>
    %cst = arith.constant dense<0.000000e+00> : vector<512x128xf32>
    %2 = tpu.matmul %0, %1, %cst {dimension_numbers = #tpu.dot_dimension_numbers<[1], [0], [0], [1], [0, 0, 1, 1], [], []>} : vector<512x128xf32>, vector<128x128xf32>, vector<512x128xf32> -> vector<512x128xf32>
    %c0_3 = arith.constant 0 : index
    %c0_4 = arith.constant 0 : index
    %3 = vector.load %arg3[%c0_3, %c0_4] : memref<1x128xf32, #tpu.memory_space<vmem>>, vector<1x128xf32>
    %4 = vector.broadcast %3 : vector<1x128xf32> to vector<512x128xf32>
    %5 = arith.addf %2, %4 : vector<512x128xf32>
    %6 = arith.negf %5 : vector<512x128xf32>
    %7 = math.exp %6 : vector<512x128xf32>
    %cst_5 = arith.constant 1.000000e+00 : f32
    %8 = vector.broadcast %cst_5 : f32 to vector<512x128xf32>
    %9 = arith.addf %8, %7 : vector<512x128xf32>
    %10 = arith.divf %8, %9 : vector<512x128xf32>
    %c0_6 = arith.constant 0 : index
    %c0_7 = arith.constant 0 : index
    %11 = vector.load %arg4[%c0_6, %c0_7] : memref<512x128xf32, #tpu.memory_space<vmem>>, vector<512x128xf32>
    tpu.vector_store %arg4[%c0_6, %c0_7], %10 {strides = array<i32>} : memref<512x128xf32, #tpu.memory_space<vmem>>, vector<512x128xf32>,
    return
  }
  func.func @transform_0(%arg0: i32) -> (i32, i32) {
    %c0_i32 = arith.constant 0 : i32
    %c0_i32_0 = arith.constant 0 : i32
    return %arg0, %c0_i32 : i32, i32
  }
  func.func @transform_1(%arg0: i32) -> (i32, i32) {
    %c0_i32 = arith.constant 0 : i32
    %c0_i32_0 = arith.constant 0 : i32
    %c0_i32_1 = arith.constant 0 : i32
    return %c0_i32, %c0_i32_0 : i32, i32
  }
  func.func @transform_2(%arg0: i32) -> (i32, i32) {
    %c0_i32 = arith.constant 0 : i32
    %c0_i32_0 = arith.constant 0 : i32
    %c0_i32_1 = arith.constant 0 : i32
    return %c0_i32, %c0_i32_0 : i32, i32
  }
  func.func @transform_3(%arg0: i32) -> (i32, i32) {
    %c0_i32 = arith.constant 0 : i32
    %c0_i32_0 = arith.constant 0 : i32
    return %arg0, %c0_i32 : i32, i32
  }
}

</mosaic_0001>

<bundles_post_ra>
// kernel: bg_restore_net.4
= control target key start
LH: loop header
LB: loop body
LE: loop exit
PB: predicated region body
PF: predicated region fallthrough
CT: control target
= control target key end

     0   :  { %v584_v0 = vmov 0.0   ;;  %s1210_s1 = inlined_call_operand.vmem [shape: f32[256,128], index: 1, kind: input, shape index: {}]   ;;  %s1211_s0 = inlined_call_operand.vmem [shape: f32[352,256], index: 0, kind: input, shape index: {}]   ;;  %s1212_s2 = inlined_call_operand.vmem [shape: f32[1,128], index: 2, kind: input, shape index: {}]   ;;  %s1213_s3 = inlined_call_operand.vmem [shape: f32[352,128], index: 3, kind: output, shape index: {}]  }
   0x1   :  { %141 = vmatprep.subr.mxu0 %v584_v0  ;;  %519 = vmatprep.subr.mxu1 %v584_v0  ;;  %v117_v1 = vld [vmem:[%s1210_s1 + $0x78] sm:$0xff]  ;;  %v116_v2 = vld [vmem:[%s1210_s1 + $0x70] sm:$0xff]  ;;  %v115_v3 = vld [vmem:[%s1210_s1 + $0x68] sm:$0xff] }
   0x2   :  { %142 = vmatpush1.msra.mxu0 %v117_v1  ;;  %551 = vmatpush1.msra.mxu1 %v117_v1  ;;  %v114_v4 = vld [vmem:[%s1210_s1 + $0x60] sm:$0xff]  ;;  %v113_v5 = vld [vmem:[%s1210_s1 + $0x58] sm:$0xff]  ;;  %v112_v6 = vld [vmem:[%s1210_s1 + $0x50] sm:$0xff] }
   0x3   :  { %143 = vmatprep.subr.mxu0 %v584_v0  ;;  %520 = vmatprep.subr.mxu1 %v584_v0  ;;  %v111_v7 = vld [vmem:[%s1210_s1 + $0x48] sm:$0xff]  ;;  %v110_v8 = vld [vmem:[%s1210_s1 + $0x40] sm:$0xff]  ;;  %v109_v9 = vld [vmem:[%s1210_s1 + $0x38] sm:$0xff] }
   0x4   :  { %144 = vmatpush1.msra.mxu0 %v116_v2  ;;  %552 = vmatpush1.msra.mxu1 %v116_v2  ;;  %v108_v10 = vld [vmem:[%s1210_s1 + $0x30] sm:$0xff]  ;;  %v107_v11 = vld [vmem:[%s1210_s1 + $0x28] sm:$0xff]  ;;  %v106_v12 = vld [vmem:[%s1210_s1 + $0x20] sm:$0xff] }
   0x5   :  { %145 = vmatprep.subr.mxu0 %v584_v0  ;;  %521 = vmatprep.subr.mxu1 %v584_v0  ;;  %v105_v13 = vld [vmem:[%s1210_s1 + $0x18] sm:$0xff]  ;;  %v104_v14 = vld [vmem:[%s1210_s1 + $0x10] sm:$0xff]  ;;  %v103_v15 = vld [vmem:[%s1210_s1 + $0x8] sm:$0xff] }
   0x6   :  { %146 = vmatpush1.msra.mxu0 %v115_v3  ;;  %553 = vmatpush1.msra.mxu1 %v115_v3  ;;  %v102_v16 = vld [vmem:[%s1210_s1] sm:$0xff]  ;;  %v133_v17 = vld [vmem:[%s1210_s1 + $0xf8] sm:$0xff]  ;;  %v132_v18 = vld [vmem:[%s1210_s1 + $0xf0] sm:$0xff] }
   0x7   :  { %147 = vmatprep.subr.mxu0 %v584_v0  ;;  %522 = vmatprep.subr.mxu1 %v584_v0  ;;  %v131_v19 = vld [vmem:[%s1210_s1 + $0xe8] sm:$0xff]  ;;  %v130_v20 = vld [vmem:[%s1210_s1 + $0xe0] sm:$0xff]  ;;  %v129_v21 = vld [vmem:[%s1210_s1 + $0xd8] sm:$0xff] }
   0x8   :  { %148 = vmatpush1.msra.mxu0 %v114_v4  ;;  %554 = vmatpush1.msra.mxu1 %v114_v4  ;;  %v128_v22 = vld [vmem:[%s1210_s1 + $0xd0] sm:$0xff]  ;;  %v127_v23 = vld [vmem:[%s1210_s1 + $0xc8] sm:$0xff]  ;;  %v126_v24 = vld [vmem:[%s1210_s1 + $0xc0] sm:$0xff] }
   0x9   :  { %149 = vmatprep.subr.mxu0 %v584_v0  ;;  %523 = vmatprep.subr.mxu1 %v584_v0  ;;  %v125_v25 = vld [vmem:[%s1210_s1 + $0xb8] sm:$0xff]  ;;  %v124_v26 = vld [vmem:[%s1210_s1 + $0xb0] sm:$0xff]  ;;  %v123_v27 = vld [vmem:[%s1210_s1 + $0xa8] sm:$0xff] }
   0xa   :  { %150 = vmatpush1.msra.mxu0 %v113_v5  ;;  %555 = vmatpush1.msra.mxu1 %v113_v5  ;;  %v122_v28 = vld [vmem:[%s1210_s1 + $0xa0] sm:$0xff]  ;;  %v121_v29 = vld [vmem:[%s1210_s1 + $0x98] sm:$0xff]  ;;  %v120_v30 = vld [vmem:[%s1210_s1 + $0x90] sm:$0xff] }
   0xb   :  { %151 = vmatprep.subr.mxu0 %v584_v0  ;;  %524 = vmatprep.subr.mxu1 %v584_v0  ;;  %v119_v31 = vld [vmem:[%s1210_s1 + $0x88] sm:$0xff]  ;;  %v118_v32 = vld [vmem:[%s1210_s1 + $0x80] sm:$0xff]  ;;  %v17_v37 = vld [vmem:[%s1211_s0 + $0x18] sm:$0xff] }
   0xc   :  { %152 = vmatpush1.msra.mxu0 %v112_v6  ;;  %556 = vmatpush1.msra.mxu1 %v112_v6  ;;  %v15_v33 = vld [vmem:[%s1211_s0 + $0x8] sm:$0xff]  ;;  %v14_v35 = vld [vmem:[%s1211_s0] sm:$0xff]  ;;  %v61_v38 = vld [vmem:[%s1211_s0 + $0x178] sm:$0xff] }
   0xd   :  { %153 = vmatprep.subr.mxu0 %v584_v0  ;;  %525 = vmatprep.subr.mxu1 %v584_v0  ;;  %v59_v34 = vld [vmem:[%s1211_s0 + $0x168] sm:$0xff]  ;;  %v58_v36 = vld [vmem:[%s1211_s0 + $0x160] sm:$0xff]  ;;  %v16_v39 = vld [vmem:[%s1211_s0 + $0x10] sm:$0xff] }
   0xe   :  { %154 = vmatpush1.msra.mxu0 %v111_v7  ;;  %557 = vmatpush1.msra.mxu1 %v111_v7  ;;  %v60_v40 = vld [vmem:[%s1211_s0 + $0x170] sm:$0xff]  ;;  %v19_v41 = vld [vmem:[%s1211_s0 + $0x28] sm:$0xff]  ;;  %v18_v43 = vld [vmem:[%s1211_s0 + $0x20] sm:$0xff] }
   0xf   :  { %155 = vmatprep.subr.mxu0 %v584_v0  ;;  %526 = vmatprep.subr.mxu1 %v584_v0  ;;  %v63_v42 = vld [vmem:[%s1211_s0 + $0x188] sm:$0xff]  ;;  %v62_v44 = vld [vmem:[%s1211_s0 + $0x180] sm:$0xff]  ;;  %v21_v45 = vld [vmem:[%s1211_s0 + $0x38] sm:$0xff] }
  0x10   :  { %156 = vmatpush1.msra.mxu0 %v110_v8  ;;  %558 = vmatpush1.msra.mxu1 %v110_v8  ;;  %v65_v46 = vld [vmem:[%s1211_s0 + $0x198] sm:$0xff]  ;;  %v20_v47 = vld [vmem:[%s1211_s0 + $0x30] sm:$0xff]  ;;  %v23_v49 = vld [vmem:[%s1211_s0 + $0x48] sm:$0xff] }
  0x11   :  { %157 = vmatprep.subr.mxu0 %v584_v0  ;;  %527 = vmatprep.subr.mxu1 %v584_v0  ;;  %v64_v48 = vld [vmem:[%s1211_s0 + $0x190] sm:$0xff]  ;;  %v67_v50 = vld [vmem:[%s1211_s0 + $0x1a8] sm:$0xff]  ;;  %v22_v51 = vld [vmem:[%s1211_s0 + $0x40] sm:$0xff] }
  0x12   :  { %158 = vmatpush1.msra.mxu0 %v109_v9  ;;  %559 = vmatpush1.msra.mxu1 %v109_v9  ;;  %v66_v52 = vld [vmem:[%s1211_s0 + $0x1a0] sm:$0xff]  ;;  %v25_v53 = vld [vmem:[%s1211_s0 + $0x58] sm:$0xff]  ;;  %v24_v55 = vld [vmem:[%s1211_s0 + $0x50] sm:$0xff] }
  0x13   :  { %159 = vmatprep.subr.mxu0 %v584_v0  ;;  %528 = vmatprep.subr.mxu1 %v584_v0  ;;  %v69_v54 = vld [vmem:[%s1211_s0 + $0x1b8] sm:$0xff]  ;;  %v68_v56 = vld [vmem:[%s1211_s0 + $0x1b0] sm:$0xff]  ;;  %v27_v57 = vld [vmem:[%s1211_s0 + $0x68] sm:$0xff] }
  0x14   :  { %160 = vmatpush1.msra.mxu0 %v108_v10  ;;  %560 = vmatpush1.msra.mxu1 %v108_v10  ;;  %v71_v58 = vld [vmem:[%s1211_s0 + $0x1c8] sm:$0xff]  ;;  %v26_v59 = vld [vmem:[%s1211_s0 + $0x60] sm:$0xff]  ;;  %v29_v61 = vld [vmem:[%s1211_s0 + $0x78] sm:$0xff] }
  0x15   :  { %161 = vmatprep.subr.mxu0 %v584_v0  ;;  %529 = vmatprep.subr.mxu1 %v584_v0  ;;  %v70_v60 = vld [vmem:[%s1211_s0 + $0x1c0] sm:$0xff]  ;;  %v73_v62 = vld [vmem:[%s1211_s0 + $0x1d8] sm:$0xff]  ;;  %v28_v63 = vld [vmem:[%s1211_s0 + $0x70] sm:$0xff] }
  0x16   :  { %162 = vmatpush1.msra.mxu0 %v107_v11  ;;  %561 = vmatpush1.msra.mxu1 %v107_v11  ;;  %v31_v1 = vld [vmem:[%s1211_s0 + $0x88] sm:$0xff]  ;;  %v30_v3 = vld [vmem:[%s1211_s0 + $0x80] sm:$0xff]  ;;  %v33_v5 = vld [vmem:[%s1211_s0 + $0x98] sm:$0xff] }
  0x17   :  { %163 = vmatprep.subr.mxu0 %v584_v0  ;;  %530 = vmatprep.subr.mxu1 %v584_v0  ;;  %v75_v2 = vld [vmem:[%s1211_s0 + $0x1e8] sm:$0xff]  ;;  %v74_v4 = vld [vmem:[%s1211_s0 + $0x1e0] sm:$0xff]  ;;  %v77_v6 = vld [vmem:[%s1211_s0 + $0x1f8] sm:$0xff] }
  0x18   :  { %164 = vmatpush1.msra.mxu0 %v106_v12  ;;  %562 = vmatpush1.msra.mxu1 %v106_v12  ;;  %v32_v7 = vld [vmem:[%s1211_s0 + $0x90] sm:$0xff]  ;;  %v35_v9 = vld [vmem:[%s1211_s0 + $0xa8] sm:$0xff]  ;;  %v34_v11 = vld [vmem:[%s1211_s0 + $0xa0] sm:$0xff] }
  0x19   :  { %165 = vmatprep.subr.mxu0 %v584_v0  ;;  %531 = vmatprep.subr.mxu1 %v584_v0  ;;  %v76_v8 = vld [vmem:[%s1211_s0 + $0x1f0] sm:$0xff]  ;;  %v79_v10 = vld [vmem:[%s1211_s0 + $0x208] sm:$0xff]  ;;  %v78_v12 = vld [vmem:[%s1211_s0 + $0x200] sm:$0xff] }
  0x1a   :  { %166 = vmatpush1.msra.mxu0 %v105_v13  ;;  %563 = vmatpush1.msra.mxu1 %v105_v13  ;;  %v37_v13 = vld [vmem:[%s1211_s0 + $0xb8] sm:$0xff] }
  0x1b   :  { %167 = vmatprep.subr.mxu0 %v584_v0  ;;  %532 = vmatprep.subr.mxu1 %v584_v0 }
  0x1c   :  { %168 = vmatpush1.msra.mxu0 %v104_v14  ;;  %564 = vmatpush1.msra.mxu1 %v104_v14  ;;  %v81_v14 = vld [vmem:[%s1211_s0 + $0x218] sm:$0xff] }
  0x1d   :  { %169 = vmatprep.subr.mxu0 %v584_v0  ;;  %533 = vmatprep.subr.mxu1 %v584_v0 }
  0x1e   :  { %170 = vmatpush1.msra.mxu0 %v103_v15  ;;  %565 = vmatpush1.msra.mxu1 %v103_v15  ;;  %v36_v15 = vld [vmem:[%s1211_s0 + $0xb0] sm:$0xff] }
  0x1f   :  { %171 = vmatprep.subr.mxu0 %v584_v0  ;;  %534 = vmatprep.subr.mxu1 %v584_v0 }
  0x20   :  { %172 = vmatpush1.msra.mxu0 %v102_v16  ;;  %566 = vmatpush1.msra.mxu1 %v102_v16  ;;  %v80_v16 = vld [vmem:[%s1211_s0 + $0x210] sm:$0xff] }
  0x21   :  { %173 = vmatprep.subr.mxu0 %v584_v0  ;;  %535 = vmatprep.subr.mxu1 %v584_v0 }
  0x22   :  { %174 = vmatpush2.msra.mxu0 %v133_v17  ;;  %567 = vmatpush2.msra.mxu1 %v133_v17  ;;  %v39_v17 = vld [vmem:[%s1211_s0 + $0xc8] sm:$0xff] }
  0x23   :  { %175 = vmatprep.subr.mxu0 %v584_v0  ;;  %536 = vmatprep.subr.mxu1 %v584_v0 }
  0x24   :  { %176 = vmatpush2.msra.mxu0 %v132_v18  ;;  %568 = vmatpush2.msra.mxu1 %v132_v18  ;;  %v83_v18 = vld [vmem:[%s1211_s0 + $0x228] sm:$0xff] }
  0x25   :  { %177 = vmatprep.subr.mxu0 %v584_v0  ;;  %537 = vmatprep.subr.mxu1 %v584_v0 }
  0x26   :  { %178 = vmatpush2.msra.mxu0 %v131_v19  ;;  %569 = vmatpush2.msra.mxu1 %v131_v19  ;;  %v38_v19 = vld [vmem:[%s1211_s0 + $0xc0] sm:$0xff] }
  0x27   :  { %179 = vmatprep.subr.mxu0 %v584_v0  ;;  %538 = vmatprep.subr.mxu1 %v584_v0 }
  0x28   :  { %180 = vmatpush2.msra.mxu0 %v130_v20  ;;  %570 = vmatpush2.msra.mxu1 %v130_v20  ;;  %v82_v20 = vld [vmem:[%s1211_s0 + $0x220] sm:$0xff] }
  0x29   :  { %181 = vmatprep.subr.mxu0 %v584_v0  ;;  %539 = vmatprep.subr.mxu1 %v584_v0 }
  0x2a   :  { %182 = vmatpush2.msra.mxu0 %v129_v21  ;;  %571 = vmatpush2.msra.mxu1 %v129_v21  ;;  %v41_v21 = vld [vmem:[%s1211_s0 + $0xd8] sm:$0xff] }
  0x2b   :  { %183 = vmatprep.subr.mxu0 %v584_v0  ;;  %540 = vmatprep.subr.mxu1 %v584_v0 }
  0x2c   :  { %184 = vmatpush2.msra.mxu0 %v128_v22  ;;  %572 = vmatpush2.msra.mxu1 %v128_v22  ;;  %v85_v22 = vld [vmem:[%s1211_s0 + $0x238] sm:$0xff] }
  0x2d   :  { %185 = vmatprep.subr.mxu0 %v584_v0  ;;  %541 = vmatprep.subr.mxu1 %v584_v0 }
  0x2e   :  { %186 = vmatpush2.msra.mxu0 %v127_v23  ;;  %573 = vmatpush2.msra.mxu1 %v127_v23  ;;  %v40_v23 = vld [vmem:[%s1211_s0 + $0xd0] sm:$0xff] }
  0x2f   :  { %187 = vmatprep.subr.mxu0 %v584_v0  ;;  %542 = vmatprep.subr.mxu1 %v584_v0 }
  0x30   :  { %188 = vmatpush2.msra.mxu0 %v126_v24  ;;  %574 = vmatpush2.msra.mxu1 %v126_v24  ;;  %v84_v24 = vld [vmem:[%s1211_s0 + $0x230] sm:$0xff] }
  0x31   :  { %189 = vmatprep.subr.mxu0 %v584_v0  ;;  %543 = vmatprep.subr.mxu1 %v584_v0 }
  0x32   :  { %190 = vmatpush2.msra.mxu0 %v125_v25  ;;  %575 = vmatpush2.msra.mxu1 %v125_v25  ;;  %v43_v25 = vld [vmem:[%s1211_s0 + $0xe8] sm:$0xff] }
  0x33   :  { %191 = vmatprep.subr.mxu0 %v584_v0  ;;  %544 = vmatprep.subr.mxu1 %v584_v0 }
  0x34   :  { %192 = vmatpush2.msra.mxu0 %v124_v26  ;;  %576 = vmatpush2.msra.mxu1 %v124_v26  ;;  %v87_v26 = vld [vmem:[%s1211_s0 + $0x248] sm:$0xff] }
  0x35   :  { %193 = vmatprep.subr.mxu0 %v584_v0  ;;  %545 = vmatprep.subr.mxu1 %v584_v0 }
  0x36   :  { %194 = vmatpush2.msra.mxu0 %v123_v27  ;;  %577 = vmatpush2.msra.mxu1 %v123_v27  ;;  %v42_v27 = vld [vmem:[%s1211_s0 + $0xe0] sm:$0xff] }
  0x37   :  { %195 = vmatprep.subr.mxu0 %v584_v0  ;;  %546 = vmatprep.subr.mxu1 %v584_v0 }
  0x38   :  { %196 = vmatpush2.msra.mxu0 %v122_v28  ;;  %578 = vmatpush2.msra.mxu1 %v122_v28  ;;  %v86_v28 = vld [vmem:[%s1211_s0 + $0x240] sm:$0xff] }
  0x39   :  { %197 = vmatprep.subr.mxu0 %v584_v0  ;;  %547 = vmatprep.subr.mxu1 %v584_v0 }
  0x3a   :  { %198 = vmatpush2.msra.mxu0 %v121_v29  ;;  %579 = vmatpush2.msra.mxu1 %v121_v29  ;;  %v45_v29 = vld [vmem:[%s1211_s0 + $0xf8] sm:$0xff] }
  0x3b   :  { %199 = vmatprep.subr.mxu0 %v584_v0  ;;  %548 = vmatprep.subr.mxu1 %v584_v0 }
  0x3c   :  { %200 = vmatpush2.msra.mxu0 %v120_v30  ;;  %580 = vmatpush2.msra.mxu1 %v120_v30  ;;  %v89_v30 = vld [vmem:[%s1211_s0 + $0x258] sm:$0xff] }
  0x3d   :  { %201 = vmatprep.subr.mxu0 %v584_v0  ;;  %549 = vmatprep.subr.mxu1 %v584_v0 }
  0x3e   :  { %202 = vmatpush2.msra.mxu0 %v119_v31  ;;  %581 = vmatpush2.msra.mxu1 %v119_v31  ;;  %v44_v31 = vld [vmem:[%s1211_s0 + $0xf0] sm:$0xff] }
  0x3f   :  { %203 = vmatprep.subr.mxu0 %v584_v0  ;;  %550 = vmatprep.subr.mxu1 %v584_v0  ;;  %v72_v0 = vld [vmem:[%s1211_s0 + $0x1d0] sm:$0xff] }
  0x40   :  { %204 = vmatpush2.msra.mxu0 %v118_v32  ;;  %582 = vmatpush2.msra.mxu1 %v118_v32  ;;  %v88_v32 = vld [vmem:[%s1211_s0 + $0x250] sm:$0xff] }
  0x41   :  { %205 = vmatprep.mubr.f32.mxu0 %v15_v33  ;;  %315 = vmatprep.mubr.f32.mxu1 %v59_v34  ;;  %v47_v33 = vld [vmem:[%s1211_s0 + $0x108] sm:$0xff] }
  0x42   :  { %206 = vmatmul.mubr.f32.vlgmr.msra.gmra.mxu0 %v14_v35  ;;  %316 = vmatmul.mubr.f32.vlgmr.msra.gmra.mxu1 %v58_v36  ;;  %v91_v34 = vld [vmem:[%s1211_s0 + $0x268] sm:$0xff]  ;;  %v46_v35 = vld [vmem:[%s1211_s0 + $0x100] sm:$0xff] }
  0x43   :  { %210 = vmatprep.mubr.f32.mxu0 %v17_v37  ;;  %320 = vmatprep.mubr.f32.mxu1 %v61_v38  ;;  %v90_v36 = vld [vmem:[%s1211_s0 + $0x260] sm:$0xff]  ;;  %v49_v37 = vld [vmem:[%s1211_s0 + $0x118] sm:$0xff] }
  0x44   :  { %v93_v38 = vld [vmem:[%s1211_s0 + $0x278] sm:$0xff] }
  0x46   :  { %211 = vmatmul.mubr.f32.gmra.mxu0 %v16_v39  ;;  %321 = vmatmul.mubr.f32.gmra.mxu1 %v60_v40  ;;  %v48_v39 = vld [vmem:[%s1211_s0 + $0x110] sm:$0xff] }
  0x47   :  { %215 = vmatprep.mubr.f32.mxu0 %v19_v41  ;;  %325 = vmatprep.mubr.f32.mxu1 %v63_v42  ;;  %v92_v40 = vld [vmem:[%s1211_s0 + $0x270] sm:$0xff]  ;;  %v51_v41 = vld [vmem:[%s1211_s0 + $0x128] sm:$0xff] }
  0x48   :  { %v95_v42 = vld [vmem:[%s1211_s0 + $0x288] sm:$0xff] }
  0x4a   :  { %216 = vmatmul.mubr.f32.gmra.mxu0 %v18_v43  ;;  %326 = vmatmul.mubr.f32.gmra.mxu1 %v62_v44  ;;  %v50_v43 = vld [vmem:[%s1211_s0 + $0x120] sm:$0xff] }
  0x4b   :  { %220 = vmatprep.mubr.f32.mxu0 %v21_v45  ;;  %330 = vmatprep.mubr.f32.mxu1 %v65_v46  ;;  %v94_v44 = vld [vmem:[%s1211_s0 + $0x280] sm:$0xff]  ;;  %v53_v45 = vld [vmem:[%s1211_s0 + $0x138] sm:$0xff] }
  0x4c   :  { %v97_v46 = vld [vmem:[%s1211_s0 + $0x298] sm:$0xff] }
  0x4e   :  { %221 = vmatmul.mubr.f32.gmra.mxu0 %v20_v47  ;;  %331 = vmatmul.mubr.f32.gmra.mxu1 %v64_v48  ;;  %v52_v47 = vld [vmem:[%s1211_s0 + $0x130] sm:$0xff] }
  0x4f   :  { %225 = vmatprep.mubr.f32.mxu0 %v23_v49  ;;  %335 = vmatprep.mubr.f32.mxu1 %v67_v50  ;;  %v96_v48 = vld [vmem:[%s1211_s0 + $0x290] sm:$0xff]  ;;  %v55_v49 = vld [vmem:[%s1211_s0 + $0x148] sm:$0xff] }
  0x50   :  { %v99_v50 = vld [vmem:[%s1211_s0 + $0x2a8] sm:$0xff] }
  0x52   :  { %226 = vmatmul.mubr.f32.gmra.mxu0 %v22_v51  ;;  %336 = vmatmul.mubr.f32.gmra.mxu1 %v66_v52  ;;  %v54_v51 = vld [vmem:[%s1211_s0 + $0x140] sm:$0xff] }
  0x53   :  { %230 = vmatprep.mubr.f32.mxu0 %v25_v53  ;;  %340 = vmatprep.mubr.f32.mxu1 %v69_v54  ;;  %v98_v52 = vld [vmem:[%s1211_s0 + $0x2a0] sm:$0xff]  ;;  %v57_v53 = vld [vmem:[%s1211_s0 + $0x158] sm:$0xff] }
  0x54   :  { %v101_v54 = vld [vmem:[%s1211_s0 + $0x2b8] sm:$0xff] }
  0x56   :  { %231 = vmatmul.mubr.f32.gmra.mxu0 %v24_v55  ;;  %341 = vmatmul.mubr.f32.gmra.mxu1 %v68_v56  ;;  %v56_v55 = vld [vmem:[%s1211_s0 + $0x150] sm:$0xff] }
  0x57   :  { %235 = vmatprep.mubr.f32.mxu0 %v27_v57  ;;  %345 = vmatprep.mubr.f32.mxu1 %v71_v58  ;;  %v100_v56 = vld [vmem:[%s1211_s0 + $0x2b0] sm:$0xff]  ;;  %v1032_v57 = vld [vmem:[%s1212_s2] ss:$0 sm:$0xff] }
  0x5a   :  { %236 = vmatmul.mubr.f32.gmra.mxu0 %v26_v59  ;;  %346 = vmatmul.mubr.f32.gmra.mxu1 %v70_v60 }
  0x5b   :  { %240 = vmatprep.mubr.f32.mxu0 %v29_v61  ;;  %350 = vmatprep.mubr.f32.mxu1 %v73_v62 }
  0x5e   :  { %241 = vmatmul.mubr.f32.gmra.mxu0 %v28_v63  ;;  %351 = vmatmul.mubr.f32.gmra.mxu1 %v72_v0 }
  0x5f   :  { %245 = vmatprep.mubr.f32.mxu0 %v31_v1  ;;  %355 = vmatprep.mubr.f32.mxu1 %v75_v2 }
  0x62   :  { %246 = vmatmul.mubr.f32.gmra.mxu0 %v30_v3  ;;  %356 = vmatmul.mubr.f32.gmra.mxu1 %v74_v4 }
  0x63   :  { %250 = vmatprep.mubr.f32.mxu0 %v33_v5  ;;  %360 = vmatprep.mubr.f32.mxu1 %v77_v6 }
  0x66   :  { %251 = vmatmul.mubr.f32.gmra.mxu0 %v32_v7  ;;  %361 = vmatmul.mubr.f32.gmra.mxu1 %v76_v8 }
  0x67   :  { %255 = vmatprep.mubr.f32.mxu0 %v35_v9  ;;  %365 = vmatprep.mubr.f32.mxu1 %v79_v10 }
  0x6a   :  { %256 = vmatmul.mubr.f32.gmra.mxu0 %v34_v11  ;;  %366 = vmatmul.mubr.f32.gmra.mxu1 %v78_v12 }
  0x6b   :  { %260 = vmatprep.mubr.f32.mxu0 %v37_v13  ;;  %370 = vmatprep.mubr.f32.mxu1 %v81_v14 }
  0x6e   :  { %261 = vmatmul.mubr.f32.gmra.mxu0 %v36_v15  ;;  %371 = vmatmul.mubr.f32.gmra.mxu1 %v80_v16 }
  0x6f   :  { %265 = vmatprep.mubr.f32.mxu0 %v39_v17  ;;  %375 = vmatprep.mubr.f32.mxu1 %v83_v18 }
  0x72   :  { %266 = vmatmul.mubr.f32.gmra.mxu0 %v38_v19  ;;  %376 = vmatmul.mubr.f32.gmra.mxu1 %v82_v20 }
  0x73   :  { %270 = vmatprep.mubr.f32.mxu0 %v41_v21  ;;  %380 = vmatprep.mubr.f32.mxu1 %v85_v22 }
  0x76   :  { %271 = vmatmul.mubr.f32.gmra.mxu0 %v40_v23  ;;  %381 = vmatmul.mubr.f32.gmra.mxu1 %v84_v24 }
  0x77   :  { %275 = vmatprep.mubr.f32.mxu0 %v43_v25  ;;  %385 = vmatprep.mubr.f32.mxu1 %v87_v26 }
  0x7a   :  { %276 = vmatmul.mubr.f32.gmra.mxu0 %v42_v27  ;;  %386 = vmatmul.mubr.f32.gmra.mxu1 %v86_v28 }
  0x7b   :  { %280 = vmatprep.mubr.f32.mxu0 %v45_v29  ;;  %390 = vmatprep.mubr.f32.mxu1 %v89_v30 }
  0x7e   :  { %281 = vmatmul.mubr.f32.gmra.mxu0 %v44_v31  ;;  %391 = vmatmul.mubr.f32.gmra.mxu1 %v88_v32 }
  0x7f   :  { %285 = vmatprep.mubr.f32.mxu0 %v47_v33  ;;  %395 = vmatprep.mubr.f32.mxu1 %v91_v34 }
  0x82   :  { %286 = vmatmul.mubr.f32.gmra.mxu0 %v46_v35  ;;  %396 = vmatmul.mubr.f32.gmra.mxu1 %v90_v36 }
  0x83   :  { %290 = vmatprep.mubr.f32.mxu0 %v49_v37  ;;  %400 = vmatprep.mubr.f32.mxu1 %v93_v38 }
  0x86   :  { %291 = vmatmul.mubr.f32.gmra.mxu0 %v48_v39  ;;  %401 = vmatmul.mubr.f32.gmra.mxu1 %v92_v40 }
  0x87   :  { %295 = vmatprep.mubr.f32.mxu0 %v51_v41  ;;  %405 = vmatprep.mubr.f32.mxu1 %v95_v42 }
  0x8a   :  { %296 = vmatmul.mubr.f32.gmra.mxu0 %v50_v43  ;;  %406 = vmatmul.mubr.f32.gmra.mxu1 %v94_v44 }
  0x8b   :  { %300 = vmatprep.mubr.f32.mxu0 %v53_v45  ;;  %410 = vmatprep.mubr.f32.mxu1 %v97_v46 }
  0x8e   :  { %301 = vmatmul.mubr.f32.gmra.mxu0 %v52_v47  ;;  %411 = vmatmul.mubr.f32.gmra.mxu1 %v96_v48 }
  0x8f   :  { %305 = vmatprep.mubr.f32.mxu0 %v55_v49  ;;  %415 = vmatprep.mubr.f32.mxu1 %v99_v50 }
  0x92   :  { %306 = vmatmul.mubr.f32.gmra.mxu0 %v54_v51  ;;  %416 = vmatmul.mubr.f32.gmra.mxu1 %v98_v52 }
  0x93   :  { %310 = vmatprep.mubr.f32.mxu0 %v57_v53  ;;  %420 = vmatprep.mubr.f32.mxu1 %v101_v54 }
  0x96   :  { %311 = vmatmul.mubr.f32.gmra.mxu0 %v56_v55  ;;  %421 = vmatmul.mubr.f32.gmra.mxu1 %v100_v56 }
 0x102   :  { %v207_v58 = vpop.f32.mrf.mxu0  ;;  %v317_v59 = vpop.f32.mrf.mxu1 }
 0x103   :  { %v208_v60 = vadd.f32 %v1032_v57, %v207_v58  ;;  %v318_v61 = vadd.f32 %v1032_v57, %v317_v59 }
 0x104   :  { %v209_v62 = vpop.f32.mrf.mxu0  ;;  %v319_v63 = vpop.f32.mrf.mxu1 }
 0x105   :  { %v426_v0 = vmax.f32 %v208_v60, 0.0  ;;  %v448_v1 = vmax.f32 %v318_v61, 0.0 }
 0x106   :  { %v212_v2 = vpop.f32.mrf.mxu0  ;;  %v322_v3 = vpop.f32.mrf.mxu1 }
 0x107   :  { %470 = vst [vmem:[%s1213_s3] sm:$0xff] %v426_v0  ;;  %492 = vst [vmem:[%s1213_s3 + $0xb0] sm:$0xff] %v448_v1  ;;  %v213_v4 = vadd.f32 %v1032_v57, %v212_v2  ;;  %v323_v5 = vadd.f32 %v1032_v57, %v322_v3 }
 0x108   :  { %v214_v6 = vpop.f32.mrf.mxu0  ;;  %v324_v7 = vpop.f32.mrf.mxu1 }
 0x109   :  { %v427_v8 = vmax.f32 %v213_v4, 0.0  ;;  %v449_v9 = vmax.f32 %v323_v5, 0.0 }
 0x10a   :  { %v217_v10 = vpop.f32.mrf.mxu0  ;;  %v327_v11 = vpop.f32.mrf.mxu1 }
 0x10b   :  { %471 = vst [vmem:[%s1213_s3 + $0x8] sm:$0xff] %v427_v8  ;;  %493 = vst [vmem:[%s1213_s3 + $0xb8] sm:$0xff] %v449_v9  ;;  %v218_v12 = vadd.f32 %v1032_v57, %v217_v10  ;;  %v328_v13 = vadd.f32 %v1032_v57, %v327_v11 }
 0x10c   :  { %v219_v14 = vpop.f32.mrf.mxu0  ;;  %v329_v15 = vpop.f32.mrf.mxu1 }
 0x10d   :  { %v428_v16 = vmax.f32 %v218_v12, 0.0  ;;  %v450_v17 = vmax.f32 %v328_v13, 0.0 }
 0x10e   :  { %v222_v18 = vpop.f32.mrf.mxu0  ;;  %v332_v19 = vpop.f32.mrf.mxu1 }
 0x10f   :  { %472 = vst [vmem:[%s1213_s3 + $0x10] sm:$0xff] %v428_v16  ;;  %494 = vst [vmem:[%s1213_s3 + $0xc0] sm:$0xff] %v450_v17  ;;  %v223_v20 = vadd.f32 %v1032_v57, %v222_v18  ;;  %v333_v21 = vadd.f32 %v1032_v57, %v332_v19 }
 0x110   :  { %v224_v22 = vpop.f32.mrf.mxu0  ;;  %v334_v23 = vpop.f32.mrf.mxu1 }
 0x111   :  { %v429_v24 = vmax.f32 %v223_v20, 0.0  ;;  %v451_v25 = vmax.f32 %v333_v21, 0.0 }
 0x112   :  { %v227_v26 = vpop.f32.mrf.mxu0  ;;  %v337_v27 = vpop.f32.mrf.mxu1 }
 0x113   :  { %473 = vst [vmem:[%s1213_s3 + $0x18] sm:$0xff] %v429_v24  ;;  %495 = vst [vmem:[%s1213_s3 + $0xc8] sm:$0xff] %v451_v25  ;;  %v228_v28 = vadd.f32 %v1032_v57, %v227_v26  ;;  %v338_v29 = vadd.f32 %v1032_v57, %v337_v27 }
 0x114   :  { %v229_v30 = vpop.f32.mrf.mxu0  ;;  %v339_v31 = vpop.f32.mrf.mxu1 }
 0x115   :  { %v430_v32 = vmax.f32 %v228_v28, 0.0  ;;  %v452_v33 = vmax.f32 %v338_v29, 0.0 }
 0x116   :  { %v232_v34 = vpop.f32.mrf.mxu0  ;;  %v342_v35 = vpop.f32.mrf.mxu1 }
 0x117   :  { %474 = vst [vmem:[%s1213_s3 + $0x20] sm:$0xff] %v430_v32  ;;  %496 = vst [vmem:[%s1213_s3 + $0xd0] sm:$0xff] %v452_v33  ;;  %v233_v36 = vadd.f32 %v1032_v57, %v232_v34  ;;  %v343_v37 = vadd.f32 %v1032_v57, %v342_v35 }
 0x118   :  { %v234_v38 = vpop.f32.mrf.mxu0  ;;  %v344_v39 = vpop.f32.mrf.mxu1 }
 0x119   :  { %v431_v40 = vmax.f32 %v233_v36, 0.0  ;;  %v453_v41 = vmax.f32 %v343_v37, 0.0 }
 0x11a   :  { %v237_v42 = vpop.f32.mrf.mxu0  ;;  %v347_v43 = vpop.f32.mrf.mxu1 }
 0x11b   :  { %475 = vst [vmem:[%s1213_s3 + $0x28] sm:$0xff] %v431_v40  ;;  %497 = vst [vmem:[%s1213_s3 + $0xd8] sm:$0xff] %v453_v41  ;;  %v238_v44 = vadd.f32 %v1032_v57, %v237_v42  ;;  %v348_v45 = vadd.f32 %v1032_v57, %v347_v43 }
 0x11c   :  { %v239_v46 = vpop.f32.mrf.mxu0  ;;  %v349_v47 = vpop.f32.mrf.mxu1 }
 0x11d   :  { %v432_v48 = vmax.f32 %v238_v44, 0.0  ;;  %v454_v49 = vmax.f32 %v348_v45, 0.0 }
 0x11e   :  { %v242_v50 = vpop.f32.mrf.mxu0  ;;  %v352_v51 = vpop.f32.mrf.mxu1 }
 0x11f   :  { %476 = vst [vmem:[%s1213_s3 + $0x30] sm:$0xff] %v432_v48  ;;  %498 = vst [vmem:[%s1213_s3 + $0xe0] sm:$0xff] %v454_v49  ;;  %v243_v52 = vadd.f32 %v1032_v57, %v242_v50  ;;  %v353_v53 = vadd.f32 %v1032_v57, %v352_v51 }
 0x120   :  { %v244_v54 = vpop.f32.mrf.mxu0  ;;  %v354_v55 = vpop.f32.mrf.mxu1 }
 0x121   :  { %v433_v56 = vmax.f32 %v243_v52, 0.0  ;;  %v455_v58 = vmax.f32 %v353_v53, 0.0 }
 0x122   :  { %v247_v59 = vpop.f32.mrf.mxu0  ;;  %v357_v60 = vpop.f32.mrf.mxu1 }
 0x123   :  { %477 = vst [vmem:[%s1213_s3 + $0x38] sm:$0xff] %v433_v56  ;;  %499 = vst [vmem:[%s1213_s3 + $0xe8] sm:$0xff] %v455_v58  ;;  %v248_v61 = vadd.f32 %v1032_v57, %v247_v59  ;;  %v358_v62 = vadd.f32 %v1032_v57, %v357_v60 }
 0x124   :  { %v249_v63 = vpop.f32.mrf.mxu0  ;;  %v359_v0 = vpop.f32.mrf.mxu1 }
 0x125   :  { %v434_v1 = vmax.f32 %v248_v61, 0.0  ;;  %v456_v2 = vmax.f32 %v358_v62, 0.0 }
 0x126   :  { %v252_v3 = vpop.f32.mrf.mxu0  ;;  %v362_v4 = vpop.f32.mrf.mxu1 }
 0x127   :  { %478 = vst [vmem:[%s1213_s3 + $0x40] sm:$0xff] %v434_v1  ;;  %500 = vst [vmem:[%s1213_s3 + $0xf0] sm:$0xff] %v456_v2  ;;  %v253_v5 = vadd.f32 %v1032_v57, %v252_v3  ;;  %v363_v6 = vadd.f32 %v1032_v57, %v362_v4 }
 0x128   :  { %v254_v7 = vpop.f32.mrf.mxu0  ;;  %v364_v8 = vpop.f32.mrf.mxu1 }
 0x129   :  { %v435_v9 = vmax.f32 %v253_v5, 0.0  ;;  %v457_v10 = vmax.f32 %v363_v6, 0.0 }
 0x12a   :  { %v257_v11 = vpop.f32.mrf.mxu0  ;;  %v367_v12 = vpop.f32.mrf.mxu1 }
 0x12b   :  { %479 = vst [vmem:[%s1213_s3 + $0x48] sm:$0xff] %v435_v9  ;;  %501 = vst [vmem:[%s1213_s3 + $0xf8] sm:$0xff] %v457_v10  ;;  %v258_v13 = vadd.f32 %v1032_v57, %v257_v11  ;;  %v368_v14 = vadd.f32 %v1032_v57, %v367_v12 }
 0x12c   :  { %v259_v15 = vpop.f32.mrf.mxu0  ;;  %v369_v16 = vpop.f32.mrf.mxu1 }
 0x12d   :  { %v436_v17 = vmax.f32 %v258_v13, 0.0  ;;  %v458_v18 = vmax.f32 %v368_v14, 0.0 }
 0x12e   :  { %v262_v19 = vpop.f32.mrf.mxu0  ;;  %v372_v20 = vpop.f32.mrf.mxu1 }
 0x12f   :  { %480 = vst [vmem:[%s1213_s3 + $0x50] sm:$0xff] %v436_v17  ;;  %502 = vst [vmem:[%s1213_s3 + $0x100] sm:$0xff] %v458_v18  ;;  %v263_v21 = vadd.f32 %v1032_v57, %v262_v19  ;;  %v373_v22 = vadd.f32 %v1032_v57, %v372_v20 }
 0x130   :  { %v264_v23 = vpop.f32.mrf.mxu0  ;;  %v374_v24 = vpop.f32.mrf.mxu1 }
 0x131   :  { %v437_v25 = vmax.f32 %v263_v21, 0.0  ;;  %v459_v26 = vmax.f32 %v373_v22, 0.0 }
 0x132   :  { %v267_v27 = vpop.f32.mrf.mxu0  ;;  %v377_v28 = vpop.f32.mrf.mxu1 }
 0x133   :  { %481 = vst [vmem:[%s1213_s3 + $0x58] sm:$0xff] %v437_v25  ;;  %503 = vst [vmem:[%s1213_s3 + $0x108] sm:$0xff] %v459_v26  ;;  %v268_v29 = vadd.f32 %v1032_v57, %v267_v27  ;;  %v378_v30 = vadd.f32 %v1032_v57, %v377_v28 }
 0x134   :  { %v269_v31 = vpop.f32.mrf.mxu0  ;;  %v379_v32 = vpop.f32.mrf.mxu1 }
 0x135   :  { %v438_v33 = vmax.f32 %v268_v29, 0.0  ;;  %v460_v34 = vmax.f32 %v378_v30, 0.0 }
 0x136   :  { %v272_v35 = vpop.f32.mrf.mxu0  ;;  %v382_v36 = vpop.f32.mrf.mxu1 }
 0x137   :  { %482 = vst [vmem:[%s1213_s3 + $0x60] sm:$0xff] %v438_v33  ;;  %504 = vst [vmem:[%s1213_s3 + $0x110] sm:$0xff] %v460_v34  ;;  %v273_v37 = vadd.f32 %v1032_v57, %v272_v35  ;;  %v383_v38 = vadd.f32 %v1032_v57, %v382_v36 }
 0x138   :  { %v274_v39 = vpop.f32.mrf.mxu0  ;;  %v384_v40 = vpop.f32.mrf.mxu1 }
 0x139   :  { %v439_v41 = vmax.f32 %v273_v37, 0.0  ;;  %v461_v42 = vmax.f32 %v383_v38, 0.0 }
 0x13a   :  { %v277_v43 = vpop.f32.mrf.mxu0  ;;  %v387_v44 = vpop.f32.mrf.mxu1 }
 0x13b   :  { %483 = vst [vmem:[%s1213_s3 + $0x68] sm:$0xff] %v439_v41  ;;  %505 = vst [vmem:[%s1213_s3 + $0x118] sm:$0xff] %v461_v42  ;;  %v278_v45 = vadd.f32 %v1032_v57, %v277_v43  ;;  %v388_v46 = vadd.f32 %v1032_v57, %v387_v44 }
 0x13c   :  { %v279_v47 = vpop.f32.mrf.mxu0  ;;  %v389_v48 = vpop.f32.mrf.mxu1 }
 0x13d   :  { %v440_v49 = vmax.f32 %v278_v45, 0.0  ;;  %v462_v50 = vmax.f32 %v388_v46, 0.0 }
 0x13e   :  { %v282_v51 = vpop.f32.mrf.mxu0  ;;  %v392_v52 = vpop.f32.mrf.mxu1 }
 0x13f   :  { %484 = vst [vmem:[%s1213_s3 + $0x70] sm:$0xff] %v440_v49  ;;  %506 = vst [vmem:[%s1213_s3 + $0x120] sm:$0xff] %v462_v50  ;;  %v283_v53 = vadd.f32 %v1032_v57, %v282_v51  ;;  %v393_v54 = vadd.f32 %v1032_v57, %v392_v52 }
 0x140   :  { %v284_v55 = vpop.f32.mrf.mxu0  ;;  %v394_v56 = vpop.f32.mrf.mxu1 }
 0x141   :  { %v441_v58 = vmax.f32 %v283_v53, 0.0  ;;  %v463_v59 = vmax.f32 %v393_v54, 0.0 }
 0x142   :  { %v287_v60 = vpop.f32.mrf.mxu0  ;;  %v397_v61 = vpop.f32.mrf.mxu1 }
 0x143   :  { %485 = vst [vmem:[%s1213_s3 + $0x78] sm:$0xff] %v441_v58  ;;  %507 = vst [vmem:[%s1213_s3 + $0x128] sm:$0xff] %v463_v59  ;;  %v288_v62 = vadd.f32 %v1032_v57, %v287_v60  ;;  %v398_v63 = vadd.f32 %v1032_v57, %v397_v61 }
 0x144   :  { %v289_v0 = vpop.f32.mrf.mxu0  ;;  %v399_v1 = vpop.f32.mrf.mxu1 }
 0x145   :  { %v442_v2 = vmax.f32 %v288_v62, 0.0  ;;  %v464_v3 = vmax.f32 %v398_v63, 0.0 }
 0x146   :  { %v292_v4 = vpop.f32.mrf.mxu0  ;;  %v402_v5 = vpop.f32.mrf.mxu1 }
 0x147   :  { %486 = vst [vmem:[%s1213_s3 + $0x80] sm:$0xff] %v442_v2  ;;  %508 = vst [vmem:[%s1213_s3 + $0x130] sm:$0xff] %v464_v3  ;;  %v293_v6 = vadd.f32 %v1032_v57, %v292_v4  ;;  %v403_v7 = vadd.f32 %v1032_v57, %v402_v5 }
 0x148   :  { %v294_v8 = vpop.f32.mrf.mxu0  ;;  %v404_v9 = vpop.f32.mrf.mxu1 }
 0x149   :  { %v443_v10 = vmax.f32 %v293_v6, 0.0  ;;  %v465_v11 = vmax.f32 %v403_v7, 0.0 }
 0x14a   :  { %v297_v12 = vpop.f32.mrf.mxu0  ;;  %v407_v13 = vpop.f32.mrf.mxu1 }
 0x14b   :  { %487 = vst [vmem:[%s1213_s3 + $0x88] sm:$0xff] %v443_v10  ;;  %509 = vst [vmem:[%s1213_s3 + $0x138] sm:$0xff] %v465_v11  ;;  %v298_v14 = vadd.f32 %v1032_v57, %v297_v12  ;;  %v408_v15 = vadd.f32 %v1032_v57, %v407_v13 }
 0x14c   :  { %v299_v16 = vpop.f32.mrf.mxu0  ;;  %v409_v17 = vpop.f32.mrf.mxu1 }
 0x14d   :  { %v444_v18 = vmax.f32 %v298_v14, 0.0  ;;  %v466_v19 = vmax.f32 %v408_v15, 0.0 }
 0x14e   :  { %v302_v20 = vpop.f32.mrf.mxu0  ;;  %v412_v21 = vpop.f32.mrf.mxu1 }
 0x14f   :  { %488 = vst [vmem:[%s1213_s3 + $0x90] sm:$0xff] %v444_v18  ;;  %510 = vst [vmem:[%s1213_s3 + $0x140] sm:$0xff] %v466_v19  ;;  %v303_v22 = vadd.f32 %v1032_v57, %v302_v20  ;;  %v413_v23 = vadd.f32 %v1032_v57, %v412_v21 }
 0x150   :  { %v304_v24 = vpop.f32.mrf.mxu0  ;;  %v414_v25 = vpop.f32.mrf.mxu1 }
 0x151   :  { %v445_v26 = vmax.f32 %v303_v22, 0.0  ;;  %v467_v27 = vmax.f32 %v413_v23, 0.0 }
 0x152   :  { %v307_v28 = vpop.f32.mrf.mxu0  ;;  %v417_v29 = vpop.f32.mrf.mxu1 }
 0x153   :  { %489 = vst [vmem:[%s1213_s3 + $0x98] sm:$0xff] %v445_v26  ;;  %511 = vst [vmem:[%s1213_s3 + $0x148] sm:$0xff] %v467_v27  ;;  %v308_v30 = vadd.f32 %v1032_v57, %v307_v28  ;;  %v418_v31 = vadd.f32 %v1032_v57, %v417_v29 }
 0x154   :  { %v309_v32 = vpop.f32.mrf.mxu0  ;;  %v419_v33 = vpop.f32.mrf.mxu1 }
 0x155   :  { %v446_v34 = vmax.f32 %v308_v30, 0.0  ;;  %v468_v35 = vmax.f32 %v418_v31, 0.0 }
 0x156   :  { %v312_v36 = vpop.f32.mrf.mxu0  ;;  %v422_v37 = vpop.f32.mrf.mxu1 }
 0x157   :  { %490 = vst [vmem:[%s1213_s3 + $0xa0] sm:$0xff] %v446_v34  ;;  %512 = vst [vmem:[%s1213_s3 + $0x150] sm:$0xff] %v468_v35  ;;  %v313_v38 = vadd.f32 %v1032_v57, %v312_v36  ;;  %v423_v39 = vadd.f32 %v1032_v57, %v422_v37 }
 0x158   :  { %v314_v40 = vpop.f32.mrf.mxu0  ;;  %v424_v41 = vpop.f32.mrf.mxu1 }
 0x159   :  { %v447_v42 = vmax.f32 %v313_v38, 0.0  ;;  %v469_v43 = vmax.f32 %v423_v39, 0.0 }
 0x15b   :  { %491 = vst [vmem:[%s1213_s3 + $0xa8] sm:$0xff] %v447_v42  ;;  %513 = vst [vmem:[%s1213_s3 + $0x158] sm:$0xff] %v469_v43 }

// kernel: bg_restore_net.5
= control target key start
LH: loop header
LB: loop body
LE: loop exit
PB: predicated region body
PF: predicated region fallthrough
CT: control target
= control target key end

     0   :  { %s782_s12 = smov 0   ;;  %s961_s0 = inlined_call_operand.vmem [shape: f32[512,128], index: 0, kind: input, shape index: {}]   ;;  %s962_s1 = inlined_call_operand.vmem [shape: f32[128,128], index: 1, kind: input, shape index: {}]   ;;  %s963_s2 = inlined_call_operand.vmem [shape: f32[1,128], index: 2, kind: input, shape index: {}]   ;;  %s964_s3 = inlined_call_operand.vmem [shape: f32[512,128], index: 3, kind: output, shape index: {}]  }
   0x1 LB: > { %s574_s13 = sadd.s32 4294967295, %s760_s12   ;;  %p578_p0 = scmp.ge.s32.totalorder %s760_s12, 1  ;;  %s760_s12 = sphi %s782_s12, %s13_s12  }
   0x2   : > { %p138_p1 = scmp.lt.s32.totalorder %s760_s12, 3 }
   0x4   : > { %p139_p2 = pnand %p578_p0, %p138_p1 }
   0x5   : > { %s579_s30 = sshll.u32 (!%p139_p2), %s574_s13, 5 }
   0x6   : > { %142 = sbr.rel (%p139_p2) target bundleno = 273 (0x111), region = 32  ;;  %p163_p3 = scmp.lt.s32.totalorder (!%p139_p2), %s579_s30, 63 }
   0xb   : > { %v221_v0 = vld [vmem:[%s962_s1 + $0x78] sm:$0xff]  ;;  %v220_v1 = vld [vmem:[%s962_s1 + $0x70] sm:$0xff]  ;;  %v219_v2 = vld [vmem:[%s962_s1 + $0x68] sm:$0xff]  ;;  %s966_s30 = smov (!%p163_p3, %s579_s30), 63 }
   0xc   : > { %634 = vmatprep.subr.mxu0 %v221_v0  ;;  %714 = vmatprep.subr.mxu1 %v221_v0  ;;  %v218_v3 = vld [vmem:[%s962_s1 + $0x60] sm:$0xff]  ;;  %v217_v4 = vld [vmem:[%s962_s1 + $0x58] sm:$0xff]  ;;  %v216_v5 = vld [vmem:[%s962_s1 + $0x50] sm:$0xff]  ;;  %s580_s17 = sshll.u32 %s966_s30, 3 }
   0xd   : > { %635 = vmatpush3.msra.mxu0 %v221_v0  ;;  %730 = vmatpush3.msra.mxu1 %v221_v0  ;;  %v215_v6 = vld [vmem:[%s962_s1 + $0x48] sm:$0xff]  ;;  %v214_v7 = vld [vmem:[%s962_s1 + $0x40] sm:$0xff]  ;;  %v213_v8 = vld [vmem:[%s962_s1 + $0x38] sm:$0xff]  ;;  %s845_s22 = scalar_lea.vmem %s961_s0, %s580_s17  ;;  %s894_s29 = scalar_lea.vmem %s964_s3, %s580_s17 }
   0xe   : > { %636 = vmatprep.subr.mxu0 %v220_v1  ;;  %715 = vmatprep.subr.mxu1 %v220_v1  ;;  %v212_v9 = vld [vmem:[%s962_s1 + $0x30] sm:$0xff]  ;;  %v211_v10 = vld [vmem:[%s962_s1 + $0x28] sm:$0xff]  ;;  %v210_v11 = vld [vmem:[%s962_s1 + $0x20] sm:$0xff] }
   0xf   : > { %637 = vmatpush3.msra.mxu0 %v220_v1  ;;  %731 = vmatpush3.msra.mxu1 %v220_v1  ;;  %v209_v12 = vld [vmem:[%s962_s1 + $0x18] sm:$0xff]  ;;  %v208_v13 = vld [vmem:[%s962_s1 + $0x10] sm:$0xff]  ;;  %v207_v14 = vld [vmem:[%s962_s1 + $0x8] sm:$0xff] }
  0x10   : > { %638 = vmatprep.subr.mxu0 %v219_v2  ;;  %716 = vmatprep.subr.mxu1 %v219_v2  ;;  %v206_v15 = vld [vmem:[%s962_s1] sm:$0xff]  ;;  %v175_v18 = vld [vmem:[%s845_s22 + $0x8] sm:$0xff]  ;;  %v176_v20 = vld [vmem:[%s845_s22 + $0x10] sm:$0xff] }
  0x11   : > { %639 = vmatpush3.msra.mxu0 %v219_v2  ;;  %732 = vmatpush3.msra.mxu1 %v219_v2  ;;  %v174_v16 = vld [vmem:[%s845_s22] sm:$0xff]  ;;  %v191_v19 = vld [vmem:[%s845_s22 + $0x88] sm:$0xff]  ;;  %v192_v21 = vld [vmem:[%s845_s22 + $0x90] sm:$0xff] }
  0x12   : > { %640 = vmatprep.subr.mxu0 %v218_v3  ;;  %717 = vmatprep.subr.mxu1 %v218_v3  ;;  %v190_v17 = vld [vmem:[%s845_s22 + $0x80] sm:$0xff]  ;;  %v177_v22 = vld [vmem:[%s845_s22 + $0x18] sm:$0xff]  ;;  %v179_v26 = vld [vmem:[%s845_s22 + $0x28] sm:$0xff] }
  0x13   : > { %641 = vmatpush3.msra.mxu0 %v218_v3  ;;  %733 = vmatpush3.msra.mxu1 %v218_v3  ;;  %v193_v23 = vld [vmem:[%s845_s22 + $0x98] sm:$0xff]  ;;  %v178_v24 = vld [vmem:[%s845_s22 + $0x20] sm:$0xff]  ;;  %v195_v27 = vld [vmem:[%s845_s22 + $0xa8] sm:$0xff] }
  0x14   : > { %642 = vmatprep.subr.mxu0 %v217_v4  ;;  %718 = vmatprep.subr.mxu1 %v217_v4  ;;  %v194_v25 = vld [vmem:[%s845_s22 + $0xa0] sm:$0xff]  ;;  %v180_v28 = vld [vmem:[%s845_s22 + $0x30] sm:$0xff]  ;;  %v181_v30 = vld [vmem:[%s845_s22 + $0x38] sm:$0xff] }
  0x15   : > { %643 = vmatpush3.msra.mxu0 %v217_v4  ;;  %734 = vmatpush3.msra.mxu1 %v217_v4  ;;  %v196_v29 = vld [vmem:[%s845_s22 + $0xb0] sm:$0xff]  ;;  %v197_v31 = vld [vmem:[%s845_s22 + $0xb8] sm:$0xff]  ;;  %v182_v32 = vld [vmem:[%s845_s22 + $0x40] sm:$0xff] }
  0x16   : > { %644 = vmatprep.subr.mxu0 %v216_v5  ;;  %719 = vmatprep.subr.mxu1 %v216_v5  ;;  %v198_v33 = vld [vmem:[%s845_s22 + $0xc0] sm:$0xff]  ;;  %v183_v34 = vld [vmem:[%s845_s22 + $0x48] sm:$0xff]  ;;  %v184_v36 = vld [vmem:[%s845_s22 + $0x50] sm:$0xff] }
  0x17   : > { %645 = vmatpush3.msra.mxu0 %v216_v5  ;;  %735 = vmatpush3.msra.mxu1 %v216_v5  ;;  %v199_v35 = vld [vmem:[%s845_s22 + $0xc8] sm:$0xff]  ;;  %v200_v37 = vld [vmem:[%s845_s22 + $0xd0] sm:$0xff]  ;;  %v185_v38 = vld [vmem:[%s845_s22 + $0x58] sm:$0xff] }
  0x18   : > { %646 = vmatprep.subr.mxu0 %v215_v6  ;;  %720 = vmatprep.subr.mxu1 %v215_v6  ;;  %v201_v39 = vld [vmem:[%s845_s22 + $0xd8] sm:$0xff]  ;;  %v186_v40 = vld [vmem:[%s845_s22 + $0x60] sm:$0xff]  ;;  %v187_v42 = vld [vmem:[%s845_s22 + $0x68] sm:$0xff] }
  0x19   : > { %647 = vmatpush3.msra.mxu0 %v215_v6  ;;  %736 = vmatpush3.msra.mxu1 %v215_v6  ;;  %v202_v41 = vld [vmem:[%s845_s22 + $0xe0] sm:$0xff]  ;;  %v203_v43 = vld [vmem:[%s845_s22 + $0xe8] sm:$0xff]  ;;  %v188_v44 = vld [vmem:[%s845_s22 + $0x70] sm:$0xff] }
  0x1a   : > { %648 = vmatprep.subr.mxu0 %v214_v7  ;;  %721 = vmatprep.subr.mxu1 %v214_v7  ;;  %v204_v45 = vld [vmem:[%s845_s22 + $0xf0] sm:$0xff]  ;;  %v189_v46 = vld [vmem:[%s845_s22 + $0x78] sm:$0xff]  ;;  %v885_v48 = vld [vmem:[%s963_s2] ss:$0 sm:$0xff] }
  0x1b   : > { %649 = vmatpush3.msra.mxu0 %v214_v7  ;;  %737 = vmatpush3.msra.mxu1 %v214_v7  ;;  %v205_v47 = vld [vmem:[%s845_s22 + $0xf8] sm:$0xff] }
  0x1c   : > { %650 = vmatprep.subr.mxu0 %v213_v8  ;;  %722 = vmatprep.subr.mxu1 %v213_v8 }
  0x1d   : > { %651 = vmatpush3.msra.mxu0 %v213_v8  ;;  %738 = vmatpush3.msra.mxu1 %v213_v8 }
  0x1e   : > { %652 = vmatprep.subr.mxu0 %v212_v9  ;;  %723 = vmatprep.subr.mxu1 %v212_v9 }
  0x1f   : > { %653 = vmatpush3.msra.mxu0 %v212_v9  ;;  %739 = vmatpush3.msra.mxu1 %v212_v9 }
  0x20   : > { %654 = vmatprep.subr.mxu0 %v211_v10  ;;  %724 = vmatprep.subr.mxu1 %v211_v10 }
  0x21   : > { %655 = vmatpush3.msra.mxu0 %v211_v10  ;;  %740 = vmatpush3.msra.mxu1 %v211_v10 }
  0x22   : > { %656 = vmatprep.subr.mxu0 %v210_v11  ;;  %725 = vmatprep.subr.mxu1 %v210_v11 }
  0x23   : > { %657 = vmatpush3.msra.mxu0 %v210_v11  ;;  %741 = vmatpush3.msra.mxu1 %v210_v11 }
  0x24   : > { %658 = vmatprep.subr.mxu0 %v209_v12  ;;  %726 = vmatprep.subr.mxu1 %v209_v12 }
  0x25   : > { %659 = vmatpush3.msra.mxu0 %v209_v12  ;;  %742 = vmatpush3.msra.mxu1 %v209_v12 }
  0x26   : > { %660 = vmatprep.subr.mxu0 %v208_v13  ;;  %727 = vmatprep.subr.mxu1 %v208_v13 }
  0x27   : > { %661 = vmatpush3.msra.mxu0 %v208_v13  ;;  %743 = vmatpush3.msra.mxu1 %v208_v13 }
  0x28   : > { %662 = vmatprep.subr.mxu0 %v207_v14  ;;  %728 = vmatprep.subr.mxu1 %v207_v14 }
  0x29   : > { %663 = vmatpush3.msra.mxu0 %v207_v14  ;;  %744 = vmatpush3.msra.mxu1 %v207_v14 }
  0x2a   : > { %664 = vmatprep.subr.mxu0 %v206_v15  ;;  %729 = vmatprep.subr.mxu1 %v206_v15 }
  0x2b   : > { %665 = vmatpush3.msra.mxu0 %v206_v15  ;;  %745 = vmatpush3.msra.mxu1 %v206_v15 }
  0x2c   : > { %666 = vmatprep.mubr.f32.mxu0 %v174_v16  ;;  %690 = vmatprep.mubr.f32.mxu1 %v190_v17 }
  0x2d   : > { %667 = vmatmul.mubr.f32.vlgmr.msra.gmra.mxu0 %v175_v18  ;;  %691 = vmatmul.mubr.f32.vlgmr.msra.gmra.mxu1 %v191_v19 }
  0x2e   : > { %669 = vmatprep.mubr.f32.mxu0 %v176_v20  ;;  %693 = vmatprep.mubr.f32.mxu1 %v192_v21 }
  0x31   : > { %670 = vmatmul.mubr.f32.gmra.mxu0 %v177_v22  ;;  %694 = vmatmul.mubr.f32.gmra.mxu1 %v193_v23 }
  0x32   : > { %672 = vmatprep.mubr.f32.mxu0 %v178_v24  ;;  %696 = vmatprep.mubr.f32.mxu1 %v194_v25 }
  0x35   : > { %673 = vmatmul.mubr.f32.gmra.mxu0 %v179_v26  ;;  %697 = vmatmul.mubr.f32.gmra.mxu1 %v195_v27 }
  0x36   : > { %675 = vmatprep.mubr.f32.mxu0 %v180_v28  ;;  %699 = vmatprep.mubr.f32.mxu1 %v196_v29 }
  0x39   : > { %676 = vmatmul.mubr.f32.gmra.mxu0 %v181_v30  ;;  %700 = vmatmul.mubr.f32.gmra.mxu1 %v197_v31 }
  0x3a   : > { %678 = vmatprep.mubr.f32.mxu0 %v182_v32  ;;  %702 = vmatprep.mubr.f32.mxu1 %v198_v33 }
  0x3d   : > { %679 = vmatmul.mubr.f32.gmra.mxu0 %v183_v34  ;;  %703 = vmatmul.mubr.f32.gmra.mxu1 %v199_v35 }
  0x3e   : > { %681 = vmatprep.mubr.f32.mxu0 %v184_v36  ;;  %705 = vmatprep.mubr.f32.mxu1 %v200_v37 }
  0x41   : > { %682 = vmatmul.mubr.f32.gmra.mxu0 %v185_v38  ;;  %706 = vmatmul.mubr.f32.gmra.mxu1 %v201_v39 }
  0x42   : > { %684 = vmatprep.mubr.f32.mxu0 %v186_v40  ;;  %708 = vmatprep.mubr.f32.mxu1 %v202_v41 }
  0x45   : > { %685 = vmatmul.mubr.f32.gmra.mxu0 %v187_v42  ;;  %709 = vmatmul.mubr.f32.gmra.mxu1 %v203_v43 }
  0x46   : > { %687 = vmatprep.mubr.f32.mxu0 %v188_v44  ;;  %711 = vmatprep.mubr.f32.mxu1 %v204_v45 }
  0x49   : > { %688 = vmatmul.mubr.f32.gmra.mxu0 %v189_v46  ;;  %712 = vmatmul.mubr.f32.gmra.mxu1 %v205_v47 }
  0xed   : > { %v668_v49 = vpop.f32.mrf.mxu0  ;;  %v692_v50 = vpop.f32.mrf.mxu1 }
  0xee   : > { %v301_v51 = vadd.f32 %v668_v49, %v885_v48  ;;  %v381_v52 = vadd.f32 %v692_v50, %v885_v48 }
  0xef   : > { %v295_v53 = vpop.f32.mrf.mxu0  ;;  %v375_v54 = vpop.f32.mrf.mxu1 }
  0xf0   : > { %v455_v55 = vmax.f32 %v301_v51, 0.0  ;;  %v471_v56 = vmax.f32 %v381_v52, 0.0  ;;  %v296_v57 = vadd.f32 %v885_v48, %v295_v53  ;;  %v376_v58 = vadd.f32 %v885_v48, %v375_v54 }
  0xf1   : > { %v671_v59 = vpop.f32.mrf.mxu0  ;;  %v695_v60 = vpop.f32.mrf.mxu1 }
  0xf2   : > { %487 = vst [vmem:[%s894_s29 + $0x8] sm:$0xff] %v455_v55  ;;  %503 = vst [vmem:[%s894_s29 + $0x88] sm:$0xff] %v471_v56  ;;  %v454_v61 = vmax.f32 %v296_v57, 0.0  ;;  %v470_v62 = vmax.f32 %v376_v58, 0.0  ;;  %v311_v63 = vadd.f32 %v671_v59, %v885_v48  ;;  %v391_v0 = vadd.f32 %v695_v60, %v885_v48 }
  0xf3   : > { %v305_v1 = vpop.f32.mrf.mxu0  ;;  %v385_v2 = vpop.f32.mrf.mxu1 }
  0xf4   : > { %486 = vst [vmem:[%s894_s29] sm:$0xff] %v454_v61  ;;  %502 = vst [vmem:[%s894_s29 + $0x80] sm:$0xff] %v470_v62  ;;  %v457_v3 = vmax.f32 %v311_v63, 0.0  ;;  %v473_v4 = vmax.f32 %v391_v0, 0.0  ;;  %v306_v5 = vadd.f32 %v885_v48, %v305_v1  ;;  %v386_v6 = vadd.f32 %v885_v48, %v385_v2 }
  0xf5   : > { %v674_v7 = vpop.f32.mrf.mxu0  ;;  %v698_v8 = vpop.f32.mrf.mxu1 }
  0xf6   : > { %489 = vst [vmem:[%s894_s29 + $0x18] sm:$0xff] %v457_v3  ;;  %505 = vst [vmem:[%s894_s29 + $0x98] sm:$0xff] %v473_v4  ;;  %v456_v9 = vmax.f32 %v306_v5, 0.0  ;;  %v472_v10 = vmax.f32 %v386_v6, 0.0  ;;  %v321_v11 = vadd.f32 %v674_v7, %v885_v48  ;;  %v401_v12 = vadd.f32 %v698_v8, %v885_v48 }
  0xf7   : > { %v315_v13 = vpop.f32.mrf.mxu0  ;;  %v395_v14 = vpop.f32.mrf.mxu1 }
  0xf8   : > { %488 = vst [vmem:[%s894_s29 + $0x10] sm:$0xff] %v456_v9  ;;  %504 = vst [vmem:[%s894_s29 + $0x90] sm:$0xff] %v472_v10  ;;  %v459_v15 = vmax.f32 %v321_v11, 0.0  ;;  %v475_v16 = vmax.f32 %v401_v12, 0.0  ;;  %v316_v17 = vadd.f32 %v885_v48, %v315_v13  ;;  %v396_v18 = vadd.f32 %v885_v48, %v395_v14 }
  0xf9   : > { %v677_v19 = vpop.f32.mrf.mxu0  ;;  %v701_v20 = vpop.f32.mrf.mxu1 }
  0xfa   : > { %491 = vst [vmem:[%s894_s29 + $0x28] sm:$0xff] %v459_v15  ;;  %507 = vst [vmem:[%s894_s29 + $0xa8] sm:$0xff] %v475_v16  ;;  %v458_v21 = vmax.f32 %v316_v17, 0.0  ;;  %v474_v22 = vmax.f32 %v396_v18, 0.0  ;;  %v331_v23 = vadd.f32 %v677_v19, %v885_v48  ;;  %v411_v24 = vadd.f32 %v701_v20, %v885_v48 }
  0xfb   : > { %v325_v25 = vpop.f32.mrf.mxu0  ;;  %v405_v26 = vpop.f32.mrf.mxu1 }
  0xfc   : > { %490 = vst [vmem:[%s894_s29 + $0x20] sm:$0xff] %v458_v21  ;;  %506 = vst [vmem:[%s894_s29 + $0xa0] sm:$0xff] %v474_v22  ;;  %v461_v27 = vmax.f32 %v331_v23, 0.0  ;;  %v477_v28 = vmax.f32 %v411_v24, 0.0  ;;  %v326_v29 = vadd.f32 %v885_v48, %v325_v25  ;;  %v406_v30 = vadd.f32 %v885_v48, %v405_v26 }
  0xfd   : > { %v680_v31 = vpop.f32.mrf.mxu0  ;;  %v704_v32 = vpop.f32.mrf.mxu1 }
  0xfe   : > { %493 = vst [vmem:[%s894_s29 + $0x38] sm:$0xff] %v461_v27  ;;  %509 = vst [vmem:[%s894_s29 + $0xb8] sm:$0xff] %v477_v28  ;;  %v460_v33 = vmax.f32 %v326_v29, 0.0  ;;  %v476_v34 = vmax.f32 %v406_v30, 0.0  ;;  %v341_v35 = vadd.f32 %v680_v31, %v885_v48  ;;  %v421_v36 = vadd.f32 %v704_v32, %v885_v48 }
  0xff   : > { %v335_v37 = vpop.f32.mrf.mxu0  ;;  %v415_v38 = vpop.f32.mrf.mxu1 }
 0x100   : > { %492 = vst [vmem:[%s894_s29 + $0x30] sm:$0xff] %v460_v33  ;;  %508 = vst [vmem:[%s894_s29 + $0xb0] sm:$0xff] %v476_v34  ;;  %v463_v39 = vmax.f32 %v341_v35, 0.0  ;;  %v479_v40 = vmax.f32 %v421_v36, 0.0  ;;  %v336_v41 = vadd.f32 %v885_v48, %v335_v37  ;;  %v416_v42 = vadd.f32 %v885_v48, %v415_v38 }
 0x101   : > { %v683_v43 = vpop.f32.mrf.mxu0  ;;  %v707_v44 = vpop.f32.mrf.mxu1 }
 0x102   : > { %495 = vst [vmem:[%s894_s29 + $0x48] sm:$0xff] %v463_v39  ;;  %511 = vst [vmem:[%s894_s29 + $0xc8] sm:$0xff] %v479_v40  ;;  %v462_v45 = vmax.f32 %v336_v41, 0.0  ;;  %v478_v46 = vmax.f32 %v416_v42, 0.0  ;;  %v351_v47 = vadd.f32 %v683_v43, %v885_v48  ;;  %v431_v49 = vadd.f32 %v707_v44, %v885_v48 }
 0x103   : > { %v345_v50 = vpop.f32.mrf.mxu0  ;;  %v425_v51 = vpop.f32.mrf.mxu1 }
 0x104   : > { %494 = vst [vmem:[%s894_s29 + $0x40] sm:$0xff] %v462_v45  ;;  %510 = vst [vmem:[%s894_s29 + $0xc0] sm:$0xff] %v478_v46  ;;  %v465_v52 = vmax.f32 %v351_v47, 0.0  ;;  %v481_v53 = vmax.f32 %v431_v49, 0.0  ;;  %v346_v54 = vadd.f32 %v885_v48, %v345_v50  ;;  %v426_v55 = vadd.f32 %v885_v48, %v425_v51 }
 0x105   : > { %v686_v56 = vpop.f32.mrf.mxu0  ;;  %v710_v57 = vpop.f32.mrf.mxu1 }
 0x106   : > { %497 = vst [vmem:[%s894_s29 + $0x58] sm:$0xff] %v465_v52  ;;  %513 = vst [vmem:[%s894_s29 + $0xd8] sm:$0xff] %v481_v53  ;;  %v464_v58 = vmax.f32 %v346_v54, 0.0  ;;  %v480_v59 = vmax.f32 %v426_v55, 0.0  ;;  %v361_v60 = vadd.f32 %v686_v56, %v885_v48  ;;  %v441_v61 = vadd.f32 %v710_v57, %v885_v48 }
 0x107   : > { %v355_v62 = vpop.f32.mrf.mxu0  ;;  %v435_v63 = vpop.f32.mrf.mxu1 }
 0x108   : > { %496 = vst [vmem:[%s894_s29 + $0x50] sm:$0xff] %v464_v58  ;;  %512 = vst [vmem:[%s894_s29 + $0xd0] sm:$0xff] %v480_v59  ;;  %v467_v0 = vmax.f32 %v361_v60, 0.0  ;;  %v483_v1 = vmax.f32 %v441_v61, 0.0  ;;  %v356_v2 = vadd.f32 %v885_v48, %v355_v62  ;;  %v436_v3 = vadd.f32 %v885_v48, %v435_v63 }
 0x109   : > { %v689_v4 = vpop.f32.mrf.mxu0  ;;  %v713_v5 = vpop.f32.mrf.mxu1 }
 0x10a   : > { %499 = vst [vmem:[%s894_s29 + $0x68] sm:$0xff] %v467_v0  ;;  %515 = vst [vmem:[%s894_s29 + $0xe8] sm:$0xff] %v483_v1  ;;  %v466_v6 = vmax.f32 %v356_v2, 0.0  ;;  %v482_v7 = vmax.f32 %v436_v3, 0.0  ;;  %v371_v8 = vadd.f32 %v689_v4, %v885_v48  ;;  %v451_v9 = vadd.f32 %v713_v5, %v885_v48 }
 0x10b   : > { %v365_v10 = vpop.f32.mrf.mxu0  ;;  %v445_v11 = vpop.f32.mrf.mxu1 }
 0x10c   : > { %498 = vst [vmem:[%s894_s29 + $0x60] sm:$0xff] %v466_v6  ;;  %514 = vst [vmem:[%s894_s29 + $0xe0] sm:$0xff] %v482_v7  ;;  %v469_v12 = vmax.f32 %v371_v8, 0.0  ;;  %v485_v13 = vmax.f32 %v451_v9, 0.0  ;;  %v366_v14 = vadd.f32 %v885_v48, %v365_v10  ;;  %v446_v15 = vadd.f32 %v885_v48, %v445_v11 }
 0x10e   : > { %501 = vst [vmem:[%s894_s29 + $0x78] sm:$0xff] %v469_v12  ;;  %517 = vst [vmem:[%s894_s29 + $0xf8] sm:$0xff] %v485_v13  ;;  %v468_v16 = vmax.f32 %v366_v14, 0.0  ;;  %v484_v17 = vmax.f32 %v446_v15, 0.0 }
 0x110   : > { %500 = vst [vmem:[%s894_s29 + $0x70] sm:$0xff] %v468_v16  ;;  %516 = vst [vmem:[%s894_s29 + $0xf0] sm:$0xff] %v484_v17 }
 0x111 PF: > { %s13_s12 = sadd.s32 1, %s760_s12  }
 0x112   : > { %p10_p4 = scmp.ge.s32.totalorder %s13_s12, 4  }
 0x114   :  { %12 = sbr.rel (!%p10_p4) target bundleno = 1 (0x1), region = 62 }

// kernel: bg_restore_net.6
= control target key start
LH: loop header
LB: loop body
LE: loop exit
PB: predicated region body
PF: predicated region fallthrough
CT: control target
= control target key end

     0   :  { %s1118_s12 = smov 0   ;;  %s1393_s0 = inlined_call_operand.vmem [shape: f32[2048,128], index: 0, kind: input, shape index: {}]   ;;  %s1394_s1 = inlined_call_operand.vmem [shape: f32[128,128], index: 1, kind: input, shape index: {}]   ;;  %s1395_s2 = inlined_call_operand.vmem [shape: f32[1,128], index: 2, kind: input, shape index: {}]   ;;  %s1396_s3 = inlined_call_operand.vmem [shape: f32[2048,128], index: 3, kind: output, shape index: {}]  }
   0x1 LB: > { %s830_s13 = sadd.s32 4294967295, %s1096_s12   ;;  %p834_p0 = scmp.ge.s32.totalorder %s1096_s12, 1  ;;  %s1096_s12 = sphi %s1118_s12, %s13_s12  }
   0x2   : > { %p138_p1 = scmp.lt.s32.totalorder %s1096_s12, 5 }
   0x4   : > { %p139_p2 = pnand %p834_p0, %p138_p1 }
   0x5   : > { %s835_s30 = sshll.u32 (!%p139_p2), %s830_s13, 6 }
   0x6   : > { %142 = sbr.rel (%p139_p2) target bundleno = 305 (0x131), region = 32  ;;  %p163_p3 = scmp.lt.s32.totalorder (!%p139_p2), %s835_s30, 255 }
   0xb   : > { %v253_v0 = vld [vmem:[%s1394_s1 + $0x78] sm:$0xff]  ;;  %v252_v1 = vld [vmem:[%s1394_s1 + $0x70] sm:$0xff]  ;;  %v251_v2 = vld [vmem:[%s1394_s1 + $0x68] sm:$0xff]  ;;  %s1398_s30 = smov (!%p163_p3, %s835_s30), 255 }
   0xc   : > { %922 = vmatprep.subr.mxu0 %v253_v0  ;;  %1050 = vmatprep.subr.mxu1 %v253_v0  ;;  %v250_v3 = vld [vmem:[%s1394_s1 + $0x60] sm:$0xff]  ;;  %v249_v4 = vld [vmem:[%s1394_s1 + $0x58] sm:$0xff]  ;;  %v248_v5 = vld [vmem:[%s1394_s1 + $0x50] sm:$0xff]  ;;  %s836_s17 = sshll.u32 %s1398_s30, 3 }
   0xd   : > { %923 = vmatpush3.msra.mxu0 %v253_v0  ;;  %1066 = vmatpush3.msra.mxu1 %v253_v0  ;;  %v247_v6 = vld [vmem:[%s1394_s1 + $0x48] sm:$0xff]  ;;  %v246_v7 = vld [vmem:[%s1394_s1 + $0x40] sm:$0xff]  ;;  %v245_v8 = vld [vmem:[%s1394_s1 + $0x38] sm:$0xff]  ;;  %s1181_s22 = scalar_lea.vmem %s1393_s0, %s836_s17  ;;  %s1262_s29 = scalar_lea.vmem %s1396_s3, %s836_s17 }
   0xe   : > { %924 = vmatprep.subr.mxu0 %v252_v1  ;;  %1051 = vmatprep.subr.mxu1 %v252_v1  ;;  %v244_v9 = vld [vmem:[%s1394_s1 + $0x30] sm:$0xff]  ;;  %v243_v10 = vld [vmem:[%s1394_s1 + $0x28] sm:$0xff]  ;;  %v242_v11 = vld [vmem:[%s1394_s1 + $0x20] sm:$0xff] }
   0xf   : > { %925 = vmatpush3.msra.mxu0 %v252_v1  ;;  %1067 = vmatpush3.msra.mxu1 %v252_v1  ;;  %v241_v12 = vld [vmem:[%s1394_s1 + $0x18] sm:$0xff]  ;;  %v240_v13 = vld [vmem:[%s1394_s1 + $0x10] sm:$0xff]  ;;  %v239_v14 = vld [vmem:[%s1394_s1 + $0x8] sm:$0xff] }
  0x10   : > { %926 = vmatprep.subr.mxu0 %v251_v2  ;;  %1052 = vmatprep.subr.mxu1 %v251_v2  ;;  %v238_v15 = vld [vmem:[%s1394_s1] sm:$0xff]  ;;  %v175_v18 = vld [vmem:[%s1181_s22 + $0x8] sm:$0xff]  ;;  %v176_v20 = vld [vmem:[%s1181_s22 + $0x10] sm:$0xff] }
  0x11   : > { %927 = vmatpush3.msra.mxu0 %v251_v2  ;;  %1068 = vmatpush3.msra.mxu1 %v251_v2  ;;  %v174_v16 = vld [vmem:[%s1181_s22] sm:$0xff]  ;;  %v207_v19 = vld [vmem:[%s1181_s22 + $0x108] sm:$0xff]  ;;  %v208_v21 = vld [vmem:[%s1181_s22 + $0x110] sm:$0xff] }
  0x12   : > { %928 = vmatprep.subr.mxu0 %v250_v3  ;;  %1053 = vmatprep.subr.mxu1 %v250_v3  ;;  %v206_v17 = vld [vmem:[%s1181_s22 + $0x100] sm:$0xff]  ;;  %v177_v22 = vld [vmem:[%s1181_s22 + $0x18] sm:$0xff]  ;;  %v179_v26 = vld [vmem:[%s1181_s22 + $0x28] sm:$0xff] }
  0x13   : > { %929 = vmatpush3.msra.mxu0 %v250_v3  ;;  %1069 = vmatpush3.msra.mxu1 %v250_v3  ;;  %v209_v23 = vld [vmem:[%s1181_s22 + $0x118] sm:$0xff]  ;;  %v178_v24 = vld [vmem:[%s1181_s22 + $0x20] sm:$0xff]  ;;  %v211_v27 = vld [vmem:[%s1181_s22 + $0x128] sm:$0xff] }
  0x14   : > { %930 = vmatprep.subr.mxu0 %v249_v4  ;;  %1054 = vmatprep.subr.mxu1 %v249_v4  ;;  %v210_v25 = vld [vmem:[%s1181_s22 + $0x120] sm:$0xff]  ;;  %v180_v28 = vld [vmem:[%s1181_s22 + $0x30] sm:$0xff]  ;;  %v181_v30 = vld [vmem:[%s1181_s22 + $0x38] sm:$0xff] }
  0x15   : > { %931 = vmatpush3.msra.mxu0 %v249_v4  ;;  %1070 = vmatpush3.msra.mxu1 %v249_v4  ;;  %v212_v29 = vld [vmem:[%s1181_s22 + $0x130] sm:$0xff]  ;;  %v213_v31 = vld [vmem:[%s1181_s22 + $0x138] sm:$0xff]  ;;  %v182_v32 = vld [vmem:[%s1181_s22 + $0x40] sm:$0xff] }
  0x16   : > { %932 = vmatprep.subr.mxu0 %v248_v5  ;;  %1055 = vmatprep.subr.mxu1 %v248_v5  ;;  %v214_v33 = vld [vmem:[%s1181_s22 + $0x140] sm:$0xff]  ;;  %v183_v34 = vld [vmem:[%s1181_s22 + $0x48] sm:$0xff]  ;;  %v184_v36 = vld [vmem:[%s1181_s22 + $0x50] sm:$0xff] }
  0x17   : > { %933 = vmatpush3.msra.mxu0 %v248_v5  ;;  %1071 = vmatpush3.msra.mxu1 %v248_v5  ;;  %v215_v35 = vld [vmem:[%s1181_s22 + $0x148] sm:$0xff]  ;;  %v216_v37 = vld [vmem:[%s1181_s22 + $0x150] sm:$0xff]  ;;  %v185_v38 = vld [vmem:[%s1181_s22 + $0x58] sm:$0xff] }
  0x18   : > { %934 = vmatprep.subr.mxu0 %v247_v6  ;;  %1056 = vmatprep.subr.mxu1 %v247_v6  ;;  %v217_v39 = vld [vmem:[%s1181_s22 + $0x158] sm:$0xff]  ;;  %v186_v40 = vld [vmem:[%s1181_s22 + $0x60] sm:$0xff]  ;;  %v187_v42 = vld [vmem:[%s1181_s22 + $0x68] sm:$0xff] }
  0x19   : > { %935 = vmatpush3.msra.mxu0 %v247_v6  ;;  %1072 = vmatpush3.msra.mxu1 %v247_v6  ;;  %v218_v41 = vld [vmem:[%s1181_s22 + $0x160] sm:$0xff]  ;;  %v219_v43 = vld [vmem:[%s1181_s22 + $0x168] sm:$0xff]  ;;  %v188_v44 = vld [vmem:[%s1181_s22 + $0x70] sm:$0xff] }
  0x1a   : > { %936 = vmatprep.subr.mxu0 %v246_v7  ;;  %1057 = vmatprep.subr.mxu1 %v246_v7  ;;  %v220_v45 = vld [vmem:[%s1181_s22 + $0x170] sm:$0xff]  ;;  %v189_v46 = vld [vmem:[%s1181_s22 + $0x78] sm:$0xff]  ;;  %v190_v48 = vld [vmem:[%s1181_s22 + $0x80] sm:$0xff] }
  0x1b   : > { %937 = vmatpush3.msra.mxu0 %v246_v7  ;;  %1073 = vmatpush3.msra.mxu1 %v246_v7  ;;  %v221_v47 = vld [vmem:[%s1181_s22 + $0x178] sm:$0xff]  ;;  %v222_v49 = vld [vmem:[%s1181_s22 + $0x180] sm:$0xff]  ;;  %v191_v50 = vld [vmem:[%s1181_s22 + $0x88] sm:$0xff] }
  0x1c   : > { %938 = vmatprep.subr.mxu0 %v245_v8  ;;  %1058 = vmatprep.subr.mxu1 %v245_v8  ;;  %v223_v51 = vld [vmem:[%s1181_s22 + $0x188] sm:$0xff]  ;;  %v192_v52 = vld [vmem:[%s1181_s22 + $0x90] sm:$0xff]  ;;  %v193_v54 = vld [vmem:[%s1181_s22 + $0x98] sm:$0xff] }
  0x1d   : > { %939 = vmatpush3.msra.mxu0 %v245_v8  ;;  %1074 = vmatpush3.msra.mxu1 %v245_v8  ;;  %v224_v53 = vld [vmem:[%s1181_s22 + $0x190] sm:$0xff]  ;;  %v225_v55 = vld [vmem:[%s1181_s22 + $0x198] sm:$0xff]  ;;  %v194_v56 = vld [vmem:[%s1181_s22 + $0xa0] sm:$0xff] }
  0x1e   : > { %940 = vmatprep.subr.mxu0 %v244_v9  ;;  %1059 = vmatprep.subr.mxu1 %v244_v9  ;;  %v226_v57 = vld [vmem:[%s1181_s22 + $0x1a0] sm:$0xff]  ;;  %v195_v58 = vld [vmem:[%s1181_s22 + $0xa8] sm:$0xff]  ;;  %v196_v60 = vld [vmem:[%s1181_s22 + $0xb0] sm:$0xff] }
  0x1f   : > { %941 = vmatpush3.msra.mxu0 %v244_v9  ;;  %1075 = vmatpush3.msra.mxu1 %v244_v9  ;;  %v227_v59 = vld [vmem:[%s1181_s22 + $0x1a8] sm:$0xff]  ;;  %v228_v61 = vld [vmem:[%s1181_s22 + $0x1b0] sm:$0xff]  ;;  %v197_v62 = vld [vmem:[%s1181_s22 + $0xb8] sm:$0xff] }
  0x20   : > { %942 = vmatprep.subr.mxu0 %v243_v10  ;;  %1060 = vmatprep.subr.mxu1 %v243_v10  ;;  %v229_v63 = vld [vmem:[%s1181_s22 + $0x1b8] sm:$0xff]  ;;  %v198_v0 = vld [vmem:[%s1181_s22 + $0xc0] sm:$0xff]  ;;  %v199_v2 = vld [vmem:[%s1181_s22 + $0xc8] sm:$0xff] }
  0x21   : > { %943 = vmatpush3.msra.mxu0 %v243_v10  ;;  %1076 = vmatpush3.msra.mxu1 %v243_v10  ;;  %v230_v1 = vld [vmem:[%s1181_s22 + $0x1c0] sm:$0xff]  ;;  %v231_v3 = vld [vmem:[%s1181_s22 + $0x1c8] sm:$0xff]  ;;  %v200_v4 = vld [vmem:[%s1181_s22 + $0xd0] sm:$0xff] }
  0x22   : > { %944 = vmatprep.subr.mxu0 %v242_v11  ;;  %1061 = vmatprep.subr.mxu1 %v242_v11  ;;  %v232_v5 = vld [vmem:[%s1181_s22 + $0x1d0] sm:$0xff]  ;;  %v201_v6 = vld [vmem:[%s1181_s22 + $0xd8] sm:$0xff]  ;;  %v202_v8 = vld [vmem:[%s1181_s22 + $0xe0] sm:$0xff] }
  0x23   : > { %945 = vmatpush3.msra.mxu0 %v242_v11  ;;  %1077 = vmatpush3.msra.mxu1 %v242_v11  ;;  %v233_v7 = vld [vmem:[%s1181_s22 + $0x1d8] sm:$0xff]  ;;  %v234_v9 = vld [vmem:[%s1181_s22 + $0x1e0] sm:$0xff]  ;;  %v203_v10 = vld [vmem:[%s1181_s22 + $0xe8] sm:$0xff] }
  0x24   : > { %946 = vmatprep.subr.mxu0 %v241_v12  ;;  %1062 = vmatprep.subr.mxu1 %v241_v12  ;;  %v235_v11 = vld [vmem:[%s1181_s22 + $0x1e8] sm:$0xff] }
  0x25   : > { %947 = vmatpush3.msra.mxu0 %v241_v12  ;;  %1078 = vmatpush3.msra.mxu1 %v241_v12  ;;  %v204_v12 = vld [vmem:[%s1181_s22 + $0xf0] sm:$0xff] }
  0x26   : > { %948 = vmatprep.subr.mxu0 %v240_v13  ;;  %1063 = vmatprep.subr.mxu1 %v240_v13 }
  0x27   : > { %949 = vmatpush3.msra.mxu0 %v240_v13  ;;  %1079 = vmatpush3.msra.mxu1 %v240_v13  ;;  %v236_v13 = vld [vmem:[%s1181_s22 + $0x1f0] sm:$0xff] }
  0x28   : > { %950 = vmatprep.subr.mxu0 %v239_v14  ;;  %1064 = vmatprep.subr.mxu1 %v239_v14 }
  0x29   : > { %951 = vmatpush3.msra.mxu0 %v239_v14  ;;  %1080 = vmatpush3.msra.mxu1 %v239_v14  ;;  %v205_v14 = vld [vmem:[%s1181_s22 + $0xf8] sm:$0xff] }
  0x2a   : > { %952 = vmatprep.subr.mxu0 %v238_v15  ;;  %1065 = vmatprep.subr.mxu1 %v238_v15 }
  0x2b   : > { %953 = vmatpush3.msra.mxu0 %v238_v15  ;;  %1081 = vmatpush3.msra.mxu1 %v238_v15  ;;  %v237_v15 = vld [vmem:[%s1181_s22 + $0x1f8] sm:$0xff] }
  0x2c   : > { %954 = vmatprep.mubr.f32.mxu0 %v174_v16  ;;  %1002 = vmatprep.mubr.f32.mxu1 %v206_v17  ;;  %v1253_v16 = vld [vmem:[%s1395_s2] ss:$0 sm:$0xff] }
  0x2d   : > { %955 = vmatmul.mubr.f32.vlgmr.msra.gmra.mxu0 %v175_v18  ;;  %1003 = vmatmul.mubr.f32.vlgmr.msra.gmra.mxu1 %v207_v19 }
  0x2e   : > { %957 = vmatprep.mubr.f32.mxu0 %v176_v20  ;;  %1005 = vmatprep.mubr.f32.mxu1 %v208_v21 }
  0x31   : > { %958 = vmatmul.mubr.f32.gmra.mxu0 %v177_v22  ;;  %1006 = vmatmul.mubr.f32.gmra.mxu1 %v209_v23 }
  0x32   : > { %960 = vmatprep.mubr.f32.mxu0 %v178_v24  ;;  %1008 = vmatprep.mubr.f32.mxu1 %v210_v25 }
  0x35   : > { %961 = vmatmul.mubr.f32.gmra.mxu0 %v179_v26  ;;  %1009 = vmatmul.mubr.f32.gmra.mxu1 %v211_v27 }
  0x36   : > { %963 = vmatprep.mubr.f32.mxu0 %v180_v28  ;;  %1011 = vmatprep.mubr.f32.mxu1 %v212_v29 }
  0x39   : > { %964 = vmatmul.mubr.f32.gmra.mxu0 %v181_v30  ;;  %1012 = vmatmul.mubr.f32.gmra.mxu1 %v213_v31 }
  0x3a   : > { %966 = vmatprep.mubr.f32.mxu0 %v182_v32  ;;  %1014 = vmatprep.mubr.f32.mxu1 %v214_v33 }
  0x3d   : > { %967 = vmatmul.mubr.f32.gmra.mxu0 %v183_v34  ;;  %1015 = vmatmul.mubr.f32.gmra.mxu1 %v215_v35 }
  0x3e   : > { %969 = vmatprep.mubr.f32.mxu0 %v184_v36  ;;  %1017 = vmatprep.mubr.f32.mxu1 %v216_v37 }
  0x41   : > { %970 = vmatmul.mubr.f32.gmra.mxu0 %v185_v38  ;;  %1018 = vmatmul.mubr.f32.gmra.mxu1 %v217_v39 }
  0x42   : > { %972 = vmatprep.mubr.f32.mxu0 %v186_v40  ;;  %1020 = vmatprep.mubr.f32.mxu1 %v218_v41 }
  0x45   : > { %973 = vmatmul.mubr.f32.gmra.mxu0 %v187_v42  ;;  %1021 = vmatmul.mubr.f32.gmra.mxu1 %v219_v43 }
  0x46   : > { %975 = vmatprep.mubr.f32.mxu0 %v188_v44  ;;  %1023 = vmatprep.mubr.f32.mxu1 %v220_v45 }
  0x49   : > { %976 = vmatmul.mubr.f32.gmra.mxu0 %v189_v46  ;;  %1024 = vmatmul.mubr.f32.gmra.mxu1 %v221_v47 }
  0x4a   : > { %978 = vmatprep.mubr.f32.mxu0 %v190_v48  ;;  %1026 = vmatprep.mubr.f32.mxu1 %v222_v49 }
  0x4d   : > { %979 = vmatmul.mubr.f32.gmra.mxu0 %v191_v50  ;;  %1027 = vmatmul.mubr.f32.gmra.mxu1 %v223_v51 }
  0x4e   : > { %981 = vmatprep.mubr.f32.mxu0 %v192_v52  ;;  %1029 = vmatprep.mubr.f32.mxu1 %v224_v53 }
  0x51   : > { %982 = vmatmul.mubr.f32.gmra.mxu0 %v193_v54  ;;  %1030 = vmatmul.mubr.f32.gmra.mxu1 %v225_v55 }
  0x52   : > { %984 = vmatprep.mubr.f32.mxu0 %v194_v56  ;;  %1032 = vmatprep.mubr.f32.mxu1 %v226_v57 }
  0x55   : > { %985 = vmatmul.mubr.f32.gmra.mxu0 %v195_v58  ;;  %1033 = vmatmul.mubr.f32.gmra.mxu1 %v227_v59 }
  0x56   : > { %987 = vmatprep.mubr.f32.mxu0 %v196_v60  ;;  %1035 = vmatprep.mubr.f32.mxu1 %v228_v61 }
  0x59   : > { %988 = vmatmul.mubr.f32.gmra.mxu0 %v197_v62  ;;  %1036 = vmatmul.mubr.f32.gmra.mxu1 %v229_v63 }
  0x5a   : > { %990 = vmatprep.mubr.f32.mxu0 %v198_v0  ;;  %1038 = vmatprep.mubr.f32.mxu1 %v230_v1 }
  0x5d   : > { %991 = vmatmul.mubr.f32.gmra.mxu0 %v199_v2  ;;  %1039 = vmatmul.mubr.f32.gmra.mxu1 %v231_v3 }
  0x5e   : > { %993 = vmatprep.mubr.f32.mxu0 %v200_v4  ;;  %1041 = vmatprep.mubr.f32.mxu1 %v232_v5 }
  0x61   : > { %994 = vmatmul.mubr.f32.gmra.mxu0 %v201_v6  ;;  %1042 = vmatmul.mubr.f32.gmra.mxu1 %v233_v7 }
  0x62   : > { %996 = vmatprep.mubr.f32.mxu0 %v202_v8  ;;  %1044 = vmatprep.mubr.f32.mxu1 %v234_v9 }
  0x65   : > { %997 = vmatmul.mubr.f32.gmra.mxu0 %v203_v10  ;;  %1045 = vmatmul.mubr.f32.gmra.mxu1 %v235_v11 }
  0x66   : > { %999 = vmatprep.mubr.f32.mxu0 %v204_v12  ;;  %1047 = vmatprep.mubr.f32.mxu1 %v236_v13 }
  0x69   : > { %1000 = vmatmul.mubr.f32.gmra.mxu0 %v205_v14  ;;  %1048 = vmatmul.mubr.f32.gmra.mxu1 %v237_v15 }
  0xed   : > { %v956_v17 = vpop.f32.mrf.mxu0  ;;  %v1004_v18 = vpop.f32.mrf.mxu1 }
  0xee   : > { %v333_v19 = vadd.f32 %v956_v17, %v1253_v16  ;;  %v493_v20 = vadd.f32 %v1004_v18, %v1253_v16 }
  0xef   : > { %v327_v21 = vpop.f32.mrf.mxu0  ;;  %v487_v22 = vpop.f32.mrf.mxu1 }
  0xf0   : > { %v647_v23 = vmax.f32 %v333_v19, 0.0  ;;  %v679_v24 = vmax.f32 %v493_v20, 0.0  ;;  %v328_v25 = vadd.f32 %v1253_v16, %v327_v21  ;;  %v488_v26 = vadd.f32 %v1253_v16, %v487_v22 }
  0xf1   : > { %v959_v27 = vpop.f32.mrf.mxu0  ;;  %v1007_v28 = vpop.f32.mrf.mxu1 }
  0xf2   : > { %711 = vst [vmem:[%s1262_s29 + $0x8] sm:$0xff] %v647_v23  ;;  %743 = vst [vmem:[%s1262_s29 + $0x108] sm:$0xff] %v679_v24  ;;  %v646_v29 = vmax.f32 %v328_v25, 0.0  ;;  %v678_v30 = vmax.f32 %v488_v26, 0.0  ;;  %v343_v31 = vadd.f32 %v959_v27, %v1253_v16  ;;  %v503_v32 = vadd.f32 %v1007_v28, %v1253_v16 }
  0xf3   : > { %v337_v33 = vpop.f32.mrf.mxu0  ;;  %v497_v34 = vpop.f32.mrf.mxu1 }
  0xf4   : > { %710 = vst [vmem:[%s1262_s29] sm:$0xff] %v646_v29  ;;  %742 = vst [vmem:[%s1262_s29 + $0x100] sm:$0xff] %v678_v30  ;;  %v649_v35 = vmax.f32 %v343_v31, 0.0  ;;  %v681_v36 = vmax.f32 %v503_v32, 0.0  ;;  %v338_v37 = vadd.f32 %v1253_v16, %v337_v33  ;;  %v498_v38 = vadd.f32 %v1253_v16, %v497_v34 }
  0xf5   : > { %v962_v39 = vpop.f32.mrf.mxu0  ;;  %v1010_v40 = vpop.f32.mrf.mxu1 }
  0xf6   : > { %713 = vst [vmem:[%s1262_s29 + $0x18] sm:$0xff] %v649_v35  ;;  %745 = vst [vmem:[%s1262_s29 + $0x118] sm:$0xff] %v681_v36  ;;  %v648_v41 = vmax.f32 %v338_v37, 0.0  ;;  %v680_v42 = vmax.f32 %v498_v38, 0.0  ;;  %v353_v43 = vadd.f32 %v962_v39, %v1253_v16  ;;  %v513_v44 = vadd.f32 %v1010_v40, %v1253_v16 }
  0xf7   : > { %v347_v45 = vpop.f32.mrf.mxu0  ;;  %v507_v46 = vpop.f32.mrf.mxu1 }
  0xf8   : > { %712 = vst [vmem:[%s1262_s29 + $0x10] sm:$0xff] %v648_v41  ;;  %744 = vst [vmem:[%s1262_s29 + $0x110] sm:$0xff] %v680_v42  ;;  %v651_v47 = vmax.f32 %v353_v43, 0.0  ;;  %v683_v48 = vmax.f32 %v513_v44, 0.0  ;;  %v348_v49 = vadd.f32 %v1253_v16, %v347_v45  ;;  %v508_v50 = vadd.f32 %v1253_v16, %v507_v46 }
  0xf9   : > { %v965_v51 = vpop.f32.mrf.mxu0  ;;  %v1013_v52 = vpop.f32.mrf.mxu1 }
  0xfa   : > { %715 = vst [vmem:[%s1262_s29 + $0x28] sm:$0xff] %v651_v47  ;;  %747 = vst [vmem:[%s1262_s29 + $0x128] sm:$0xff] %v683_v48  ;;  %v650_v53 = vmax.f32 %v348_v49, 0.0  ;;  %v682_v54 = vmax.f32 %v508_v50, 0.0  ;;  %v363_v55 = vadd.f32 %v965_v51, %v1253_v16  ;;  %v523_v56 = vadd.f32 %v1013_v52, %v1253_v16 }
  0xfb   : > { %v357_v57 = vpop.f32.mrf.mxu0  ;;  %v517_v58 = vpop.f32.mrf.mxu1 }
  0xfc   : > { %714 = vst [vmem:[%s1262_s29 + $0x20] sm:$0xff] %v650_v53  ;;  %746 = vst [vmem:[%s1262_s29 + $0x120] sm:$0xff] %v682_v54  ;;  %v653_v59 = vmax.f32 %v363_v55, 0.0  ;;  %v685_v60 = vmax.f32 %v523_v56, 0.0  ;;  %v358_v61 = vadd.f32 %v1253_v16, %v357_v57  ;;  %v518_v62 = vadd.f32 %v1253_v16, %v517_v58 }
  0xfd   : > { %v968_v63 = vpop.f32.mrf.mxu0  ;;  %v1016_v0 = vpop.f32.mrf.mxu1 }
  0xfe   : > { %717 = vst [vmem:[%s1262_s29 + $0x38] sm:$0xff] %v653_v59  ;;  %749 = vst [vmem:[%s1262_s29 + $0x138] sm:$0xff] %v685_v60  ;;  %v652_v1 = vmax.f32 %v358_v61, 0.0  ;;  %v684_v2 = vmax.f32 %v518_v62, 0.0  ;;  %v373_v3 = vadd.f32 %v968_v63, %v1253_v16  ;;  %v533_v4 = vadd.f32 %v1016_v0, %v1253_v16 }
  0xff   : > { %v367_v5 = vpop.f32.mrf.mxu0  ;;  %v527_v6 = vpop.f32.mrf.mxu1 }
 0x100   : > { %716 = vst [vmem:[%s1262_s29 + $0x30] sm:$0xff] %v652_v1  ;;  %748 = vst [vmem:[%s1262_s29 + $0x130] sm:$0xff] %v684_v2  ;;  %v655_v7 = vmax.f32 %v373_v3, 0.0  ;;  %v687_v8 = vmax.f32 %v533_v4, 0.0  ;;  %v368_v9 = vadd.f32 %v1253_v16, %v367_v5  ;;  %v528_v10 = vadd.f32 %v1253_v16, %v527_v6 }
 0x101   : > { %v971_v11 = vpop.f32.mrf.mxu0  ;;  %v1019_v12 = vpop.f32.mrf.mxu1 }
 0x102   : > { %719 = vst [vmem:[%s1262_s29 + $0x48] sm:$0xff] %v655_v7  ;;  %751 = vst [vmem:[%s1262_s29 + $0x148] sm:$0xff] %v687_v8  ;;  %v654_v13 = vmax.f32 %v368_v9, 0.0  ;;  %v686_v14 = vmax.f32 %v528_v10, 0.0  ;;  %v383_v15 = vadd.f32 %v971_v11, %v1253_v16  ;;  %v543_v17 = vadd.f32 %v1019_v12, %v1253_v16 }
 0x103   : > { %v377_v18 = vpop.f32.mrf.mxu0  ;;  %v537_v19 = vpop.f32.mrf.mxu1 }
 0x104   : > { %718 = vst [vmem:[%s1262_s29 + $0x40] sm:$0xff] %v654_v13  ;;  %750 = vst [vmem:[%s1262_s29 + $0x140] sm:$0xff] %v686_v14  ;;  %v657_v20 = vmax.f32 %v383_v15, 0.0  ;;  %v689_v21 = vmax.f32 %v543_v17, 0.0  ;;  %v378_v22 = vadd.f32 %v1253_v16, %v377_v18  ;;  %v538_v23 = vadd.f32 %v1253_v16, %v537_v19 }
 0x105   : > { %v974_v24 = vpop.f32.mrf.mxu0  ;;  %v1022_v25 = vpop.f32.mrf.mxu1 }
 0x106   : > { %721 = vst [vmem:[%s1262_s29 + $0x58] sm:$0xff] %v657_v20  ;;  %753 = vst [vmem:[%s1262_s29 + $0x158] sm:$0xff] %v689_v21  ;;  %v656_v26 = vmax.f32 %v378_v22, 0.0  ;;  %v688_v27 = vmax.f32 %v538_v23, 0.0  ;;  %v393_v28 = vadd.f32 %v974_v24, %v1253_v16  ;;  %v553_v29 = vadd.f32 %v1022_v25, %v1253_v16 }
 0x107   : > { %v387_v30 = vpop.f32.mrf.mxu0  ;;  %v547_v31 = vpop.f32.mrf.mxu1 }
 0x108   : > { %720 = vst [vmem:[%s1262_s29 + $0x50] sm:$0xff] %v656_v26  ;;  %752 = vst [vmem:[%s1262_s29 + $0x150] sm:$0xff] %v688_v27  ;;  %v659_v32 = vmax.f32 %v393_v28, 0.0  ;;  %v691_v33 = vmax.f32 %v553_v29, 0.0  ;;  %v388_v34 = vadd.f32 %v1253_v16, %v387_v30  ;;  %v548_v35 = vadd.f32 %v1253_v16, %v547_v31 }
 0x109   : > { %v977_v36 = vpop.f32.mrf.mxu0  ;;  %v1025_v37 = vpop.f32.mrf.mxu1 }
 0x10a   : > { %723 = vst [vmem:[%s1262_s29 + $0x68] sm:$0xff] %v659_v32  ;;  %755 = vst [vmem:[%s1262_s29 + $0x168] sm:$0xff] %v691_v33  ;;  %v658_v38 = vmax.f32 %v388_v34, 0.0  ;;  %v690_v39 = vmax.f32 %v548_v35, 0.0  ;;  %v403_v40 = vadd.f32 %v977_v36, %v1253_v16  ;;  %v563_v41 = vadd.f32 %v1025_v37, %v1253_v16 }
 0x10b   : > { %v397_v42 = vpop.f32.mrf.mxu0  ;;  %v557_v43 = vpop.f32.mrf.mxu1 }
 0x10c   : > { %722 = vst [vmem:[%s1262_s29 + $0x60] sm:$0xff] %v658_v38  ;;  %754 = vst [vmem:[%s1262_s29 + $0x160] sm:$0xff] %v690_v39  ;;  %v661_v44 = vmax.f32 %v403_v40, 0.0  ;;  %v693_v45 = vmax.f32 %v563_v41, 0.0  ;;  %v398_v46 = vadd.f32 %v1253_v16, %v397_v42  ;;  %v558_v47 = vadd.f32 %v1253_v16, %v557_v43 }
 0x10d   : > { %v980_v48 = vpop.f32.mrf.mxu0  ;;  %v1028_v49 = vpop.f32.mrf.mxu1 }
 0x10e   : > { %725 = vst [vmem:[%s1262_s29 + $0x78] sm:$0xff] %v661_v44  ;;  %757 = vst [vmem:[%s1262_s29 + $0x178] sm:$0xff] %v693_v45  ;;  %v660_v50 = vmax.f32 %v398_v46, 0.0  ;;  %v692_v51 = vmax.f32 %v558_v47, 0.0  ;;  %v413_v52 = vadd.f32 %v980_v48, %v1253_v16  ;;  %v573_v53 = vadd.f32 %v1028_v49, %v1253_v16 }
 0x10f   : > { %v407_v54 = vpop.f32.mrf.mxu0  ;;  %v567_v55 = vpop.f32.mrf.mxu1 }
 0x110   : > { %724 = vst [vmem:[%s1262_s29 + $0x70] sm:$0xff] %v660_v50  ;;  %756 = vst [vmem:[%s1262_s29 + $0x170] sm:$0xff] %v692_v51  ;;  %v663_v56 = vmax.f32 %v413_v52, 0.0  ;;  %v695_v57 = vmax.f32 %v573_v53, 0.0  ;;  %v408_v58 = vadd.f32 %v1253_v16, %v407_v54  ;;  %v568_v59 = vadd.f32 %v1253_v16, %v567_v55 }
 0x111   : > { %v983_v60 = vpop.f32.mrf.mxu0  ;;  %v1031_v61 = vpop.f32.mrf.mxu1 }
 0x112   : > { %727 = vst [vmem:[%s1262_s29 + $0x88] sm:$0xff] %v663_v56  ;;  %759 = vst [vmem:[%s1262_s29 + $0x188] sm:$0xff] %v695_v57  ;;  %v662_v62 = vmax.f32 %v408_v58, 0.0  ;;  %v694_v63 = vmax.f32 %v568_v59, 0.0  ;;  %v423_v0 = vadd.f32 %v983_v60, %v1253_v16  ;;  %v583_v1 = vadd.f32 %v1031_v61, %v1253_v16 }
 0x113   : > { %v417_v2 = vpop.f32.mrf.mxu0  ;;  %v577_v3 = vpop.f32.mrf.mxu1 }
 0x114   : > { %726 = vst [vmem:[%s1262_s29 + $0x80] sm:$0xff] %v662_v62  ;;  %758 = vst [vmem:[%s1262_s29 + $0x180] sm:$0xff] %v694_v63  ;;  %v665_v4 = vmax.f32 %v423_v0, 0.0  ;;  %v697_v5 = vmax.f32 %v583_v1, 0.0  ;;  %v418_v6 = vadd.f32 %v1253_v16, %v417_v2  ;;  %v578_v7 = vadd.f32 %v1253_v16, %v577_v3 }
 0x115   : > { %v986_v8 = vpop.f32.mrf.mxu0  ;;  %v1034_v9 = vpop.f32.mrf.mxu1 }
 0x116   : > { %729 = vst [vmem:[%s1262_s29 + $0x98] sm:$0xff] %v665_v4  ;;  %761 = vst [vmem:[%s1262_s29 + $0x198] sm:$0xff] %v697_v5  ;;  %v664_v10 = vmax.f32 %v418_v6, 0.0  ;;  %v696_v11 = vmax.f32 %v578_v7, 0.0  ;;  %v433_v12 = vadd.f32 %v986_v8, %v1253_v16  ;;  %v593_v13 = vadd.f32 %v1034_v9, %v1253_v16 }
 0x117   : > { %v427_v14 = vpop.f32.mrf.mxu0  ;;  %v587_v15 = vpop.f32.mrf.mxu1 }
 0x118   : > { %728 = vst [vmem:[%s1262_s29 + $0x90] sm:$0xff] %v664_v10  ;;  %760 = vst [vmem:[%s1262_s29 + $0x190] sm:$0xff] %v696_v11  ;;  %v667_v17 = vmax.f32 %v433_v12, 0.0  ;;  %v699_v18 = vmax.f32 %v593_v13, 0.0  ;;  %v428_v19 = vadd.f32 %v1253_v16, %v427_v14  ;;  %v588_v20 = vadd.f32 %v1253_v16, %v587_v15 }
 0x119   : > { %v989_v21 = vpop.f32.mrf.mxu0  ;;  %v1037_v22 = vpop.f32.mrf.mxu1 }
 0x11a   : > { %731 = vst [vmem:[%s1262_s29 + $0xa8] sm:$0xff] %v667_v17  ;;  %763 = vst [vmem:[%s1262_s29 + $0x1a8] sm:$0xff] %v699_v18  ;;  %v666_v23 = vmax.f32 %v428_v19, 0.0  ;;  %v698_v24 = vmax.f32 %v588_v20, 0.0  ;;  %v443_v25 = vadd.f32 %v989_v21, %v1253_v16  ;;  %v603_v26 = vadd.f32 %v1037_v22, %v1253_v16 }
 0x11b   : > { %v437_v27 = vpop.f32.mrf.mxu0  ;;  %v597_v28 = vpop.f32.mrf.mxu1 }
 0x11c   : > { %730 = vst [vmem:[%s1262_s29 + $0xa0] sm:$0xff] %v666_v23  ;;  %762 = vst [vmem:[%s1262_s29 + $0x1a0] sm:$0xff] %v698_v24  ;;  %v669_v29 = vmax.f32 %v443_v25, 0.0  ;;  %v701_v30 = vmax.f32 %v603_v26, 0.0  ;;  %v438_v31 = vadd.f32 %v1253_v16, %v437_v27  ;;  %v598_v32 = vadd.f32 %v1253_v16, %v597_v28 }
 0x11d   : > { %v992_v33 = vpop.f32.mrf.mxu0  ;;  %v1040_v34 = vpop.f32.mrf.mxu1 }
 0x11e   : > { %733 = vst [vmem:[%s1262_s29 + $0xb8] sm:$0xff] %v669_v29  ;;  %765 = vst [vmem:[%s1262_s29 + $0x1b8] sm:$0xff] %v701_v30  ;;  %v668_v35 = vmax.f32 %v438_v31, 0.0  ;;  %v700_v36 = vmax.f32 %v598_v32, 0.0  ;;  %v453_v37 = vadd.f32 %v992_v33, %v1253_v16  ;;  %v613_v38 = vadd.f32 %v1040_v34, %v1253_v16 }
 0x11f   : > { %v447_v39 = vpop.f32.mrf.mxu0  ;;  %v607_v40 = vpop.f32.mrf.mxu1 }
 0x120   : > { %732 = vst [vmem:[%s1262_s29 + $0xb0] sm:$0xff] %v668_v35  ;;  %764 = vst [vmem:[%s1262_s29 + $0x1b0] sm:$0xff] %v700_v36  ;;  %v671_v41 = vmax.f32 %v453_v37, 0.0  ;;  %v703_v42 = vmax.f32 %v613_v38, 0.0  ;;  %v448_v43 = vadd.f32 %v1253_v16, %v447_v39  ;;  %v608_v44 = vadd.f32 %v1253_v16, %v607_v40 }
 0x121   : > { %v995_v45 = vpop.f32.mrf.mxu0  ;;  %v1043_v46 = vpop.f32.mrf.mxu1 }
 0x122   : > { %735 = vst [vmem:[%s1262_s29 + $0xc8] sm:$0xff] %v671_v41  ;;  %767 = vst [vmem:[%s1262_s29 + $0x1c8] sm:$0xff] %v703_v42  ;;  %v670_v47 = vmax.f32 %v448_v43, 0.0  ;;  %v702_v48 = vmax.f32 %v608_v44, 0.0  ;;  %v463_v49 = vadd.f32 %v995_v45, %v1253_v16  ;;  %v623_v50 = vadd.f32 %v1043_v46, %v1253_v16 }
 0x123   : > { %v457_v51 = vpop.f32.mrf.mxu0  ;;  %v617_v52 = vpop.f32.mrf.mxu1 }
 0x124   : > { %734 = vst [vmem:[%s1262_s29 + $0xc0] sm:$0xff] %v670_v47  ;;  %766 = vst [vmem:[%s1262_s29 + $0x1c0] sm:$0xff] %v702_v48  ;;  %v673_v53 = vmax.f32 %v463_v49, 0.0  ;;  %v705_v54 = vmax.f32 %v623_v50, 0.0  ;;  %v458_v55 = vadd.f32 %v1253_v16, %v457_v51  ;;  %v618_v56 = vadd.f32 %v1253_v16, %v617_v52 }
 0x125   : > { %v998_v57 = vpop.f32.mrf.mxu0  ;;  %v1046_v58 = vpop.f32.mrf.mxu1 }
 0x126   : > { %737 = vst [vmem:[%s1262_s29 + $0xd8] sm:$0xff] %v673_v53  ;;  %769 = vst [vmem:[%s1262_s29 + $0x1d8] sm:$0xff] %v705_v54  ;;  %v672_v59 = vmax.f32 %v458_v55, 0.0  ;;  %v704_v60 = vmax.f32 %v618_v56, 0.0  ;;  %v473_v61 = vadd.f32 %v998_v57, %v1253_v16  ;;  %v633_v62 = vadd.f32 %v1046_v58, %v1253_v16 }
 0x127   : > { %v467_v63 = vpop.f32.mrf.mxu0  ;;  %v627_v0 = vpop.f32.mrf.mxu1 }
 0x128   : > { %736 = vst [vmem:[%s1262_s29 + $0xd0] sm:$0xff] %v672_v59  ;;  %768 = vst [vmem:[%s1262_s29 + $0x1d0] sm:$0xff] %v704_v60  ;;  %v675_v1 = vmax.f32 %v473_v61, 0.0  ;;  %v707_v2 = vmax.f32 %v633_v62, 0.0  ;;  %v468_v3 = vadd.f32 %v1253_v16, %v467_v63  ;;  %v628_v4 = vadd.f32 %v1253_v16, %v627_v0 }
 0x129   : > { %v1001_v5 = vpop.f32.mrf.mxu0  ;;  %v1049_v6 = vpop.f32.mrf.mxu1 }
 0x12a   : > { %739 = vst [vmem:[%s1262_s29 + $0xe8] sm:$0xff] %v675_v1  ;;  %771 = vst [vmem:[%s1262_s29 + $0x1e8] sm:$0xff] %v707_v2  ;;  %v674_v7 = vmax.f32 %v468_v3, 0.0  ;;  %v706_v8 = vmax.f32 %v628_v4, 0.0  ;;  %v483_v9 = vadd.f32 %v1001_v5, %v1253_v16  ;;  %v643_v10 = vadd.f32 %v1049_v6, %v1253_v16 }
 0x12b   : > { %v477_v11 = vpop.f32.mrf.mxu0  ;;  %v637_v12 = vpop.f32.mrf.mxu1 }
 0x12c   : > { %738 = vst [vmem:[%s1262_s29 + $0xe0] sm:$0xff] %v674_v7  ;;  %770 = vst [vmem:[%s1262_s29 + $0x1e0] sm:$0xff] %v706_v8  ;;  %v677_v13 = vmax.f32 %v483_v9, 0.0  ;;  %v709_v14 = vmax.f32 %v643_v10, 0.0  ;;  %v478_v15 = vadd.f32 %v1253_v16, %v477_v11  ;;  %v638_v17 = vadd.f32 %v1253_v16, %v637_v12 }
 0x12e   : > { %741 = vst [vmem:[%s1262_s29 + $0xf8] sm:$0xff] %v677_v13  ;;  %773 = vst [vmem:[%s1262_s29 + $0x1f8] sm:$0xff] %v709_v14  ;;  %v676_v18 = vmax.f32 %v478_v15, 0.0  ;;  %v708_v19 = vmax.f32 %v638_v17, 0.0 }
 0x130   : > { %740 = vst [vmem:[%s1262_s29 + $0xf0] sm:$0xff] %v676_v18  ;;  %772 = vst [vmem:[%s1262_s29 + $0x1f0] sm:$0xff] %v708_v19 }
 0x131 PF: > { %s13_s12 = sadd.s32 1, %s1096_s12  }
 0x132   : > { %p10_p4 = scmp.ge.s32.totalorder %s13_s12, 6  }
 0x134   :  { %12 = sbr.rel (!%p10_p4) target bundleno = 1 (0x1), region = 62 }

// kernel: bg_restore_net.7
= control target key start
LH: loop header
LB: loop body
LE: loop exit
PB: predicated region body
PF: predicated region fallthrough
CT: control target
= control target key end

     0   :  { %s1758_s12 = smov 0   ;;  %s2045_s0 = inlined_call_operand.vmem [shape: f32[2048,128], index: 0, kind: input, shape index: {}]   ;;  %s2046_s1 = inlined_call_operand.vmem [shape: f32[128,128], index: 1, kind: input, shape index: {}]   ;;  %s2047_s2 = inlined_call_operand.vmem [shape: f32[1,128], index: 2, kind: input, shape index: {}]   ;;  %s2048_s3 = inlined_call_operand.vmem [shape: f32[2048,128], index: 3, kind: output, shape index: {}]  }
   0x1 LB: > { %s1150_s13 = sadd.s32 4294967295, %s1736_s12   ;;  %p1154_p0 = scmp.ge.s32.totalorder %s1736_s12, 1  ;;  %s1736_s12 = sphi %s1758_s12, %s13_s12  }
   0x2   : > { %p138_p1 = scmp.lt.s32.totalorder %s1736_s12, 5 }
   0x4   : > { %p139_p2 = pnand %p1154_p0, %p138_p1 }
   0x5   : > { %s1155_s30 = sshll.u32 (!%p139_p2), %s1150_s13, 6 }
   0x6   : > { %142 = sbr.rel (%p139_p2) target bundleno = 384 (0x180), region = 32  ;;  %p163_p3 = scmp.lt.s32.totalorder (!%p139_p2), %s1155_s30, 255 }
   0xb   : > { %v253_v0 = vld [vmem:[%s2046_s1 + $0x78] sm:$0xff]  ;;  %v252_v1 = vld [vmem:[%s2046_s1 + $0x70] sm:$0xff]  ;;  %v251_v2 = vld [vmem:[%s2046_s1 + $0x68] sm:$0xff]  ;;  %s2050_s30 = smov (!%p163_p3, %s1155_s30), 255 }
   0xc   : > { %1306 = vmatprep.subr.mxu0 %v253_v0  ;;  %1434 = vmatprep.subr.mxu1 %v253_v0  ;;  %v250_v3 = vld [vmem:[%s2046_s1 + $0x60] sm:$0xff]  ;;  %v249_v4 = vld [vmem:[%s2046_s1 + $0x58] sm:$0xff]  ;;  %v248_v5 = vld [vmem:[%s2046_s1 + $0x50] sm:$0xff]  ;;  %s1156_s17 = sshll.u32 %s2050_s30, 3 }
   0xd   : > { %1307 = vmatpush3.msra.mxu0 %v253_v0  ;;  %1450 = vmatpush3.msra.mxu1 %v253_v0  ;;  %v247_v6 = vld [vmem:[%s2046_s1 + $0x48] sm:$0xff]  ;;  %v246_v7 = vld [vmem:[%s2046_s1 + $0x40] sm:$0xff]  ;;  %v245_v8 = vld [vmem:[%s2046_s1 + $0x38] sm:$0xff]  ;;  %s1821_s22 = scalar_lea.vmem %s2045_s0, %s1156_s17  ;;  %s1919_s29 = scalar_lea.vmem %s2048_s3, %s1156_s17 }
   0xe   : > { %1308 = vmatprep.subr.mxu0 %v252_v1  ;;  %1435 = vmatprep.subr.mxu1 %v252_v1  ;;  %v244_v9 = vld [vmem:[%s2046_s1 + $0x30] sm:$0xff]  ;;  %v243_v10 = vld [vmem:[%s2046_s1 + $0x28] sm:$0xff]  ;;  %v242_v11 = vld [vmem:[%s2046_s1 + $0x20] sm:$0xff] }
   0xf   : > { %1309 = vmatpush3.msra.mxu0 %v252_v1  ;;  %1451 = vmatpush3.msra.mxu1 %v252_v1  ;;  %v241_v12 = vld [vmem:[%s2046_s1 + $0x18] sm:$0xff]  ;;  %v240_v13 = vld [vmem:[%s2046_s1 + $0x10] sm:$0xff]  ;;  %v239_v14 = vld [vmem:[%s2046_s1 + $0x8] sm:$0xff] }
  0x10   : > { %1310 = vmatprep.subr.mxu0 %v251_v2  ;;  %1436 = vmatprep.subr.mxu1 %v251_v2  ;;  %v238_v15 = vld [vmem:[%s2046_s1] sm:$0xff]  ;;  %v175_v18 = vld [vmem:[%s1821_s22 + $0x8] sm:$0xff]  ;;  %v176_v20 = vld [vmem:[%s1821_s22 + $0x10] sm:$0xff] }
  0x11   : > { %1311 = vmatpush3.msra.mxu0 %v251_v2  ;;  %1452 = vmatpush3.msra.mxu1 %v251_v2  ;;  %v174_v16 = vld [vmem:[%s1821_s22] sm:$0xff]  ;;  %v207_v19 = vld [vmem:[%s1821_s22 + $0x108] sm:$0xff]  ;;  %v208_v21 = vld [vmem:[%s1821_s22 + $0x110] sm:$0xff] }
  0x12   : > { %1312 = vmatprep.subr.mxu0 %v250_v3  ;;  %1437 = vmatprep.subr.mxu1 %v250_v3  ;;  %v206_v17 = vld [vmem:[%s1821_s22 + $0x100] sm:$0xff]  ;;  %v177_v22 = vld [vmem:[%s1821_s22 + $0x18] sm:$0xff]  ;;  %v179_v26 = vld [vmem:[%s1821_s22 + $0x28] sm:$0xff] }
  0x13   : > { %1313 = vmatpush3.msra.mxu0 %v250_v3  ;;  %1453 = vmatpush3.msra.mxu1 %v250_v3  ;;  %v209_v23 = vld [vmem:[%s1821_s22 + $0x118] sm:$0xff]  ;;  %v178_v24 = vld [vmem:[%s1821_s22 + $0x20] sm:$0xff]  ;;  %v211_v27 = vld [vmem:[%s1821_s22 + $0x128] sm:$0xff] }
  0x14   : > { %1314 = vmatprep.subr.mxu0 %v249_v4  ;;  %1438 = vmatprep.subr.mxu1 %v249_v4  ;;  %v210_v25 = vld [vmem:[%s1821_s22 + $0x120] sm:$0xff]  ;;  %v180_v28 = vld [vmem:[%s1821_s22 + $0x30] sm:$0xff]  ;;  %v181_v30 = vld [vmem:[%s1821_s22 + $0x38] sm:$0xff] }
  0x15   : > { %1315 = vmatpush3.msra.mxu0 %v249_v4  ;;  %1454 = vmatpush3.msra.mxu1 %v249_v4  ;;  %v212_v29 = vld [vmem:[%s1821_s22 + $0x130] sm:$0xff]  ;;  %v213_v31 = vld [vmem:[%s1821_s22 + $0x138] sm:$0xff]  ;;  %v182_v32 = vld [vmem:[%s1821_s22 + $0x40] sm:$0xff] }
  0x16   : > { %1316 = vmatprep.subr.mxu0 %v248_v5  ;;  %1439 = vmatprep.subr.mxu1 %v248_v5  ;;  %v214_v33 = vld [vmem:[%s1821_s22 + $0x140] sm:$0xff]  ;;  %v183_v34 = vld [vmem:[%s1821_s22 + $0x48] sm:$0xff]  ;;  %v184_v36 = vld [vmem:[%s1821_s22 + $0x50] sm:$0xff] }
  0x17   : > { %1317 = vmatpush3.msra.mxu0 %v248_v5  ;;  %1455 = vmatpush3.msra.mxu1 %v248_v5  ;;  %v215_v35 = vld [vmem:[%s1821_s22 + $0x148] sm:$0xff]  ;;  %v216_v37 = vld [vmem:[%s1821_s22 + $0x150] sm:$0xff]  ;;  %v185_v38 = vld [vmem:[%s1821_s22 + $0x58] sm:$0xff] }
  0x18   : > { %1318 = vmatprep.subr.mxu0 %v247_v6  ;;  %1440 = vmatprep.subr.mxu1 %v247_v6  ;;  %v217_v39 = vld [vmem:[%s1821_s22 + $0x158] sm:$0xff]  ;;  %v186_v40 = vld [vmem:[%s1821_s22 + $0x60] sm:$0xff]  ;;  %v187_v42 = vld [vmem:[%s1821_s22 + $0x68] sm:$0xff] }
  0x19   : > { %1319 = vmatpush3.msra.mxu0 %v247_v6  ;;  %1456 = vmatpush3.msra.mxu1 %v247_v6  ;;  %v218_v41 = vld [vmem:[%s1821_s22 + $0x160] sm:$0xff]  ;;  %v219_v43 = vld [vmem:[%s1821_s22 + $0x168] sm:$0xff]  ;;  %v188_v44 = vld [vmem:[%s1821_s22 + $0x70] sm:$0xff] }
  0x1a   : > { %1320 = vmatprep.subr.mxu0 %v246_v7  ;;  %1441 = vmatprep.subr.mxu1 %v246_v7  ;;  %v220_v45 = vld [vmem:[%s1821_s22 + $0x170] sm:$0xff]  ;;  %v189_v46 = vld [vmem:[%s1821_s22 + $0x78] sm:$0xff]  ;;  %v190_v48 = vld [vmem:[%s1821_s22 + $0x80] sm:$0xff] }
  0x1b   : > { %1321 = vmatpush3.msra.mxu0 %v246_v7  ;;  %1457 = vmatpush3.msra.mxu1 %v246_v7  ;;  %v221_v47 = vld [vmem:[%s1821_s22 + $0x178] sm:$0xff]  ;;  %v222_v49 = vld [vmem:[%s1821_s22 + $0x180] sm:$0xff]  ;;  %v191_v50 = vld [vmem:[%s1821_s22 + $0x88] sm:$0xff] }
  0x1c   : > { %1322 = vmatprep.subr.mxu0 %v245_v8  ;;  %1442 = vmatprep.subr.mxu1 %v245_v8  ;;  %v223_v51 = vld [vmem:[%s1821_s22 + $0x188] sm:$0xff]  ;;  %v192_v52 = vld [vmem:[%s1821_s22 + $0x90] sm:$0xff]  ;;  %v193_v54 = vld [vmem:[%s1821_s22 + $0x98] sm:$0xff] }
  0x1d   : > { %1323 = vmatpush3.msra.mxu0 %v245_v8  ;;  %1458 = vmatpush3.msra.mxu1 %v245_v8  ;;  %v224_v53 = vld [vmem:[%s1821_s22 + $0x190] sm:$0xff]  ;;  %v225_v55 = vld [vmem:[%s1821_s22 + $0x198] sm:$0xff]  ;;  %v194_v56 = vld [vmem:[%s1821_s22 + $0xa0] sm:$0xff] }
  0x1e   : > { %1324 = vmatprep.subr.mxu0 %v244_v9  ;;  %1443 = vmatprep.subr.mxu1 %v244_v9  ;;  %v226_v57 = vld [vmem:[%s1821_s22 + $0x1a0] sm:$0xff]  ;;  %v195_v58 = vld [vmem:[%s1821_s22 + $0xa8] sm:$0xff]  ;;  %v196_v60 = vld [vmem:[%s1821_s22 + $0xb0] sm:$0xff] }
  0x1f   : > { %1325 = vmatpush3.msra.mxu0 %v244_v9  ;;  %1459 = vmatpush3.msra.mxu1 %v244_v9  ;;  %v227_v59 = vld [vmem:[%s1821_s22 + $0x1a8] sm:$0xff]  ;;  %v228_v61 = vld [vmem:[%s1821_s22 + $0x1b0] sm:$0xff]  ;;  %v197_v62 = vld [vmem:[%s1821_s22 + $0xb8] sm:$0xff] }
  0x20   : > { %1326 = vmatprep.subr.mxu0 %v243_v10  ;;  %1444 = vmatprep.subr.mxu1 %v243_v10  ;;  %v229_v63 = vld [vmem:[%s1821_s22 + $0x1b8] sm:$0xff]  ;;  %v198_v0 = vld [vmem:[%s1821_s22 + $0xc0] sm:$0xff]  ;;  %v199_v2 = vld [vmem:[%s1821_s22 + $0xc8] sm:$0xff] }
  0x21   : > { %1327 = vmatpush3.msra.mxu0 %v243_v10  ;;  %1460 = vmatpush3.msra.mxu1 %v243_v10  ;;  %v230_v1 = vld [vmem:[%s1821_s22 + $0x1c0] sm:$0xff]  ;;  %v231_v3 = vld [vmem:[%s1821_s22 + $0x1c8] sm:$0xff]  ;;  %v200_v4 = vld [vmem:[%s1821_s22 + $0xd0] sm:$0xff] }
  0x22   : > { %1328 = vmatprep.subr.mxu0 %v242_v11  ;;  %1445 = vmatprep.subr.mxu1 %v242_v11  ;;  %v232_v5 = vld [vmem:[%s1821_s22 + $0x1d0] sm:$0xff]  ;;  %v201_v6 = vld [vmem:[%s1821_s22 + $0xd8] sm:$0xff]  ;;  %v202_v8 = vld [vmem:[%s1821_s22 + $0xe0] sm:$0xff] }
  0x23   : > { %1329 = vmatpush3.msra.mxu0 %v242_v11  ;;  %1461 = vmatpush3.msra.mxu1 %v242_v11  ;;  %v233_v7 = vld [vmem:[%s1821_s22 + $0x1d8] sm:$0xff]  ;;  %v234_v9 = vld [vmem:[%s1821_s22 + $0x1e0] sm:$0xff]  ;;  %v203_v10 = vld [vmem:[%s1821_s22 + $0xe8] sm:$0xff] }
  0x24   : > { %1330 = vmatprep.subr.mxu0 %v241_v12  ;;  %1446 = vmatprep.subr.mxu1 %v241_v12  ;;  %v235_v11 = vld [vmem:[%s1821_s22 + $0x1e8] sm:$0xff] }
  0x25   : > { %1331 = vmatpush3.msra.mxu0 %v241_v12  ;;  %1462 = vmatpush3.msra.mxu1 %v241_v12  ;;  %v204_v12 = vld [vmem:[%s1821_s22 + $0xf0] sm:$0xff] }
  0x26   : > { %1332 = vmatprep.subr.mxu0 %v240_v13  ;;  %1447 = vmatprep.subr.mxu1 %v240_v13 }
  0x27   : > { %1333 = vmatpush3.msra.mxu0 %v240_v13  ;;  %1463 = vmatpush3.msra.mxu1 %v240_v13  ;;  %v236_v13 = vld [vmem:[%s1821_s22 + $0x1f0] sm:$0xff] }
  0x28   : > { %1334 = vmatprep.subr.mxu0 %v239_v14  ;;  %1448 = vmatprep.subr.mxu1 %v239_v14 }
  0x29   : > { %1335 = vmatpush3.msra.mxu0 %v239_v14  ;;  %1464 = vmatpush3.msra.mxu1 %v239_v14  ;;  %v205_v14 = vld [vmem:[%s1821_s22 + $0xf8] sm:$0xff] }
  0x2a   : > { %1336 = vmatprep.subr.mxu0 %v238_v15  ;;  %1449 = vmatprep.subr.mxu1 %v238_v15 }
  0x2b   : > { %1337 = vmatpush3.msra.mxu0 %v238_v15  ;;  %1465 = vmatpush3.msra.mxu1 %v238_v15  ;;  %v237_v15 = vld [vmem:[%s1821_s22 + $0x1f8] sm:$0xff] }
  0x2c   : > { %1338 = vmatprep.mubr.f32.mxu0 %v174_v16  ;;  %1386 = vmatprep.mubr.f32.mxu1 %v206_v17  ;;  %v1893_v16 = vld [vmem:[%s2047_s2] ss:$0 sm:$0xff] }
  0x2d   : > { %1339 = vmatmul.mubr.f32.vlgmr.msra.gmra.mxu0 %v175_v18  ;;  %1387 = vmatmul.mubr.f32.vlgmr.msra.gmra.mxu1 %v207_v19 }
  0x2e   : > { %1341 = vmatprep.mubr.f32.mxu0 %v176_v20  ;;  %1389 = vmatprep.mubr.f32.mxu1 %v208_v21 }
  0x31   : > { %1342 = vmatmul.mubr.f32.gmra.mxu0 %v177_v22  ;;  %1390 = vmatmul.mubr.f32.gmra.mxu1 %v209_v23 }
  0x32   : > { %1344 = vmatprep.mubr.f32.mxu0 %v178_v24  ;;  %1392 = vmatprep.mubr.f32.mxu1 %v210_v25 }
  0x35   : > { %1345 = vmatmul.mubr.f32.gmra.mxu0 %v179_v26  ;;  %1393 = vmatmul.mubr.f32.gmra.mxu1 %v211_v27 }
  0x36   : > { %1347 = vmatprep.mubr.f32.mxu0 %v180_v28  ;;  %1395 = vmatprep.mubr.f32.mxu1 %v212_v29 }
  0x39   : > { %1348 = vmatmul.mubr.f32.gmra.mxu0 %v181_v30  ;;  %1396 = vmatmul.mubr.f32.gmra.mxu1 %v213_v31 }
  0x3a   : > { %1350 = vmatprep.mubr.f32.mxu0 %v182_v32  ;;  %1398 = vmatprep.mubr.f32.mxu1 %v214_v33 }
  0x3d   : > { %1351 = vmatmul.mubr.f32.gmra.mxu0 %v183_v34  ;;  %1399 = vmatmul.mubr.f32.gmra.mxu1 %v215_v35 }
  0x3e   : > { %1353 = vmatprep.mubr.f32.mxu0 %v184_v36  ;;  %1401 = vmatprep.mubr.f32.mxu1 %v216_v37 }
  0x41   : > { %1354 = vmatmul.mubr.f32.gmra.mxu0 %v185_v38  ;;  %1402 = vmatmul.mubr.f32.gmra.mxu1 %v217_v39 }
  0x42   : > { %1356 = vmatprep.mubr.f32.mxu0 %v186_v40  ;;  %1404 = vmatprep.mubr.f32.mxu1 %v218_v41 }
  0x45   : > { %1357 = vmatmul.mubr.f32.gmra.mxu0 %v187_v42  ;;  %1405 = vmatmul.mubr.f32.gmra.mxu1 %v219_v43 }
  0x46   : > { %1359 = vmatprep.mubr.f32.mxu0 %v188_v44  ;;  %1407 = vmatprep.mubr.f32.mxu1 %v220_v45 }
  0x49   : > { %1360 = vmatmul.mubr.f32.gmra.mxu0 %v189_v46  ;;  %1408 = vmatmul.mubr.f32.gmra.mxu1 %v221_v47 }
  0x4a   : > { %1362 = vmatprep.mubr.f32.mxu0 %v190_v48  ;;  %1410 = vmatprep.mubr.f32.mxu1 %v222_v49 }
  0x4d   : > { %1363 = vmatmul.mubr.f32.gmra.mxu0 %v191_v50  ;;  %1411 = vmatmul.mubr.f32.gmra.mxu1 %v223_v51 }
  0x4e   : > { %1365 = vmatprep.mubr.f32.mxu0 %v192_v52  ;;  %1413 = vmatprep.mubr.f32.mxu1 %v224_v53 }
  0x51   : > { %1366 = vmatmul.mubr.f32.gmra.mxu0 %v193_v54  ;;  %1414 = vmatmul.mubr.f32.gmra.mxu1 %v225_v55 }
  0x52   : > { %1368 = vmatprep.mubr.f32.mxu0 %v194_v56  ;;  %1416 = vmatprep.mubr.f32.mxu1 %v226_v57 }
  0x55   : > { %1369 = vmatmul.mubr.f32.gmra.mxu0 %v195_v58  ;;  %1417 = vmatmul.mubr.f32.gmra.mxu1 %v227_v59 }
  0x56   : > { %1371 = vmatprep.mubr.f32.mxu0 %v196_v60  ;;  %1419 = vmatprep.mubr.f32.mxu1 %v228_v61 }
  0x59   : > { %1372 = vmatmul.mubr.f32.gmra.mxu0 %v197_v62  ;;  %1420 = vmatmul.mubr.f32.gmra.mxu1 %v229_v63 }
  0x5a   : > { %1374 = vmatprep.mubr.f32.mxu0 %v198_v0  ;;  %1422 = vmatprep.mubr.f32.mxu1 %v230_v1 }
  0x5d   : > { %1375 = vmatmul.mubr.f32.gmra.mxu0 %v199_v2  ;;  %1423 = vmatmul.mubr.f32.gmra.mxu1 %v231_v3 }
  0x5e   : > { %1377 = vmatprep.mubr.f32.mxu0 %v200_v4  ;;  %1425 = vmatprep.mubr.f32.mxu1 %v232_v5 }
  0x61   : > { %1378 = vmatmul.mubr.f32.gmra.mxu0 %v201_v6  ;;  %1426 = vmatmul.mubr.f32.gmra.mxu1 %v233_v7 }
  0x62   : > { %1380 = vmatprep.mubr.f32.mxu0 %v202_v8  ;;  %1428 = vmatprep.mubr.f32.mxu1 %v234_v9 }
  0x65   : > { %1381 = vmatmul.mubr.f32.gmra.mxu0 %v203_v10  ;;  %1429 = vmatmul.mubr.f32.gmra.mxu1 %v235_v11 }
  0x66   : > { %1383 = vmatprep.mubr.f32.mxu0 %v204_v12  ;;  %1431 = vmatprep.mubr.f32.mxu1 %v236_v13 }
  0x69   : > { %1384 = vmatmul.mubr.f32.gmra.mxu0 %v205_v14  ;;  %1432 = vmatmul.mubr.f32.gmra.mxu1 %v237_v15 }
  0xed   : > { %v1340_v17 = vpop.f32.mrf.mxu0  ;;  %v1388_v18 = vpop.f32.mrf.mxu1 }
  0xee   : > { %v333_v19 = vadd.f32 %v1340_v17, %v1893_v16  ;;  %v493_v20 = vadd.f32 %v1388_v18, %v1893_v16 }
  0xef   : > { %v327_v21 = vpop.f32.mrf.mxu0  ;;  %v487_v22 = vpop.f32.mrf.mxu1 }
  0xf0   : > { %v1161_v23 = vmul.f32 -1.442695, %v333_v19  ;;  %v1193_v24 = vmul.f32 -1.442695, %v493_v20  ;;  %v328_v25 = vadd.f32 %v1893_v16, %v327_v21  ;;  %v488_v26 = vadd.f32 %v1893_v16, %v487_v22 }
  0xf1   : > { %v1343_v27 = vpop.f32.mrf.mxu0  ;;  %v1391_v28 = vpop.f32.mrf.mxu1 }
  0xf2   : > { %1474 = vpow2.f32 %v1161_v23  ;;  %v1160_v29 = vmul.f32 -1.442695, %v328_v25  ;;  %v1192_v30 = vmul.f32 -1.442695, %v488_v26  ;;  %v343_v31 = vadd.f32 %v1343_v27, %v1893_v16 }
  0xf3   : > { %1476 = vpow2.f32 %v1193_v24  ;;  %v503_v32 = vadd.f32 %v1391_v28, %v1893_v16  ;;  %v337_v33 = vpop.f32.mrf.mxu0  ;;  %v497_v34 = vpop.f32.mrf.mxu1 }
  0xf4   : > { %1478 = vpow2.f32 %v1160_v29  ;;  %v1163_v35 = vmul.f32 -1.442695, %v343_v31  ;;  %v338_v36 = vadd.f32 %v1893_v16, %v337_v33  ;;  %v498_v37 = vadd.f32 %v1893_v16, %v497_v34 }
  0xf5   : > { %1480 = vpow2.f32 %v1192_v30  ;;  %v1195_v38 = vmul.f32 -1.442695, %v503_v32  ;;  %v1346_v39 = vpop.f32.mrf.mxu0  ;;  %v1394_v40 = vpop.f32.mrf.mxu1 }
  0xf6   : > { %1482 = vpow2.f32 %v1163_v35  ;;  %v1162_v41 = vmul.f32 -1.442695, %v338_v36  ;;  %v1194_v42 = vmul.f32 -1.442695, %v498_v37  ;;  %v353_v43 = vadd.f32 %v1346_v39, %v1893_v16 }
  0xf7   : > { %1484 = vpow2.f32 %v1195_v38  ;;  %v513_v44 = vadd.f32 %v1394_v40, %v1893_v16  ;;  %v347_v45 = vpop.f32.mrf.mxu0  ;;  %v507_v46 = vpop.f32.mrf.mxu1 }
  0xf8   : > { %1486 = vpow2.f32 %v1162_v41  ;;  %v1165_v47 = vmul.f32 -1.442695, %v353_v43  ;;  %v348_v48 = vadd.f32 %v1893_v16, %v347_v45  ;;  %v508_v49 = vadd.f32 %v1893_v16, %v507_v46 }
  0xf9   : > { %1488 = vpow2.f32 %v1194_v42  ;;  %v1197_v50 = vmul.f32 -1.442695, %v513_v44  ;;  %v1349_v51 = vpop.f32.mrf.mxu0  ;;  %v1397_v52 = vpop.f32.mrf.mxu1 }
  0xfa   : > { %1490 = vpow2.f32 %v1165_v47  ;;  %v1164_v53 = vmul.f32 -1.442695, %v348_v48  ;;  %v1196_v54 = vmul.f32 -1.442695, %v508_v49  ;;  %v363_v55 = vadd.f32 %v1349_v51, %v1893_v16 }
  0xfb   : > { %1492 = vpow2.f32 %v1197_v50  ;;  %v523_v56 = vadd.f32 %v1397_v52, %v1893_v16  ;;  %v357_v57 = vpop.f32.mrf.mxu0  ;;  %v517_v58 = vpop.f32.mrf.mxu1 }
  0xfc   : > { %1494 = vpow2.f32 %v1164_v53  ;;  %v1167_v59 = vmul.f32 -1.442695, %v363_v55  ;;  %v358_v60 = vadd.f32 %v1893_v16, %v357_v57  ;;  %v518_v61 = vadd.f32 %v1893_v16, %v517_v58 }
  0xfd   : > { %1496 = vpow2.f32 %v1196_v54  ;;  %v1199_v62 = vmul.f32 -1.442695, %v523_v56  ;;  %v1352_v63 = vpop.f32.mrf.mxu0  ;;  %v1400_v0 = vpop.f32.mrf.mxu1 }
  0xfe   : > { %1498 = vpow2.f32 %v1167_v59  ;;  %v1166_v1 = vmul.f32 -1.442695, %v358_v60  ;;  %v1198_v2 = vmul.f32 -1.442695, %v518_v61  ;;  %v373_v34 = vadd.f32 %v1352_v63, %v1893_v16 }
  0xff   : > { %v1475_v3 = vpop.eup %1474  ;;  %1500 = vpow2.f32 %v1199_v62  ;;  %v367_v4 = vpop.f32.mrf.mxu0  ;;  %v533_v38 = vadd.f32 %v1400_v0, %v1893_v16 }
 0x100   : > { %v527_v5 = vpop.f32.mrf.mxu1  ;;  %v1477_v6 = vpop.eup %1476  ;;  %v839_v7 = vadd.f32 1.0, %v1475_v3  ;;  %1502 = vpow2.f32 %v1166_v1  ;;  %v368_v41 = vadd.f32 %v1893_v16, %v367_v4  ;;  %v1169_v48 = vmul.f32 -1.442695, %v373_v34 }
 0x101   : > { %v1479_v8 = vpop.eup %1478  ;;  %v871_v9 = vadd.f32 1.0, %v1477_v6  ;;  %1504 = vpow2.f32 %v1198_v2  ;;  %v1355_v10 = vpop.f32.mrf.mxu0  ;;  %v528_v44 = vadd.f32 %v1893_v16, %v527_v5  ;;  %v1201_v53 = vmul.f32 -1.442695, %v533_v38 }
 0x102   : > { %v1481_v11 = vpop.eup %1480  ;;  %1506 = vrcp.f32 %v839_v7  ;;  %v838_v12 = vadd.f32 1.0, %v1479_v8  ;;  %v1403_v13 = vpop.f32.mrf.mxu1  ;;  %v383_v49 = vadd.f32 %v1355_v10, %v1893_v16  ;;  %v1168_v56 = vmul.f32 -1.442695, %v368_v41 }
 0x103   : > { %v1483_v14 = vpop.eup %1482  ;;  %1508 = vrcp.f32 %v871_v9  ;;  %v870_v15 = vadd.f32 1.0, %v1481_v11  ;;  %v377_v21 = vpop.f32.mrf.mxu0  ;;  %v543_v54 = vadd.f32 %v1403_v13, %v1893_v16  ;;  %v1200_v59 = vmul.f32 -1.442695, %v528_v44 }
 0x104   : > { %v1485_v17 = vpop.eup %1484  ;;  %1510 = vrcp.f32 %v838_v12  ;;  %v841_v18 = vadd.f32 1.0, %v1483_v14  ;;  %v537_v24 = vpop.f32.mrf.mxu1  ;;  %v378_v57 = vadd.f32 %v1893_v16, %v377_v21  ;;  %v1171_v63 = vmul.f32 -1.442695, %v383_v49 }
 0x105   : > { %v1487_v19 = vpop.eup %1486  ;;  %1512 = vrcp.f32 %v870_v15  ;;  %v873_v20 = vadd.f32 1.0, %v1485_v17  ;;  %v1358_v31 = vpop.f32.mrf.mxu0  ;;  %v538_v60 = vadd.f32 %v1893_v16, %v537_v24  ;;  %v1203_v3 = vmul.f32 -1.442695, %v543_v54 }
 0x106   : > { %v1489_v22 = vpop.eup %1488  ;;  %1514 = vrcp.f32 %v841_v18  ;;  %v840_v23 = vadd.f32 1.0, %v1487_v19  ;;  %v1406_v35 = vpop.f32.mrf.mxu1  ;;  %v393_v0 = vadd.f32 %v1358_v31, %v1893_v16  ;;  %v1170_v6 = vmul.f32 -1.442695, %v378_v57 }
 0x107   : > { %v1491_v25 = vpop.eup %1490  ;;  %1516 = vrcp.f32 %v873_v20  ;;  %v872_v26 = vadd.f32 1.0, %v1489_v22  ;;  %v387_v45 = vpop.f32.mrf.mxu0  ;;  %v553_v4 = vadd.f32 %v1406_v35, %v1893_v16  ;;  %v1202_v9 = vmul.f32 -1.442695, %v538_v60 }
 0x108   : > { %v1493_v27 = vpop.eup %1492  ;;  %1518 = vrcp.f32 %v840_v23  ;;  %v843_v28 = vadd.f32 1.0, %v1491_v25  ;;  %v547_v50 = vpop.f32.mrf.mxu1  ;;  %v388_v7 = vadd.f32 %v1893_v16, %v387_v45  ;;  %v1173_v13 = vmul.f32 -1.442695, %v393_v0 }
 0x109   : > { %v1495_v29 = vpop.eup %1494  ;;  %1520 = vrcp.f32 %v872_v26  ;;  %v875_v30 = vadd.f32 1.0, %v1493_v27  ;;  %v1361_v61 = vpop.f32.mrf.mxu0  ;;  %v548_v10 = vadd.f32 %v1893_v16, %v547_v50  ;;  %v1205_v18 = vmul.f32 -1.442695, %v553_v4 }
 0x10a   : > { %v1497_v32 = vpop.eup %1496  ;;  %1522 = vrcp.f32 %v843_v28  ;;  %v842_v33 = vadd.f32 1.0, %v1495_v29  ;;  %v1409_v1 = vpop.f32.mrf.mxu1  ;;  %v403_v14 = vadd.f32 %v1361_v61, %v1893_v16  ;;  %v1172_v21 = vmul.f32 -1.442695, %v388_v7 }
 0x10b   : > { %v1499_v36 = vpop.eup %1498  ;;  %1524 = vrcp.f32 %v875_v30  ;;  %v874_v37 = vadd.f32 1.0, %v1497_v32  ;;  %v397_v11 = vpop.f32.mrf.mxu0  ;;  %v563_v19 = vadd.f32 %v1409_v1, %v1893_v16  ;;  %v1204_v24 = vmul.f32 -1.442695, %v548_v10 }
 0x10c   : > { %v1501_v39 = vpop.eup %1500  ;;  %1526 = vrcp.f32 %v842_v33  ;;  %v845_v40 = vadd.f32 1.0, %v1499_v36  ;;  %v557_v15 = vpop.f32.mrf.mxu1  ;;  %v398_v22 = vadd.f32 %v1893_v16, %v397_v11  ;;  %v1175_v28 = vmul.f32 -1.442695, %v403_v14 }
 0x10d   : > { %v1503_v42 = vpop.eup %1502  ;;  %1528 = vrcp.f32 %v874_v37  ;;  %v877_v43 = vadd.f32 1.0, %v1501_v39  ;;  %v558_v25 = vadd.f32 %v1893_v16, %v557_v15  ;;  %v1944_v26 = vpop.f32.mrf.mxu0  ;;  %v1207_v31 = vmul.f32 -1.442695, %v563_v19 }
 0x10e   : > { %v1505_v46 = vpop.eup %1504  ;;  %1530 = vrcp.f32 %v845_v40  ;;  %v844_v47 = vadd.f32 1.0, %v1503_v42  ;;  %v1947_v29 = vpop.f32.mrf.mxu1  ;;  %v1174_v33 = vmul.f32 -1.442695, %v398_v22 }
 0x10f   : > { %v1507_v51 = vpop.eup %1506  ;;  %1532 = vrcp.f32 %v877_v43  ;;  %v876_v52 = vadd.f32 1.0, %v1505_v46  ;;  %v1206_v35 = vmul.f32 -1.442695, %v558_v25  ;;  %v407_v36 = vpop.f32.mrf.mxu0  ;;  %v573_v7 = vadd.f32 %v1947_v29, %v1893_v16 }
 0x110   : > { %v1509_v55 = vpop.eup %1508  ;;  %1031 = vst [vmem:[%s1919_s29 + $0x8] sm:$0xff] %v1507_v51  ;;  %1534 = vrcp.f32 %v844_v47  ;;  %v567_v38 = vpop.f32.mrf.mxu1  ;;  %v408_v10 = vadd.f32 %v1893_v16, %v407_v36 }
 0x111   : > { %v1511_v58 = vpop.eup %1510  ;;  %1063 = vst [vmem:[%s1919_s29 + $0x108] sm:$0xff] %v1509_v55  ;;  %1536 = vrcp.f32 %v876_v52  ;;  %v1367_v44 = vpop.f32.mrf.mxu0 }
 0x112   : > { %v1513_v62 = vpop.eup %1512  ;;  %1030 = vst [vmem:[%s1919_s29] sm:$0xff] %v1511_v58  ;;  %1538 = vpow2.f32 %v1169_v48  ;;  %v1415_v47 = vpop.f32.mrf.mxu1  ;;  %v423_v19 = vadd.f32 %v1367_v44, %v1893_v16 }
 0x113   : > { %v1515_v2 = vpop.eup %1514  ;;  %1062 = vst [vmem:[%s1919_s29 + $0x100] sm:$0xff] %v1513_v62  ;;  %1540 = vpow2.f32 %v1201_v53  ;;  %v417_v54 = vpop.f32.mrf.mxu0 }
 0x114   : > { %v1517_v5 = vpop.eup %1516  ;;  %1033 = vst [vmem:[%s1919_s29 + $0x18] sm:$0xff] %v1515_v2  ;;  %1542 = vpow2.f32 %v1168_v56  ;;  %v577_v57 = vpop.f32.mrf.mxu1 }
 0x115   : > { %v1519_v8 = vpop.eup %1518  ;;  %1065 = vst [vmem:[%s1919_s29 + $0x118] sm:$0xff] %v1517_v5  ;;  %1544 = vpow2.f32 %v1200_v59  ;;  %v1370_v0 = vpop.f32.mrf.mxu0 }
 0x116   : > { %v1521_v12 = vpop.eup %1520  ;;  %1032 = vst [vmem:[%s1919_s29 + $0x10] sm:$0xff] %v1519_v8  ;;  %1546 = vpow2.f32 %v1171_v63  ;;  %v1418_v4 = vpop.f32.mrf.mxu1 }
 0x117   : > { %v1523_v17 = vpop.eup %1522  ;;  %1064 = vst [vmem:[%s1919_s29 + $0x110] sm:$0xff] %v1521_v12  ;;  %1548 = vpow2.f32 %v1203_v3  ;;  %v413_v3 = vadd.f32 %v1944_v26, %v1893_v16  ;;  %v427_v14 = vpop.f32.mrf.mxu0  ;;  %v1176_v26 = vmul.f32 -1.442695, %v408_v10 }
 0x118   : > { %v1525_v20 = vpop.eup %1524  ;;  %1035 = vst [vmem:[%s1919_s29 + $0x28] sm:$0xff] %v1523_v17  ;;  %1550 = vpow2.f32 %v1170_v6 }
 0x119   : > { %v1527_v23 = vpop.eup %1526  ;;  %1067 = vst [vmem:[%s1919_s29 + $0x128] sm:$0xff] %v1525_v20  ;;  %1552 = vpow2.f32 %v1202_v9  ;;  %v587_v20 = vpop.f32.mrf.mxu1 }
 0x11a   : > { %v1529_v27 = vpop.eup %1528  ;;  %1034 = vst [vmem:[%s1919_s29 + $0x20] sm:$0xff] %v1527_v23  ;;  %1554 = vpow2.f32 %v1173_v13  ;;  %v568_v13 = vadd.f32 %v1893_v16, %v567_v38  ;;  %v1209_v23 = vmul.f32 -1.442695, %v573_v7  ;;  %v593_v38 = vadd.f32 %v1418_v4, %v1893_v16 }
 0x11b   : > { %v1531_v30 = vpop.eup %1530  ;;  %1066 = vst [vmem:[%s1919_s29 + $0x120] sm:$0xff] %v1529_v27  ;;  %1556 = vpow2.f32 %v1205_v18  ;;  %v1177_v18 = vmul.f32 -1.442695, %v413_v3  ;;  %v418_v27 = vadd.f32 %v1893_v16, %v417_v54  ;;  %v588_v44 = vadd.f32 %v1893_v16, %v587_v20 }
 0x11c   : > { %v1533_v32 = vpop.eup %1532  ;;  %1037 = vst [vmem:[%s1919_s29 + $0x38] sm:$0xff] %v1531_v30  ;;  %1558 = vpow2.f32 %v1172_v21  ;;  %v1208_v29 = vmul.f32 -1.442695, %v568_v13  ;;  %v578_v30 = vadd.f32 %v1893_v16, %v577_v57 }
 0x11d   : > { %v1535_v34 = vpop.eup %1534  ;;  %1069 = vst [vmem:[%s1919_s29 + $0x138] sm:$0xff] %v1533_v32  ;;  %1560 = vpow2.f32 %v1204_v24  ;;  %v583_v24 = vadd.f32 %v1415_v47, %v1893_v16  ;;  %v1212_v57 = vmul.f32 -1.442695, %v588_v44 }
 0x11e   : > { %v1537_v37 = vpop.eup %1536  ;;  %1036 = vst [vmem:[%s1919_s29 + $0x30] sm:$0xff] %v1535_v34  ;;  %1562 = vpow2.f32 %v1175_v28  ;;  %v433_v34 = vadd.f32 %v1370_v0, %v1893_v16 }
 0x11f   : > { %v1539_v39 = vpop.eup %1538  ;;  %1068 = vst [vmem:[%s1919_s29 + $0x130] sm:$0xff] %v1537_v37  ;;  %1564 = vpow2.f32 %v1207_v31  ;;  %v1373_v31 = vpop.f32.mrf.mxu0  ;;  %v1211_v37 = vmul.f32 -1.442695, %v583_v24 }
 0x120   : > { %v1541_v40 = vpop.eup %1540  ;;  %v847_v41 = vadd.f32 1.0, %v1539_v39  ;;  %1566 = vpow2.f32 %v1174_v33  ;;  %v1179_v33 = vmul.f32 -1.442695, %v423_v19  ;;  %v1181_v47 = vmul.f32 -1.442695, %v433_v34 }
 0x121   : > { %v1543_v42 = vpop.eup %1542  ;;  %v879_v43 = vadd.f32 1.0, %v1541_v40  ;;  %1568 = vpow2.f32 %v1206_v35  ;;  %v1421_v35 = vpop.f32.mrf.mxu1  ;;  %v1178_v40 = vmul.f32 -1.442695, %v418_v27 }
 0x122   : > { %v1545_v45 = vpop.eup %1544  ;;  %1570 = vrcp.f32 %v847_v41  ;;  %v846_v46 = vadd.f32 1.0, %v1543_v42  ;;  %v428_v41 = vadd.f32 %v1893_v16, %v427_v14 }
 0x123   : > { %v1547_v48 = vpop.eup %1546  ;;  %1572 = vrcp.f32 %v879_v43  ;;  %v878_v49 = vadd.f32 1.0, %v1545_v45  ;;  %v1210_v43 = vmul.f32 -1.442695, %v578_v30  ;;  %v437_v45 = vpop.f32.mrf.mxu0 }
 0x124   : > { %v1549_v50 = vpop.eup %1548  ;;  %1574 = vrcp.f32 %v846_v46  ;;  %v849_v51 = vadd.f32 1.0, %v1547_v48  ;;  %v443_v48 = vadd.f32 %v1373_v31, %v1893_v16  ;;  %v1180_v54 = vmul.f32 -1.442695, %v428_v41 }
 0x125   : > { %v1551_v52 = vpop.eup %1550  ;;  %1576 = vrcp.f32 %v878_v49  ;;  %v881_v53 = vadd.f32 1.0, %v1549_v50  ;;  %v597_v49 = vpop.f32.mrf.mxu1 }
 0x126   : > { %v1553_v55 = vpop.eup %1552  ;;  %1578 = vrcp.f32 %v849_v51  ;;  %v848_v56 = vadd.f32 1.0, %v1551_v52  ;;  %v1213_v51 = vmul.f32 -1.442695, %v593_v38  ;;  %v603_v52 = vadd.f32 %v1421_v35, %v1893_v16 }
 0x127   : > { %v1555_v58 = vpop.eup %1554  ;;  %1580 = vrcp.f32 %v881_v53  ;;  %v880_v59 = vadd.f32 1.0, %v1553_v55  ;;  %v438_v55 = vadd.f32 %v1893_v16, %v437_v45 }
 0x128   : > { %v1557_v60 = vpop.eup %1556  ;;  %1582 = vrcp.f32 %v848_v56  ;;  %v851_v61 = vadd.f32 1.0, %v1555_v58  ;;  %v598_v58 = vadd.f32 %v1893_v16, %v597_v49  ;;  %v1215_v0 = vmul.f32 -1.442695, %v603_v52 }
 0x129   : > { %v1559_v62 = vpop.eup %1558  ;;  %1584 = vrcp.f32 %v880_v59  ;;  %v883_v63 = vadd.f32 1.0, %v1557_v60  ;;  %v1982_v59 = vpop.f32.mrf.mxu0 }
 0x12a   : > { %v1561_v1 = vpop.eup %1560  ;;  %1586 = vrcp.f32 %v851_v61  ;;  %v850_v2 = vadd.f32 1.0, %v1559_v62  ;;  %v1183_v61 = vmul.f32 -1.442695, %v443_v48  ;;  %v1985_v62 = vpop.f32.mrf.mxu1  ;;  %v1214_v4 = vmul.f32 -1.442695, %v598_v58 }
 0x12b   : > { %v1563_v5 = vpop.eup %1562  ;;  %1588 = vrcp.f32 %v883_v63  ;;  %v882_v6 = vadd.f32 1.0, %v1561_v1  ;;  %v613_v41 = vadd.f32 %v1985_v62, %v1893_v16 }
 0x12c   : > { %v1565_v8 = vpop.eup %1564  ;;  %1590 = vrcp.f32 %v850_v2  ;;  %v853_v9 = vadd.f32 1.0, %v1563_v5  ;;  %v1182_v2 = vmul.f32 -1.442695, %v438_v55  ;;  %v447_v5 = vpop.f32.mrf.mxu0 }
 0x12d   : > { %v1567_v11 = vpop.eup %1566  ;;  %1592 = vrcp.f32 %v882_v6  ;;  %v885_v12 = vadd.f32 1.0, %v1565_v8  ;;  %v607_v7 = vpop.f32.mrf.mxu1  ;;  %v448_v44 = vadd.f32 %v1893_v16, %v447_v5 }
 0x12e   : > { %v1569_v15 = vpop.eup %1568  ;;  %1594 = vrcp.f32 %v853_v9  ;;  %v852_v17 = vadd.f32 1.0, %v1567_v11  ;;  %v1379_v13 = vpop.f32.mrf.mxu0 }
 0x12f   : > { %v1571_v21 = vpop.eup %1570  ;;  %1596 = vrcp.f32 %v885_v12  ;;  %v884_v22 = vadd.f32 1.0, %v1569_v15  ;;  %v463_v52 = vadd.f32 %v1379_v13, %v1893_v16 }
 0x130   : > { %v1573_v25 = vpop.eup %1572  ;;  %1039 = vst [vmem:[%s1919_s29 + $0x48] sm:$0xff] %v1571_v21  ;;  %1598 = vrcp.f32 %v852_v17  ;;  %v1427_v17 = vpop.f32.mrf.mxu1 }
 0x131   : > { %v1575_v28 = vpop.eup %1574  ;;  %1071 = vst [vmem:[%s1919_s29 + $0x148] sm:$0xff] %v1573_v25  ;;  %1600 = vrcp.f32 %v884_v22  ;;  %v457_v24 = vpop.f32.mrf.mxu0 }
 0x132   : > { %v1577_v32 = vpop.eup %1576  ;;  %1038 = vst [vmem:[%s1919_s29 + $0x40] sm:$0xff] %v1575_v28  ;;  %1602 = vpow2.f32 %v1177_v18  ;;  %v617_v27 = vpop.f32.mrf.mxu1 }
 0x133   : > { %v1579_v36 = vpop.eup %1578  ;;  %1070 = vst [vmem:[%s1919_s29 + $0x140] sm:$0xff] %v1577_v32  ;;  %1604 = vpow2.f32 %v1209_v23  ;;  %v1382_v34 = vpop.f32.mrf.mxu0 }
 0x134   : > { %v1581_v39 = vpop.eup %1580  ;;  %1041 = vst [vmem:[%s1919_s29 + $0x58] sm:$0xff] %v1579_v36  ;;  %1606 = vpow2.f32 %v1176_v26  ;;  %v1430_v38 = vpop.f32.mrf.mxu1 }
 0x135   : > { %v1583_v42 = vpop.eup %1582  ;;  %1073 = vst [vmem:[%s1919_s29 + $0x158] sm:$0xff] %v1581_v39  ;;  %1608 = vpow2.f32 %v1208_v29  ;;  %v467_v48 = vpop.f32.mrf.mxu0 }
 0x136   : > { %v1585_v46 = vpop.eup %1584  ;;  %1040 = vst [vmem:[%s1919_s29 + $0x50] sm:$0xff] %v1583_v42  ;;  %1610 = vpow2.f32 %v1179_v33 }
 0x137   : > { %v1587_v50 = vpop.eup %1586  ;;  %1072 = vst [vmem:[%s1919_s29 + $0x150] sm:$0xff] %v1585_v46  ;;  %1612 = vpow2.f32 %v1211_v37  ;;  %v453_v37 = vadd.f32 %v1982_v59, %v1893_v16  ;;  %v1184_v59 = vmul.f32 -1.442695, %v448_v44 }
 0x138   : > { %v1589_v53 = vpop.eup %1588  ;;  %1043 = vst [vmem:[%s1919_s29 + $0x68] sm:$0xff] %v1587_v50  ;;  %1614 = vpow2.f32 %v1178_v40 }
 0x139   : > { %v1591_v56 = vpop.eup %1590  ;;  %1075 = vst [vmem:[%s1919_s29 + $0x168] sm:$0xff] %v1589_v53  ;;  %1616 = vpow2.f32 %v1210_v43  ;;  %v627_v53 = vpop.f32.mrf.mxu1 }
 0x13a   : > { %v1593_v60 = vpop.eup %1592  ;;  %1042 = vst [vmem:[%s1919_s29 + $0x60] sm:$0xff] %v1591_v56  ;;  %1618 = vpow2.f32 %v1181_v47  ;;  %v608_v47 = vadd.f32 %v1893_v16, %v607_v7  ;;  %v1217_v56 = vmul.f32 -1.442695, %v613_v41  ;;  %v633_v7 = vadd.f32 %v1430_v38, %v1893_v16 }
 0x13b   : > { %v1595_v63 = vpop.eup %1594  ;;  %1074 = vst [vmem:[%s1919_s29 + $0x160] sm:$0xff] %v1593_v60  ;;  %1620 = vpow2.f32 %v1213_v51  ;;  %v1185_v51 = vmul.f32 -1.442695, %v453_v37  ;;  %v458_v60 = vadd.f32 %v1893_v16, %v457_v24  ;;  %v628_v13 = vadd.f32 %v1893_v16, %v627_v53 }
 0x13c   : > { %v1597_v1 = vpop.eup %1596  ;;  %1045 = vst [vmem:[%s1919_s29 + $0x78] sm:$0xff] %v1595_v63  ;;  %1622 = vpow2.f32 %v1180_v54  ;;  %v1216_v62 = vmul.f32 -1.442695, %v608_v47  ;;  %v618_v63 = vadd.f32 %v1893_v16, %v617_v27 }
 0x13d   : > { %v1599_v3 = vpop.eup %1598  ;;  %1077 = vst [vmem:[%s1919_s29 + $0x178] sm:$0xff] %v1597_v1  ;;  %1624 = vpow2.f32 %v1212_v57  ;;  %v623_v57 = vadd.f32 %v1427_v17, %v1893_v16  ;;  %v1220_v27 = vmul.f32 -1.442695, %v628_v13 }
 0x13e   : > { %v1601_v6 = vpop.eup %1600  ;;  %1044 = vst [vmem:[%s1919_s29 + $0x70] sm:$0xff] %v1599_v3  ;;  %1626 = vpow2.f32 %v1183_v61  ;;  %v473_v3 = vadd.f32 %v1382_v34, %v1893_v16 }
 0x13f   : > { %v1603_v8 = vpop.eup %1602  ;;  %1076 = vst [vmem:[%s1919_s29 + $0x170] sm:$0xff] %v1601_v6  ;;  %1628 = vpow2.f32 %v1215_v0  ;;  %v1385_v0 = vpop.f32.mrf.mxu0  ;;  %v1219_v6 = vmul.f32 -1.442695, %v623_v57 }
 0x140   : > { %v1605_v9 = vpop.eup %1604  ;;  %v855_v10 = vadd.f32 1.0, %v1603_v8  ;;  %1630 = vpow2.f32 %v1182_v2  ;;  %v1187_v2 = vmul.f32 -1.442695, %v463_v52  ;;  %v1189_v17 = vmul.f32 -1.442695, %v473_v3 }
 0x141   : > { %v1607_v11 = vpop.eup %1606  ;;  %v887_v12 = vadd.f32 1.0, %v1605_v9  ;;  %1632 = vpow2.f32 %v1214_v4  ;;  %v1433_v4 = vpop.f32.mrf.mxu1  ;;  %v1186_v9 = vmul.f32 -1.442695, %v458_v60 }
 0x142   : > { %v1609_v14 = vpop.eup %1608  ;;  %1634 = vrcp.f32 %v855_v10  ;;  %v854_v15 = vadd.f32 1.0, %v1607_v11  ;;  %v468_v10 = vadd.f32 %v1893_v16, %v467_v48 }
 0x143   : > { %v1611_v18 = vpop.eup %1610  ;;  %1636 = vrcp.f32 %v887_v12  ;;  %v886_v19 = vadd.f32 1.0, %v1609_v14  ;;  %v1218_v12 = vmul.f32 -1.442695, %v618_v63  ;;  %v477_v14 = vpop.f32.mrf.mxu0 }
 0x144   : > { %v1613_v20 = vpop.eup %1612  ;;  %1638 = vrcp.f32 %v854_v15  ;;  %v857_v21 = vadd.f32 1.0, %v1611_v18  ;;  %v483_v18 = vadd.f32 %v1385_v0, %v1893_v16  ;;  %v1188_v24 = vmul.f32 -1.442695, %v468_v10 }
 0x145   : > { %v1615_v22 = vpop.eup %1614  ;;  %1640 = vrcp.f32 %v886_v19  ;;  %v889_v23 = vadd.f32 1.0, %v1613_v20  ;;  %v637_v19 = vpop.f32.mrf.mxu1 }
 0x146   : > { %v1617_v25 = vpop.eup %1616  ;;  %1642 = vrcp.f32 %v857_v21  ;;  %v856_v26 = vadd.f32 1.0, %v1615_v22  ;;  %v1221_v21 = vmul.f32 -1.442695, %v633_v7  ;;  %v643_v22 = vadd.f32 %v1433_v4, %v1893_v16 }
 0x147   : > { %v1619_v28 = vpop.eup %1618  ;;  %1644 = vrcp.f32 %v889_v23  ;;  %v888_v29 = vadd.f32 1.0, %v1617_v25  ;;  %v478_v25 = vadd.f32 %v1893_v16, %v477_v14 }
 0x148   : > { %v1621_v30 = vpop.eup %1620  ;;  %1646 = vrcp.f32 %v856_v26  ;;  %v859_v31 = vadd.f32 1.0, %v1619_v28  ;;  %v638_v28 = vadd.f32 %v1893_v16, %v637_v19 }
 0x149   : > { %v1623_v32 = vpop.eup %1622  ;;  %1648 = vrcp.f32 %v888_v29  ;;  %v891_v33 = vadd.f32 1.0, %v1621_v30  ;;  %v1191_v30 = vmul.f32 -1.442695, %v483_v18  ;;  %v1190_v34 = vmul.f32 -1.442695, %v478_v25 }
 0x14a   : > { %v1625_v35 = vpop.eup %1624  ;;  %1650 = vrcp.f32 %v859_v31  ;;  %v858_v36 = vadd.f32 1.0, %v1623_v32  ;;  %v1223_v32 = vmul.f32 -1.442695, %v643_v22 }
 0x14b   : > { %v1627_v39 = vpop.eup %1626  ;;  %1652 = vrcp.f32 %v891_v33  ;;  %v890_v40 = vadd.f32 1.0, %v1625_v35 }
 0x14c   : > { %v1629_v42 = vpop.eup %1628  ;;  %1654 = vrcp.f32 %v858_v36  ;;  %v861_v43 = vadd.f32 1.0, %v1627_v39  ;;  %v1222_v36 = vmul.f32 -1.442695, %v638_v28 }
 0x14d   : > { %v1631_v45 = vpop.eup %1630  ;;  %1656 = vrcp.f32 %v890_v40  ;;  %v893_v46 = vadd.f32 1.0, %v1629_v42 }
 0x14e   : > { %v1633_v49 = vpop.eup %1632  ;;  %1658 = vrcp.f32 %v861_v43  ;;  %v860_v50 = vadd.f32 1.0, %v1631_v45 }
 0x14f   : > { %v1635_v54 = vpop.eup %1634  ;;  %1660 = vrcp.f32 %v893_v46  ;;  %v892_v55 = vadd.f32 1.0, %v1633_v49 }
 0x150   : > { %v1637_v58 = vpop.eup %1636  ;;  %1047 = vst [vmem:[%s1919_s29 + $0x88] sm:$0xff] %v1635_v54  ;;  %1662 = vrcp.f32 %v860_v50 }
 0x151   : > { %v1639_v61 = vpop.eup %1638  ;;  %1079 = vst [vmem:[%s1919_s29 + $0x188] sm:$0xff] %v1637_v58  ;;  %1664 = vrcp.f32 %v892_v55 }
 0x152   : > { %v1641_v1 = vpop.eup %1640  ;;  %1046 = vst [vmem:[%s1919_s29 + $0x80] sm:$0xff] %v1639_v61  ;;  %1666 = vpow2.f32 %v1185_v51 }
 0x153   : > { %v1643_v5 = vpop.eup %1642  ;;  %1078 = vst [vmem:[%s1919_s29 + $0x180] sm:$0xff] %v1641_v1  ;;  %1668 = vpow2.f32 %v1217_v56 }
 0x154   : > { %v1645_v8 = vpop.eup %1644  ;;  %1049 = vst [vmem:[%s1919_s29 + $0x98] sm:$0xff] %v1643_v5  ;;  %1670 = vpow2.f32 %v1184_v59 }
 0x155   : > { %v1647_v11 = vpop.eup %1646  ;;  %1081 = vst [vmem:[%s1919_s29 + $0x198] sm:$0xff] %v1645_v8  ;;  %1672 = vpow2.f32 %v1216_v62 }
 0x156   : > { %v1649_v15 = vpop.eup %1648  ;;  %1048 = vst [vmem:[%s1919_s29 + $0x90] sm:$0xff] %v1647_v11  ;;  %1674 = vpow2.f32 %v1187_v2 }
 0x157   : > { %v1651_v20 = vpop.eup %1650  ;;  %1080 = vst [vmem:[%s1919_s29 + $0x190] sm:$0xff] %v1649_v15  ;;  %1676 = vpow2.f32 %v1219_v6 }
 0x158   : > { %v1653_v23 = vpop.eup %1652  ;;  %1051 = vst [vmem:[%s1919_s29 + $0xa8] sm:$0xff] %v1651_v20  ;;  %1678 = vpow2.f32 %v1186_v9 }
 0x159   : > { %v1655_v26 = vpop.eup %1654  ;;  %1083 = vst [vmem:[%s1919_s29 + $0x1a8] sm:$0xff] %v1653_v23  ;;  %1680 = vpow2.f32 %v1218_v12 }
 0x15a   : > { %v1657_v29 = vpop.eup %1656  ;;  %1050 = vst [vmem:[%s1919_s29 + $0xa0] sm:$0xff] %v1655_v26  ;;  %1682 = vpow2.f32 %v1189_v17 }
 0x15b   : > { %v1659_v31 = vpop.eup %1658  ;;  %1082 = vst [vmem:[%s1919_s29 + $0x1a0] sm:$0xff] %v1657_v29  ;;  %1684 = vpow2.f32 %v1221_v21 }
 0x15c   : > { %v1661_v33 = vpop.eup %1660  ;;  %1053 = vst [vmem:[%s1919_s29 + $0xb8] sm:$0xff] %v1659_v31  ;;  %1686 = vpow2.f32 %v1188_v24 }
 0x15d   : > { %v1663_v35 = vpop.eup %1662  ;;  %1085 = vst [vmem:[%s1919_s29 + $0x1b8] sm:$0xff] %v1661_v33  ;;  %1688 = vpow2.f32 %v1220_v27 }
 0x15e   : > { %v1665_v37 = vpop.eup %1664  ;;  %1052 = vst [vmem:[%s1919_s29 + $0xb0] sm:$0xff] %v1663_v35  ;;  %1690 = vpow2.f32 %v1191_v30 }
 0x15f   : > { %v1667_v16 = vpop.eup %1666  ;;  %1084 = vst [vmem:[%s1919_s29 + $0x1b0] sm:$0xff] %v1665_v37  ;;  %1692 = vpow2.f32 %v1223_v32 }
 0x160   : > { %v1669_v38 = vpop.eup %1668  ;;  %v863_v39 = vadd.f32 1.0, %v1667_v16  ;;  %1694 = vpow2.f32 %v1190_v34 }
 0x161   : > { %v1671_v40 = vpop.eup %1670  ;;  %v895_v41 = vadd.f32 1.0, %v1669_v38  ;;  %1696 = vpow2.f32 %v1222_v36 }
 0x162   : > { %v1673_v42 = vpop.eup %1672  ;;  %1698 = vrcp.f32 %v863_v39  ;;  %v862_v43 = vadd.f32 1.0, %v1671_v40 }
 0x163   : > { %v1675_v44 = vpop.eup %1674  ;;  %1700 = vrcp.f32 %v895_v41  ;;  %v894_v45 = vadd.f32 1.0, %v1673_v42 }
 0x164   : > { %v1677_v46 = vpop.eup %1676  ;;  %1702 = vrcp.f32 %v862_v43  ;;  %v865_v47 = vadd.f32 1.0, %v1675_v44 }
 0x165   : > { %v1679_v48 = vpop.eup %1678  ;;  %1704 = vrcp.f32 %v894_v45  ;;  %v897_v49 = vadd.f32 1.0, %v1677_v46 }
 0x166   : > { %v1681_v50 = vpop.eup %1680  ;;  %1706 = vrcp.f32 %v865_v47  ;;  %v864_v51 = vadd.f32 1.0, %v1679_v48 }
 0x167   : > { %v1683_v52 = vpop.eup %1682  ;;  %1708 = vrcp.f32 %v897_v49  ;;  %v896_v53 = vadd.f32 1.0, %v1681_v50 }
 0x168   : > { %v1685_v54 = vpop.eup %1684  ;;  %1710 = vrcp.f32 %v864_v51  ;;  %v867_v55 = vadd.f32 1.0, %v1683_v52 }
 0x169   : > { %v1687_v56 = vpop.eup %1686  ;;  %1712 = vrcp.f32 %v896_v53  ;;  %v899_v57 = vadd.f32 1.0, %v1685_v54 }
 0x16a   : > { %v1689_v58 = vpop.eup %1688  ;;  %1714 = vrcp.f32 %v867_v55  ;;  %v866_v59 = vadd.f32 1.0, %v1687_v56 }
 0x16b   : > { %v1691_v60 = vpop.eup %1690  ;;  %1716 = vrcp.f32 %v899_v57  ;;  %v898_v61 = vadd.f32 1.0, %v1689_v58 }
 0x16c   : > { %v1693_v62 = vpop.eup %1692  ;;  %1718 = vrcp.f32 %v866_v59  ;;  %v869_v63 = vadd.f32 1.0, %v1691_v60 }
 0x16d   : > { %v1695_v0 = vpop.eup %1694  ;;  %1720 = vrcp.f32 %v898_v61  ;;  %v901_v1 = vadd.f32 1.0, %v1693_v62 }
 0x16e   : > { %v1697_v2 = vpop.eup %1696  ;;  %1722 = vrcp.f32 %v869_v63  ;;  %v868_v3 = vadd.f32 1.0, %v1695_v0 }
 0x16f   : > { %v1699_v4 = vpop.eup %1698  ;;  %1724 = vrcp.f32 %v901_v1  ;;  %v900_v5 = vadd.f32 1.0, %v1697_v2 }
 0x170   : > { %v1701_v6 = vpop.eup %1700  ;;  %1055 = vst [vmem:[%s1919_s29 + $0xc8] sm:$0xff] %v1699_v4  ;;  %1726 = vrcp.f32 %v868_v3 }
 0x171   : > { %v1703_v7 = vpop.eup %1702  ;;  %1087 = vst [vmem:[%s1919_s29 + $0x1c8] sm:$0xff] %v1701_v6  ;;  %1728 = vrcp.f32 %v900_v5 }
 0x172   : > { %v1705_v8 = vpop.eup %1704  ;;  %1054 = vst [vmem:[%s1919_s29 + $0xc0] sm:$0xff] %v1703_v7 }
 0x173   : > { %v1707_v9 = vpop.eup %1706  ;;  %1086 = vst [vmem:[%s1919_s29 + $0x1c0] sm:$0xff] %v1705_v8 }
 0x174   : > { %v1709_v10 = vpop.eup %1708  ;;  %1057 = vst [vmem:[%s1919_s29 + $0xd8] sm:$0xff] %v1707_v9 }
 0x175   : > { %v1711_v11 = vpop.eup %1710  ;;  %1089 = vst [vmem:[%s1919_s29 + $0x1d8] sm:$0xff] %v1709_v10 }
 0x176   : > { %v1713_v12 = vpop.eup %1712  ;;  %1056 = vst [vmem:[%s1919_s29 + $0xd0] sm:$0xff] %v1711_v11 }
 0x177   : > { %v1715_v13 = vpop.eup %1714  ;;  %1088 = vst [vmem:[%s1919_s29 + $0x1d0] sm:$0xff] %v1713_v12 }
 0x178   : > { %v1717_v14 = vpop.eup %1716  ;;  %1059 = vst [vmem:[%s1919_s29 + $0xe8] sm:$0xff] %v1715_v13 }
 0x179   : > { %v1719_v15 = vpop.eup %1718  ;;  %1091 = vst [vmem:[%s1919_s29 + $0x1e8] sm:$0xff] %v1717_v14 }
 0x17a   : > { %v1721_v17 = vpop.eup %1720  ;;  %1058 = vst [vmem:[%s1919_s29 + $0xe0] sm:$0xff] %v1719_v15 }
 0x17b   : > { %v1723_v18 = vpop.eup %1722  ;;  %1090 = vst [vmem:[%s1919_s29 + $0x1e0] sm:$0xff] %v1721_v17 }
 0x17c   : > { %v1725_v19 = vpop.eup %1724  ;;  %1061 = vst [vmem:[%s1919_s29 + $0xf8] sm:$0xff] %v1723_v18 }
 0x17d   : > { %v1727_v20 = vpop.eup %1726  ;;  %1093 = vst [vmem:[%s1919_s29 + $0x1f8] sm:$0xff] %v1725_v19 }
 0x17e   : > { %v1729_v21 = vpop.eup %1728  ;;  %1060 = vst [vmem:[%s1919_s29 + $0xf0] sm:$0xff] %v1727_v20 }
 0x17f   : > { %1092 = vst [vmem:[%s1919_s29 + $0x1f0] sm:$0xff] %v1729_v21 }
 0x180 PF: > { %s13_s12 = sadd.s32 1, %s1736_s12  }
 0x181   : > { %p10_p4 = scmp.ge.s32.totalorder %s13_s12, 6  }
 0x183   :  { %12 = sbr.rel (!%p10_p4) target bundleno = 1 (0x1), region = 62 }

</bundles_post_ra>
